<compile_context>
chip_gen: v7x
topology: tpu7x:2x2x1
jax: 0.10.0
libtpu: 0.0.40
codegen_flags: <defaults>
</compile_context>

<pallas_src>
import functools
import math

import jax
import jax.numpy as jnp
from jax.experimental import pallas as pl
from jax.experimental.pallas import tpu as pltpu

# ----- small synthetic config (module defaults scaled down for a quick run) -----
N_EMBED = 128          # multiple of 128 lanes
NUM_HEADS = 8
HEAD_DIM = N_EMBED // NUM_HEADS
NUM_EXPERTS = 8
TOP_K = 2
LN_EPS = 1e-5


# ------------------------------- Pallas kernels --------------------------------

def _mha_ln_kernel(q_ref, kv_ref, wq_ref, bq_ref, wk_ref, bk_ref, wv_ref, bv_ref,
                   wo_ref, bo_ref, g_ref, beta_ref, o_ref, *, num_heads, scale):
    """Fused multi-head attention + residual + LayerNorm for one batch element.

    q_ref  : (1, Tq, D)  f32   (query input; also the residual branch)
    kv_ref : (1, Tkv, D) f32   (key/value input)
    wq/wk/wv_ref : (H, D, Dh) bf16 per-head projection weights
    bq/bk/bv_ref : (H, 1, Dh) f32 per-head biases
    wo_ref : (H, Dh, D) bf16   per-head slice of the output projection
    bo_ref, g_ref, beta_ref : (1, D) f32
    o_ref  : (1, Tq, D) f32 = LayerNorm(q_in + attn_out)
    """
    xq = q_ref[0]                                    # (Tq, D) f32
    xkv = kv_ref[0]                                  # (Tkv, D) f32
    xq_b = xq.astype(jnp.bfloat16)
    xkv_b = xkv.astype(jnp.bfloat16)
    Tq, D = xq.shape

    out = jnp.zeros((Tq, D), jnp.float32)
    for h in range(num_heads):                       # static unroll; all inside one kernel
        qh = jnp.dot(xq_b, wq_ref[h], preferred_element_type=jnp.float32) + bq_ref[h]
        kh = jnp.dot(xkv_b, wk_ref[h], preferred_element_type=jnp.float32) + bk_ref[h]
        vh = jnp.dot(xkv_b, wv_ref[h], preferred_element_type=jnp.float32) + bv_ref[h]
        s = jax.lax.dot_general(
            qh.astype(jnp.bfloat16), kh.astype(jnp.bfloat16),
            (((1,), (1,)), ((), ())), preferred_element_type=jnp.float32) * scale
        s = s - jnp.max(s, axis=-1, keepdims=True)
        p = jnp.exp(s)
        p = p * pl.reciprocal(jnp.sum(p, axis=-1, keepdims=True), approx=True)
        ctx = jnp.dot(p.astype(jnp.bfloat16), vh.astype(jnp.bfloat16),
                      preferred_element_type=jnp.float32)            # (Tq, Dh)
        out = out + jnp.dot(ctx.astype(jnp.bfloat16), wo_ref[h],
                            preferred_element_type=jnp.float32)      # (Tq, D)

    hres = xq + out + bo_ref[...]                    # residual + output-proj bias
    mean = jnp.mean(hres, axis=-1, keepdims=True)
    var = jnp.mean(jnp.square(hres - mean), axis=-1, keepdims=True)
    o_ref[0] = (hres - mean) * jax.lax.rsqrt(var + LN_EPS) * g_ref[...] + beta_ref[...]


def fused_mha_ln(q_in, kv_in, p, gamma, beta):
    """q_in: (B, Tq, D), kv_in: (B, Tkv, D) -> LayerNorm(q_in + MHA(q_in, kv_in, kv_in))."""
    B, Tq, D = q_in.shape
    Tkv = kv_in.shape[1]
    Hn, Dh = NUM_HEADS, HEAD_DIM
    scale = 1.0 / math.sqrt(Dh)

    # Pre-split weights per head (cheap one-time layout work outside the kernel).
    wq_h = p["wq"].reshape(D, Hn, Dh).transpose(1, 0, 2).astype(jnp.bfloat16)   # (H, D, Dh)
    wk_h = p["wk"].reshape(D, Hn, Dh).transpose(1, 0, 2).astype(jnp.bfloat16)
    wv_h = p["wv"].reshape(D, Hn, Dh).transpose(1, 0, 2).astype(jnp.bfloat16)
    bq_h = p["bq"].reshape(Hn, 1, Dh)
    bk_h = p["bk"].reshape(Hn, 1, Dh)
    bv_h = p["bv"].reshape(Hn, 1, Dh)
    wo_h = p["wo"].reshape(Hn, Dh, D).astype(jnp.bfloat16)                      # (H, Dh, D)
    bo2 = p["bo"].reshape(1, D)
    g2 = gamma.reshape(1, D)
    b2 = beta.reshape(1, D)

    kernel = functools.partial(_mha_ln_kernel, num_heads=Hn, scale=scale)
    return pl.pallas_call(
        kernel,
        out_shape=jax.ShapeDtypeStruct((B, Tq, D), jnp.float32),
        grid=(B,),
        in_specs=[
            pl.BlockSpec((1, Tq, D), lambda b: (b, 0, 0)),
            pl.BlockSpec((1, Tkv, D), lambda b: (b, 0, 0)),
            pl.BlockSpec((Hn, D, Dh), lambda b: (0, 0, 0)),
            pl.BlockSpec((Hn, 1, Dh), lambda b: (0, 0, 0)),
            pl.BlockSpec((Hn, D, Dh), lambda b: (0, 0, 0)),
            pl.BlockSpec((Hn, 1, Dh), lambda b: (0, 0, 0)),
            pl.BlockSpec((Hn, D, Dh), lambda b: (0, 0, 0)),
            pl.BlockSpec((Hn, 1, Dh), lambda b: (0, 0, 0)),
            pl.BlockSpec((Hn, Dh, D), lambda b: (0, 0, 0)),
            pl.BlockSpec((1, D), lambda b: (0, 0)),
            pl.BlockSpec((1, D), lambda b: (0, 0)),
            pl.BlockSpec((1, D), lambda b: (0, 0)),
        ],
        out_specs=pl.BlockSpec((1, Tq, D), lambda b: (b, 0, 0)),
        compiler_params=pltpu.CompilerParams(dimension_semantics=("parallel",)),
    )(q_in, kv_in, wq_h, bq_h, wk_h, bk_h, wv_h, bv_h, wo_h, bo2, g2, b2)


def _router_kernel(x_ref, w_ref, b_ref, o_ref):
    # Fused router: [logits | raw_noise] = x @ [Wr | Wn] + [br | bn]
    o_ref[...] = (
        jnp.dot(x_ref[...].astype(jnp.bfloat16), w_ref[...],
                preferred_element_type=jnp.float32) + b_ref[...]
    )


def router_project(x_flat, w, b):
    """x_flat: (N, D); w: (D, 2E); b: (2E,) -> (N, 2E) f32."""
    N, D = x_flat.shape
    Dout = w.shape[1]
    return pl.pallas_call(
        _router_kernel,
        out_shape=jax.ShapeDtypeStruct((N, Dout), jnp.float32),
        grid=(1,),
        in_specs=[
            pl.BlockSpec((N, D), lambda i: (0, 0)),
            pl.BlockSpec((D, Dout), lambda i: (0, 0)),
            pl.BlockSpec((1, Dout), lambda i: (0, 0)),
        ],
        out_specs=pl.BlockSpec((N, Dout), lambda i: (0, 0)),
    )(x_flat, w.astype(jnp.bfloat16), b.reshape(1, Dout))


def _moe_ln_kernel(count_ref, x_ref, probs_ref, w1_ref, b1_ref, w2_ref, b2_ref,
                   g_ref, beta_ref, o_ref, acc_ref):
    """Grid axis = expert index. Accumulate probs[:, e] * Expert_e(x) into a VMEM scratch,
    skipping experts with zero routed tokens; fuse residual + LayerNorm at the last expert."""
    e = pl.program_id(0)

    @pl.when(e == 0)
    def _init():
        acc_ref[...] = jnp.zeros_like(acc_ref)

    @pl.when(count_ref[e] > 0)
    def _compute():
        x_b = x_ref[...].astype(jnp.bfloat16)
        h = jnp.dot(x_b, w1_ref[0], preferred_element_type=jnp.float32) + b1_ref[0]
        h = jnp.maximum(h, 0.0)                                           # ReLU
        y = jnp.dot(h.astype(jnp.bfloat16), w2_ref[0],
                    preferred_element_type=jnp.float32) + b2_ref[0]
        # Select column e of the (N, E) probs block without lane-sparse DMAs.
        lane = jax.lax.broadcasted_iota(jnp.int32, probs_ref.shape, 1)
        p_col = jnp.sum(jnp.where(lane == e, probs_ref[...], 0.0),
                        axis=-1, keepdims=True)                           # (N, 1)
        acc_ref[...] += p_col * y

    @pl.when(e == NUM_EXPERTS - 1)
    def _finalize():
        hsum = x_ref[...] + acc_ref[...]                                  # residual
        mean = jnp.mean(hsum, axis=-1, keepdims=True)
        var = jnp.mean(jnp.square(hsum - mean), axis=-1, keepdims=True)
        o_ref[...] = (hsum - mean) * jax.lax.rsqrt(var + LN_EPS) * g_ref[...] + beta_ref[...]


def moe_experts_ln(x_flat, probs, counts, mp, gamma, beta):
    """x_flat: (N, D), probs: (N, E) (zero outside top-k), counts: (E,) int32.
    Returns LayerNorm(x_flat + sum_e probs[:, e] * Expert_e(x_flat))."""
    N, D = x_flat.shape
    H4 = 4 * D
    E = NUM_EXPERTS
    g2 = gamma.reshape(1, D)
    b2 = beta.reshape(1, D)
    w1 = mp["w1"].astype(jnp.bfloat16)
    w2 = mp["w2"].astype(jnp.bfloat16)

    grid_spec = pltpu.PrefetchScalarGridSpec(
        num_scalar_prefetch=1,
        grid=(E,),
        in_specs=[
            pl.BlockSpec((N, D), lambda e, c: (0, 0)),
            pl.BlockSpec((N, E), lambda e, c: (0, 0)),
            pl.BlockSpec((1, D, H4), lambda e, c: (e, 0, 0)),
            pl.BlockSpec((1, 1, H4), lambda e, c: (e, 0, 0)),
            pl.BlockSpec((1, H4, D), lambda e, c: (e, 0, 0)),
            pl.BlockSpec((1, 1, D), lambda e, c: (e, 0, 0)),
            pl.BlockSpec((1, D), lambda e, c: (0, 0)),
            pl.BlockSpec((1, D), lambda e, c: (0, 0)),
        ],
        out_specs=pl.BlockSpec((N, D), lambda e, c: (0, 0)),
        scratch_shapes=[pltpu.VMEM((N, D), jnp.float32)],
    )
    return pl.pallas_call(
        _moe_ln_kernel,
        out_shape=jax.ShapeDtypeStruct((N, D), jnp.float32),
        grid_spec=grid_spec,
        compiler_params=pltpu.CompilerParams(dimension_semantics=("arbitrary",)),
    )(counts, x_flat, probs, w1, mp["b1"], w2, mp["b2"], g2, b2)


# ------------------------------- model (JAX glue) -------------------------------

def noisy_topk_router(x_flat, rp, rng_key):
    raw = router_project(x_flat, rp["w"], rp["b"])                    # (N, 2E)
    logits = raw[:, :NUM_EXPERTS]
    noise_scale = jax.nn.softplus(raw[:, NUM_EXPERTS:])
    noise = jax.random.normal(rng_key, logits.shape, jnp.float32) * noise_scale
    noisy = logits + noise
    _, top_idx = jax.lax.top_k(noisy, TOP_K)                          # (N, K)
    sel = jax.nn.one_hot(top_idx, NUM_EXPERTS, dtype=jnp.float32).sum(axis=1)  # (N, E)
    masked = jnp.where(sel > 0, noisy, -jnp.inf)
    probs = jax.nn.softmax(masked, axis=-1)                           # zero outside top-k
    lb_loss = NUM_EXPERTS * jnp.sum(probs.mean(axis=0) * sel.mean(axis=0))
    counts = sel.sum(axis=0).astype(jnp.int32)                        # tokens routed per expert
    return probs, counts, lb_loss


def sparse_moe_ln(x_flat, mp, gamma, beta, rng_key):
    probs, counts, lb = noisy_topk_router(x_flat, mp["router"], rng_key)
    out = moe_experts_ln(x_flat, probs, counts, mp, gamma, beta)
    return out, lb


def decoder_layer(p, x, enc, rng_key):
    """Equivalent of DecoderLayer.forward(x, enc) with past_kv=None, use_cache=False."""
    B, T, D = x.shape
    x1 = fused_mha_ln(x, x, p["self_attn"], p["ln1_g"], p["ln1_b"])       # norm1(x + self_attn)
    x2 = fused_mha_ln(x1, enc, p["cross_attn"], p["ln2_g"], p["ln2_b"])   # norm2(x + cross_attn)
    out_flat, lb = sparse_moe_ln(x2.reshape(B * T, D), p["moe"],
                                 p["ln3_g"], p["ln3_b"], rng_key)         # norm3(x + moe)
    return out_flat.reshape(B, T, D), lb


# ------------------------------- parameter init ---------------------------------

def init_decoder_layer_params(key):
    ks = iter(jax.random.split(key, 128))

    def lin(din, dout):
        lim = 1.0 / math.sqrt(din)
        w = jax.random.uniform(next(ks), (din, dout), jnp.float32, -lim, lim)
        b = jax.random.uniform(next(ks), (dout,), jnp.float32, -lim, lim)
        return w, b

    def mha_p():
        p = {}
        for name in ("q", "k", "v", "o"):
            w, b = lin(N_EMBED, N_EMBED)
            p["w" + name], p["b" + name] = w, b
        return p

    def moe_p():
        D, H4 = N_EMBED, 4 * N_EMBED
        l1, l2 = 1.0 / math.sqrt(D), 1.0 / math.sqrt(H4)
        wr, br = lin(D, NUM_EXPERTS)
        wn, bn = lin(D, NUM_EXPERTS)
        return {
            "router": {"w": jnp.concatenate([wr, wn], axis=1),      # (D, 2E) fused
                       "b": jnp.concatenate([br, bn], axis=0)},     # (2E,)
            "w1": jax.random.uniform(next(ks), (NUM_EXPERTS, D, H4), jnp.float32, -l1, l1),
            "b1": jax.random.uniform(next(ks), (NUM_EXPERTS, 1, H4), jnp.float32, -l1, l1),
            "w2": jax.random.uniform(next(ks), (NUM_EXPERTS, H4, D), jnp.float32, -l2, l2),
            "b2": jax.random.uniform(next(ks), (NUM_EXPERTS, 1, D), jnp.float32, -l2, l2),
        }

    def ln_p():
        return jnp.ones((N_EMBED,), jnp.float32), jnp.zeros((N_EMBED,), jnp.float32)

    g1, b1 = ln_p()
    g2, b2 = ln_p()
    g3, b3 = ln_p()
    return {
        "self_attn": mha_p(),
        "cross_attn": mha_p(),
        "ln1_g": g1, "ln1_b": b1,
        "ln2_g": g2, "ln2_b": b2,
        "ln3_g": g3, "ln3_b": b3,
        "moe": moe_p(),
    }


# ------------------------------------ main ---------------------------------------

if __name__ == "__main__":
    key = jax.random.PRNGKey(0)
    pk, xk, ek, rk = jax.random.split(key, 4)

    params = init_decoder_layer_params(pk)

    B, T, Ts = 2, 8, 8
    x = 0.02 * jax.random.normal(xk, (B, T, N_EMBED), jnp.float32)     # decoder hidden states
    enc = 0.02 * jax.random.normal(ek, (B, Ts, N_EMBED), jnp.float32)  # encoder output

    fwd = jax.jit(decoder_layer)
    out, lb_loss = fwd(params, x, enc, rk)
    out, lb_loss = jax.block_until_ready((out, lb_loss))

    assert out.shape == (B, T, N_EMBED)
    assert jnp.isfinite(out).all()
    assert jnp.isfinite(lb_loss)
    print("KERNEL_OK")
</pallas_src>

<mosaic_0001>
module attributes {stable_mosaic.version = 11 : i64} {
  func.func @_router_kernel(%arg0: i32, %arg1: memref<16x128xf32, #tpu.memory_space<vmem>>, %arg2: memref<128x16xbf16, #tpu.memory_space<vmem>>, %arg3: memref<1x16xf32, #tpu.memory_space<vmem>>, %arg4: memref<16x16xf32, #tpu.memory_space<vmem>>) attributes {dimension_semantics = [#tpu.dimension_semantics<arbitrary>], iteration_bounds = array<i64: 1>, scalar_prefetch = 0 : i64, scratch_operands = 0 : i64, tpu.core_type = #tpu.core_type<tc>, window_params = [{pipeline_mode = #tpu.pipeline_mode<synchronous>, transform_indices = @transform_0, window_bounds = array<i64: 16, 128>}, {pipeline_mode = #tpu.pipeline_mode<synchronous>, transform_indices = @transform_1, window_bounds = array<i64: 128, 16>}, {pipeline_mode = #tpu.pipeline_mode<synchronous>, transform_indices = @transform_2, window_bounds = array<i64: 1, 16>}, {pipeline_mode = #tpu.pipeline_mode<synchronous>, transform_indices = @transform_3, window_bounds = array<i64: 16, 16>}]} {
    %c0 = arith.constant 0 : index
    %c0_0 = arith.constant 0 : index
    %0 = vector.load %arg1[%c0, %c0_0] : memref<16x128xf32, #tpu.memory_space<vmem>>, vector<16x128xf32>
    %1 = arith.truncf %0 : vector<16x128xf32> to vector<16x128xbf16>
    %c0_1 = arith.constant 0 : index
    %c0_2 = arith.constant 0 : index
    %2 = vector.load %arg2[%c0_1, %c0_2] : memref<128x16xbf16, #tpu.memory_space<vmem>>, vector<128x16xbf16>
    %cst = arith.constant dense<0.000000e+00> : vector<16x16xf32>
    %3 = tpu.matmul %1, %2, %cst {dimension_numbers = #tpu.dot_dimension_numbers<[1], [0], [0], [1], [0, 0, 1, 1], [], []>} : vector<16x128xbf16>, vector<128x16xbf16>, vector<16x16xf32> -> vector<16x16xf32>
    %c0_3 = arith.constant 0 : index
    %c0_4 = arith.constant 0 : index
    %4 = vector.load %arg3[%c0_3, %c0_4] : memref<1x16xf32, #tpu.memory_space<vmem>>, vector<1x16xf32>
    %5 = vector.broadcast %4 : vector<1x16xf32> to vector<16x16xf32>
    %6 = arith.addf %3, %5 : vector<16x16xf32>
    %c0_5 = arith.constant 0 : index
    %c0_6 = arith.constant 0 : index
    %7 = vector.load %arg4[%c0_5, %c0_6] : memref<16x16xf32, #tpu.memory_space<vmem>>, vector<16x16xf32>
    tpu.vector_store %arg4[%c0_5, %c0_6], %6 {strides = array<i32>} : memref<16x16xf32, #tpu.memory_space<vmem>>, vector<16x16xf32>,
    return
  }
  func.func @transform_0(%arg0: i32) -> (i32, i32) {
    %c0_i32 = arith.constant 0 : i32
    %c0_i32_0 = arith.constant 0 : i32
    %c0_i32_1 = arith.constant 0 : i32
    return %c0_i32, %c0_i32_0 : i32, i32
  }
  func.func @transform_1(%arg0: i32) -> (i32, i32) {
    %c0_i32 = arith.constant 0 : i32
    %c0_i32_0 = arith.constant 0 : i32
    %c0_i32_1 = arith.constant 0 : i32
    return %c0_i32, %c0_i32_0 : i32, i32
  }
  func.func @transform_2(%arg0: i32) -> (i32, i32) {
    %c0_i32 = arith.constant 0 : i32
    %c0_i32_0 = arith.constant 0 : i32
    %c0_i32_1 = arith.constant 0 : i32
    return %c0_i32, %c0_i32_0 : i32, i32
  }
  func.func @transform_3(%arg0: i32) -> (i32, i32) {
    %c0_i32 = arith.constant 0 : i32
    %c0_i32_0 = arith.constant 0 : i32
    %c0_i32_1 = arith.constant 0 : i32
    return %c0_i32, %c0_i32_0 : i32, i32
  }
}

module attributes {stable_mosaic.version = 11 : i64} {
  func.func @_mha_ln_kernel(%arg0: i32, %arg1: memref<1x8x128xf32, #tpu.memory_space<vmem>>, %arg2: memref<1x8x128xf32, #tpu.memory_space<vmem>>, %arg3: memref<8x128x16xbf16, #tpu.memory_space<vmem>>, %arg4: memref<8x1x16xf32, #tpu.memory_space<vmem>>, %arg5: memref<8x128x16xbf16, #tpu.memory_space<vmem>>, %arg6: memref<8x1x16xf32, #tpu.memory_space<vmem>>, %arg7: memref<8x128x16xbf16, #tpu.memory_space<vmem>>, %arg8: memref<8x1x16xf32, #tpu.memory_space<vmem>>, %arg9: memref<8x16x128xbf16, #tpu.memory_space<vmem>>, %arg10: memref<1x128xf32, #tpu.memory_space<vmem>>, %arg11: memref<1x128xf32, #tpu.memory_space<vmem>>, %arg12: memref<1x128xf32, #tpu.memory_space<vmem>>, %arg13: memref<1x8x128xf32, #tpu.memory_space<vmem>>) attributes {dimension_semantics = [#tpu.dimension_semantics<parallel>], iteration_bounds = array<i64: 2>, scalar_prefetch = 0 : i64, scratch_operands = 0 : i64, tpu.core_type = #tpu.core_type<tc>, window_params = [{transform_indices = @transform_0, window_bounds = array<i64: 1, 8, 128>}, {transform_indices = @transform_1, window_bounds = array<i64: 1, 8, 128>}, {pipeline_mode = #tpu.pipeline_mode<synchronous>, transform_indices = @transform_2, window_bounds = array<i64: 8, 128, 16>}, {pipeline_mode = #tpu.pipeline_mode<synchronous>, transform_indices = @transform_3, window_bounds = array<i64: 8, 1, 16>}, {pipeline_mode = #tpu.pipeline_mode<synchronous>, transform_indices = @transform_4, window_bounds = array<i64: 8, 128, 16>}, {pipeline_mode = #tpu.pipeline_mode<synchronous>, transform_indices = @transform_5, window_bounds = array<i64: 8, 1, 16>}, {pipeline_mode = #tpu.pipeline_mode<synchronous>, transform_indices = @transform_6, window_bounds = array<i64: 8, 128, 16>}, {pipeline_mode = #tpu.pipeline_mode<synchronous>, transform_indices = @transform_7, window_bounds = array<i64: 8, 1, 16>}, {pipeline_mode = #tpu.pipeline_mode<synchronous>, transform_indices = @transform_8, window_bounds = array<i64: 8, 16, 128>}, {pipeline_mode = #tpu.pipeline_mode<synchronous>, transform_indices = @transform_9, window_bounds = array<i64: 1, 128>}, {pipeline_mode = #tpu.pipeline_mode<synchronous>, transform_indices = @transform_10, window_bounds = array<i64: 1, 128>}, {pipeline_mode = #tpu.pipeline_mode<synchronous>, transform_indices = @transform_11, window_bounds = array<i64: 1, 128>}, {transform_indices = @transform_12, window_bounds = array<i64: 1, 8, 128>}]} {
    %c0 = arith.constant 0 : index
    %c0_0 = arith.constant 0 : index
    %c0_1 = arith.constant 0 : index
    %0 = vector.load %arg1[%c0, %c0_0, %c0_1] : memref<1x8x128xf32, #tpu.memory_space<vmem>>, vector<1x8x128xf32>
    %1 = vector.shape_cast %0 : vector<1x8x128xf32> to vector<8x128xf32>
    %c0_2 = arith.constant 0 : index
    %c0_3 = arith.constant 0 : index
    %c0_4 = arith.constant 0 : index
    %2 = vector.load %arg2[%c0_2, %c0_3, %c0_4] : memref<1x8x128xf32, #tpu.memory_space<vmem>>, vector<1x8x128xf32>
    %3 = vector.shape_cast %2 : vector<1x8x128xf32> to vector<8x128xf32>
    %4 = arith.truncf %1 : vector<8x128xf32> to vector<8x128xbf16>
    %5 = arith.truncf %3 : vector<8x128xf32> to vector<8x128xbf16>
    %cst = arith.constant 0.000000e+00 : f32
    %6 = vector.broadcast %cst : f32 to vector<8x128xf32>
    %c0_5 = arith.constant 0 : index
    %c0_6 = arith.constant 0 : index
    %c0_7 = arith.constant 0 : index
    %7 = vector.load %arg3[%c0_5, %c0_6, %c0_7] : memref<8x128x16xbf16, #tpu.memory_space<vmem>>, vector<1x128x16xbf16>
    %8 = vector.shape_cast %7 : vector<1x128x16xbf16> to vector<128x16xbf16>
    %cst_8 = arith.constant dense<0.000000e+00> : vector<8x16xf32>
    %9 = tpu.matmul %4, %8, %cst_8 {dimension_numbers = #tpu.dot_dimension_numbers<[1], [0], [0], [1], [0, 0, 1, 1], [], []>} : vector<8x128xbf16>, vector<128x16xbf16>, vector<8x16xf32> -> vector<8x16xf32>
    %c0_9 = arith.constant 0 : index
    %c0_10 = arith.constant 0 : index
    %c0_11 = arith.constant 0 : index
    %10 = vector.load %arg4[%c0_9, %c0_10, %c0_11] : memref<8x1x16xf32, #tpu.memory_space<vmem>>, vector<1x1x16xf32>
    %11 = vector.shape_cast %10 : vector<1x1x16xf32> to vector<1x16xf32>
    %12 = vector.broadcast %11 : vector<1x16xf32> to vector<8x16xf32>
    %13 = arith.addf %9, %12 : vector<8x16xf32>
    %c0_12 = arith.constant 0 : index
    %c0_13 = arith.constant 0 : index
    %c0_14 = arith.constant 0 : index
    %14 = vector.load %arg5[%c0_12, %c0_13, %c0_14] : memref<8x128x16xbf16, #tpu.memory_space<vmem>>, vector<1x128x16xbf16>
    %15 = vector.shape_cast %14 : vector<1x128x16xbf16> to vector<128x16xbf16>
    %cst_15 = arith.constant dense<0.000000e+00> : vector<8x16xf32>
    %16 = tpu.matmul %5, %15, %cst_15 {dimension_numbers = #tpu.dot_dimension_numbers<[1], [0], [0], [1], [0, 0, 1, 1], [], []>} : vector<8x128xbf16>, vector<128x16xbf16>, vector<8x16xf32> -> vector<8x16xf32>
    %c0_16 = arith.constant 0 : index
    %c0_17 = arith.constant 0 : index
    %c0_18 = arith.constant 0 : index
    %17 = vector.load %arg6[%c0_16, %c0_17, %c0_18] : memref<8x1x16xf32, #tpu.memory_space<vmem>>, vector<1x1x16xf32>
    %18 = vector.shape_cast %17 : vector<1x1x16xf32> to vector<1x16xf32>
    %19 = vector.broadcast %18 : vector<1x16xf32> to vector<8x16xf32>
    %20 = arith.addf %16, %19 : vector<8x16xf32>
    %c0_19 = arith.constant 0 : index
    %c0_20 = arith.constant 0 : index
    %c0_21 = arith.constant 0 : index
    %21 = vector.load %arg7[%c0_19, %c0_20, %c0_21] : memref<8x128x16xbf16, #tpu.memory_space<vmem>>, vector<1x128x16xbf16>
    %22 = vector.shape_cast %21 : vector<1x128x16xbf16> to vector<128x16xbf16>
    %cst_22 = arith.constant dense<0.000000e+00> : vector<8x16xf32>
    %23 = tpu.matmul %5, %22, %cst_22 {dimension_numbers = #tpu.dot_dimension_numbers<[1], [0], [0], [1], [0, 0, 1, 1], [], []>} : vector<8x128xbf16>, vector<128x16xbf16>, vector<8x16xf32> -> vector<8x16xf32>
    %c0_23 = arith.constant 0 : index
    %c0_24 = arith.constant 0 : index
    %c0_25 = arith.constant 0 : index
    %24 = vector.load %arg8[%c0_23, %c0_24, %c0_25] : memref<8x1x16xf32, #tpu.memory_space<vmem>>, vector<1x1x16xf32>
    %25 = vector.shape_cast %24 : vector<1x1x16xf32> to vector<1x16xf32>
    %26 = vector.broadcast %25 : vector<1x16xf32> to vector<8x16xf32>
    %27 = arith.addf %23, %26 : vector<8x16xf32>
    %28 = arith.truncf %13 : vector<8x16xf32> to vector<8x16xbf16>
    %29 = arith.truncf %20 : vector<8x16xf32> to vector<8x16xbf16>
    %cst_26 = arith.constant dense<0.000000e+00> : vector<8x8xf32>
    %30 = tpu.matmul %28, %29, %cst_26 {dimension_numbers = #tpu.dot_dimension_numbers<[1], [1], [0], [0], [0, 0, 1, 0], [], []>} : vector<8x16xbf16>, vector<8x16xbf16>, vector<8x8xf32> -> vector<8x8xf32>
    %cst_27 = arith.constant 2.500000e-01 : f32
    %31 = vector.broadcast %cst_27 : f32 to vector<8x8xf32>
    %32 = arith.mulf %30, %31 : vector<8x8xf32>
    %cst_28 = arith.constant dense<0xFF800000> : vector<8xf32>
    %33 = vector.multi_reduction <maximumf>, %32, %cst_28 [1] : vector<8x8xf32> to vector<8xf32>
    %34 = vector.shape_cast %33 : vector<8xf32> to vector<8x1xf32>
    %35 = vector.broadcast %34 : vector<8x1xf32> to vector<8x8xf32>
    %36 = arith.subf %32, %35 : vector<8x8xf32>
    %37 = math.exp %36 : vector<8x8xf32>
    %cst_29 = arith.constant dense<0.000000e+00> : vector<8xf32>
    %38 = vector.multi_reduction <add>, %37, %cst_29 [1] : vector<8x8xf32> to vector<8xf32>
    %39 = vector.shape_cast %38 : vector<8xf32> to vector<8x1xf32>
    %40 = tpu.reciprocal %39 {approx = true} : vector<8x1xf32> -> vector<8x1xf32>
    %41 = vector.broadcast %40 : vector<8x1xf32> to vector<8x8xf32>
    %42 = arith.mulf %37, %41 : vector<8x8xf32>
    %43 = arith.truncf %42 : vector<8x8xf32> to vector<8x8xbf16>
    %44 = arith.truncf %27 : vector<8x16xf32> to vector<8x16xbf16>
    %cst_30 = arith.constant dense<0.000000e+00> : vector<8x16xf32>
    %45 = tpu.matmul %43, %44, %cst_30 {dimension_numbers = #tpu.dot_dimension_numbers<[1], [0], [0], [1], [0, 0, 1, 1], [], []>} : vector<8x8xbf16>, vector<8x16xbf16>, vector<8x16xf32> -> vector<8x16xf32>
    %46 = arith.truncf %45 : vector<8x16xf32> to vector<8x16xbf16>
    %c0_31 = arith.constant 0 : index
    %c0_32 = arith.constant 0 : index
    %c0_33 = arith.constant 0 : index
    %47 = vector.load %arg9[%c0_31, %c0_32, %c0_33] : memref<8x16x128xbf16, #tpu.memory_space<vmem>>, vector<1x16x128xbf16>
    %48 = vector.shape_cast %47 : vector<1x16x128xbf16> to vector<16x128xbf16>
    %cst_34 = arith.constant dense<0.000000e+00> : vector<8x128xf32>
    %49 = tpu.matmul %46, %48, %cst_34 {dimension_numbers = #tpu.dot_dimension_numbers<[1], [0], [0], [1], [0, 0, 1, 1], [], []>} : vector<8x16xbf16>, vector<16x128xbf16>, vector<8x128xf32> -> vector<8x128xf32>
    %50 = arith.addf %6, %49 : vector<8x128xf32>
    %c1 = arith.constant 1 : index
    %c0_35 = arith.constant 0 : index
    %c0_36 = arith.constant 0 : index
    %51 = vector.load %arg3[%c1, %c0_35, %c0_36] : memref<8x128x16xbf16, #tpu.memory_space<vmem>>, vector<1x128x16xbf16>
    %52 = vector.shape_cast %51 : vector<1x128x16xbf16> to vector<128x16xbf16>
    %cst_37 = arith.constant dense<0.000000e+00> : vector<8x16xf32>
    %53 = tpu.matmul %4, %52, %cst_37 {dimension_numbers = #tpu.dot_dimension_numbers<[1], [0], [0], [1], [0, 0, 1, 1], [], []>} : vector<8x128xbf16>, vector<128x16xbf16>, vector<8x16xf32> -> vector<8x16xf32>
    %c1_38 = arith.constant 1 : index
    %c0_39 = arith.constant 0 : index
    %c0_40 = arith.constant 0 : index
    %54 = vector.load %arg4[%c1_38, %c0_39, %c0_40] : memref<8x1x16xf32, #tpu.memory_space<vmem>>, vector<1x1x16xf32>
    %55 = vector.shape_cast %54 : vector<1x1x16xf32> to vector<1x16xf32>
    %56 = vector.broadcast %55 : vector<1x16xf32> to vector<8x16xf32>
    %57 = arith.addf %53, %56 : vector<8x16xf32>
    %c1_41 = arith.constant 1 : index
    %c0_42 = arith.constant 0 : index
    %c0_43 = arith.constant 0 : index
    %58 = vector.load %arg5[%c1_41, %c0_42, %c0_43] : memref<8x128x16xbf16, #tpu.memory_space<vmem>>, vector<1x128x16xbf16>
    %59 = vector.shape_cast %58 : vector<1x128x16xbf16> to vector<128x16xbf16>
    %cst_44 = arith.constant dense<0.000000e+00> : vector<8x16xf32>
    %60 = tpu.matmul %5, %59, %cst_44 {dimension_numbers = #tpu.dot_dimension_numbers<[1], [0], [0], [1], [0, 0, 1, 1], [], []>} : vector<8x128xbf16>, vector<128x16xbf16>, vector<8x16xf32> -> vector<8x16xf32>
    %c1_45 = arith.constant 1 : index
    %c0_46 = arith.constant 0 : index
    %c0_47 = arith.constant 0 : index
    %61 = vector.load %arg6[%c1_45, %c0_46, %c0_47] : memref<8x1x16xf32, #tpu.memory_space<vmem>>, vector<1x1x16xf32>
    %62 = vector.shape_cast %61 : vector<1x1x16xf32> to vector<1x16xf32>
    %63 = vector.broadcast %62 : vector<1x16xf32> to vector<8x16xf32>
    %64 = arith.addf %60, %63 : vector<8x16xf32>
    %c1_48 = arith.constant 1 : index
    %c0_49 = arith.constant 0 : index
    %c0_50 = arith.constant 0 : index
    %65 = vector.load %arg7[%c1_48, %c0_49, %c0_50] : memref<8x128x16xbf16, #tpu.memory_space<vmem>>, vector<1x128x16xbf16>
    %66 = vector.shape_cast %65 : vector<1x128x16xbf16> to vector<128x16xbf16>
    %cst_51 = arith.constant dense<0.000000e+00> : vector<8x16xf32>
    %67 = tpu.matmul %5, %66, %cst_51 {dimension_numbers = #tpu.dot_dimension_numbers<[1], [0], [0], [1], [0, 0, 1, 1], [], []>} : vector<8x128xbf16>, vector<128x16xbf16>, vector<8x16xf32> -> vector<8x16xf32>
    %c1_52 = arith.constant 1 : index
    %c0_53 = arith.constant 0 : index
    %c0_54 = arith.constant 0 : index
    %68 = vector.load %arg8[%c1_52, %c0_53, %c0_54] : memref<8x1x16xf32, #tpu.memory_space<vmem>>, vector<1x1x16xf32>
    %69 = vector.shape_cast %68 : vector<1x1x16xf32> to vector<1x16xf32>
    %70 = vector.broadcast %69 : vector<1x16xf32> to vector<8x16xf32>
    %71 = arith.addf %67, %70 : vector<8x16xf32>
    %72 = arith.truncf %57 : vector<8x16xf32> to vector<8x16xbf16>
    %73 = arith.truncf %64 : vector<8x16xf32> to vector<8x16xbf16>
    %cst_55 = arith.constant dense<0.000000e+00> : vector<8x8xf32>
    %74 = tpu.matmul %72, %73, %cst_55 {dimension_numbers = #tpu.dot_dimension_numbers<[1], [1], [0], [0], [0, 0, 1, 0], [], []>} : vector<8x16xbf16>, vector<8x16xbf16>, vector<8x8xf32> -> vector<8x8xf32>
    %cst_56 = arith.constant 2.500000e-01 : f32
    %75 = vector.broadcast %cst_56 : f32 to vector<8x8xf32>
    %76 = arith.mulf %74, %75 : vector<8x8xf32>
    %cst_57 = arith.constant dense<0xFF800000> : vector<8xf32>
    %77 = vector.multi_reduction <maximumf>, %76, %cst_57 [1] : vector<8x8xf32> to vector<8xf32>
    %78 = vector.shape_cast %77 : vector<8xf32> to vector<8x1xf32>
    %79 = vector.broadcast %78 : vector<8x1xf32> to vector<8x8xf32>
    %80 = arith.subf %76, %79 : vector<8x8xf32>
    %81 = math.exp %80 : vector<8x8xf32>
    %cst_58 = arith.constant dense<0.000000e+00> : vector<8xf32>
    %82 = vector.multi_reduction <add>, %81, %cst_58 [1] : vector<8x8xf32> to vector<8xf32>
    %83 = vector.shape_cast %82 : vector<8xf32> to vector<8x1xf32>
    %84 = tpu.reciprocal %83 {approx = true} : vector<8x1xf32> -> vector<8x1xf32>
    %85 = vector.broadcast %84 : vector<8x1xf32> to vector<8x8xf32>
    %86 = arith.mulf %81, %85 : vector<8x8xf32>
    %87 = arith.truncf %86 : vector<8x8xf32> to vector<8x8xbf16>
    %88 = arith.truncf %71 : vector<8x16xf32> to vector<8x16xbf16>
    %cst_59 = arith.constant dense<0.000000e+00> : vector<8x16xf32>
    %89 = tpu.matmul %87, %88, %cst_59 {dimension_numbers = #tpu.dot_dimension_numbers<[1], [0], [0], [1], [0, 0, 1, 1], [], []>} : vector<8x8xbf16>, vector<8x16xbf16>, vector<8x16xf32> -> vector<8x16xf32>
    %90 = arith.truncf %89 : vector<8x16xf32> to vector<8x16xbf16>
    %c1_60 = arith.constant 1 : index
    %c0_61 = arith.constant 0 : index
    %c0_62 = arith.constant 0 : index
    %91 = vector.load %arg9[%c1_60, %c0_61, %c0_62] : memref<8x16x128xbf16, #tpu.memory_space<vmem>>, vector<1x16x128xbf16>
    %92 = vector.shape_cast %91 : vector<1x16x128xbf16> to vector<16x128xbf16>
    %cst_63 = arith.constant dense<0.000000e+00> : vector<8x128xf32>
    %93 = tpu.matmul %90, %92, %cst_63 {dimension_numbers = #tpu.dot_dimension_numbers<[1], [0], [0], [1], [0, 0, 1, 1], [], []>} : vector<8x16xbf16>, vector<16x128xbf16>, vector<8x128xf32> -> vector<8x128xf32>
    %94 = arith.addf %50, %93 : vector<8x128xf32>
    %c2 = arith.constant 2 : index
    %c0_64 = arith.constant 0 : index
    %c0_65 = arith.constant 0 : index
    %95 = vector.load %arg3[%c2, %c0_64, %c0_65] : memref<8x128x16xbf16, #tpu.memory_space<vmem>>, vector<1x128x16xbf16>
    %96 = vector.shape_cast %95 : vector<1x128x16xbf16> to vector<128x16xbf16>
    %cst_66 = arith.constant dense<0.000000e+00> : vector<8x16xf32>
    %97 = tpu.matmul %4, %96, %cst_66 {dimension_numbers = #tpu.dot_dimension_numbers<[1], [0], [0], [1], [0, 0, 1, 1], [], []>} : vector<8x128xbf16>, vector<128x16xbf16>, vector<8x16xf32> -> vector<8x16xf32>
    %c2_67 = arith.constant 2 : index
    %c0_68 = arith.constant 0 : index
    %c0_69 = arith.constant 0 : index
    %98 = vector.load %arg4[%c2_67, %c0_68, %c0_69] : memref<8x1x16xf32, #tpu.memory_space<vmem>>, vector<1x1x16xf32>
    %99 = vector.shape_cast %98 : vector<1x1x16xf32> to vector<1x16xf32>
    %100 = vector.broadcast %99 : vector<1x16xf32> to vector<8x16xf32>
    %101 = arith.addf %97, %100 : vector<8x16xf32>
    %c2_70 = arith.constant 2 : index
    %c0_71 = arith.constant 0 : index
    %c0_72 = arith.constant 0 : index
    %102 = vector.load %arg5[%c2_70, %c0_71, %c0_72] : memref<8x128x16xbf16, #tpu.memory_space<vmem>>, vector<1x128x16xbf16>
    %103 = vector.shape_cast %102 : vector<1x128x16xbf16> to vector<128x16xbf16>
    %cst_73 = arith.constant dense<0.000000e+00> : vector<8x16xf32>
    %104 = tpu.matmul %5, %103, %cst_73 {dimension_numbers = #tpu.dot_dimension_numbers<[1], [0], [0], [1], [0, 0, 1, 1], [], []>} : vector<8x128xbf16>, vector<128x16xbf16>, vector<8x16xf32> -> vector<8x16xf32>
    %c2_74 = arith.constant 2 : index
    %c0_75 = arith.constant 0 : index
    %c0_76 = arith.constant 0 : index
    %105 = vector.load %arg6[%c2_74, %c0_75, %c0_76] : memref<8x1x16xf32, #tpu.memory_space<vmem>>, vector<1x1x16xf32>
    %106 = vector.shape_cast %105 : vector<1x1x16xf32> to vector<1x16xf32>
    %107 = vector.broadcast %106 : vector<1x16xf32> to vector<8x16xf32>
    %108 = arith.addf %104, %107 : vector<8x16xf32>
    %c2_77 = arith.constant 2 : index
    %c0_78 = arith.constant 0 : index
    %c0_79 = arith.constant 0 : index
    %109 = vector.load %arg7[%c2_77, %c0_78, %c0_79] : memref<8x128x16xbf16, #tpu.memory_space<vmem>>, vector<1x128x16xbf16>
    %110 = vector.shape_cast %109 : vector<1x128x16xbf16> to vector<128x16xbf16>
    %cst_80 = arith.constant dense<0.000000e+00> : vector<8x16xf32>
    %111 = tpu.matmul %5, %110, %cst_80 {dimension_numbers = #tpu.dot_dimension_numbers<[1], [0], [0], [1], [0, 0, 1, 1], [], []>} : vector<8x128xbf16>, vector<128x16xbf16>, vector<8x16xf32> -> vector<8x16xf32>
    %c2_81 = arith.constant 2 : index
    %c0_82 = arith.constant 0 : index
    %c0_83 = arith.constant 0 : index
    %112 = vector.load %arg8[%c2_81, %c0_82, %c0_83] : memref<8x1x16xf32, #tpu.memory_space<vmem>>, vector<1x1x16xf32>
    %113 = vector.shape_cast %112 : vector<1x1x16xf32> to vector<1x16xf32>
    %114 = vector.broadcast %113 : vector<1x16xf32> to vector<8x16xf32>
    %115 = arith.addf %111, %114 : vector<8x16xf32>
    %116 = arith.truncf %101 : vector<8x16xf32> to vector<8x16xbf16>
    %117 = arith.truncf %108 : vector<8x16xf32> to vector<8x16xbf16>
    %cst_84 = arith.constant dense<0.000000e+00> : vector<8x8xf32>
    %118 = tpu.matmul %116, %117, %cst_84 {dimension_numbers = #tpu.dot_dimension_numbers<[1], [1], [0], [0], [0, 0, 1, 0], [], []>} : vector<8x16xbf16>, vector<8x16xbf16>, vector<8x8xf32> -> vector<8x8xf32>
    %cst_85 = arith.constant 2.500000e-01 : f32
    %119 = vector.broadcast %cst_85 : f32 to vector<8x8xf32>
    %120 = arith.mulf %118, %119 : vector<8x8xf32>
    %cst_86 = arith.constant dense<0xFF800000> : vector<8xf32>
    %121 = vector.multi_reduction <maximumf>, %120, %cst_86 [1] : vector<8x8xf32> to vector<8xf32>
    %122 = vector.shape_cast %121 : vector<8xf32> to vector<8x1xf32>
    %123 = vector.broadcast %122 : vector<8x1xf32> to vector<8x8xf32>
    %124 = arith.subf %120, %123 : vector<8x8xf32>
    %125 = math.exp %124 : vector<8x8xf32>
    %cst_87 = arith.constant dense<0.000000e+00> : vector<8xf32>
    %126 = vector.multi_reduction <add>, %125, %cst_87 [1] : vector<8x8xf32> to vector<8xf32>
    %127 = vector.shape_cast %126 : vector<8xf32> to vector<8x1xf32>
    %128 = tpu.reciprocal %127 {approx = true} : vector<8x1xf32> -> vector<8x1xf32>
    %129 = vector.broadcast %128 : vector<8x1xf32> to vector<8x8xf32>
    %130 = arith.mulf %125, %129 : vector<8x8xf32>
    %131 = arith.truncf %130 : vector<8x8xf32> to vector<8x8xbf16>
    %132 = arith.truncf %115 : vector<8x16xf32> to vector<8x16xbf16>
    %cst_88 = arith.constant dense<0.000000e+00> : vector<8x16xf32>
    %133 = tpu.matmul %131, %132, %cst_88 {dimension_numbers = #tpu.dot_dimension_numbers<[1], [0], [0], [1], [0, 0, 1, 1], [], []>} : vector<8x8xbf16>, vector<8x16xbf16>, vector<8x16xf32> -> vector<8x16xf32>
    %134 = arith.truncf %133 : vector<8x16xf32> to vector<8x16xbf16>
    %c2_89 = arith.constant 2 : index
    %c0_90 = arith.constant 0 : index
    %c0_91 = arith.constant 0 : index
    %135 = vector.load %arg9[%c2_89, %c0_90, %c0_91] : memref<8x16x128xbf16, #tpu.memory_space<vmem>>, vector<1x16x128xbf16>
    %136 = vector.shape_cast %135 : vector<1x16x128xbf16> to vector<16x128xbf16>
    %cst_92 = arith.constant dense<0.000000e+00> : vector<8x128xf32>
    %137 = tpu.matmul %134, %136, %cst_92 {dimension_numbers = #tpu.dot_dimension_numbers<[1], [0], [0], [1], [0, 0, 1, 1], [], []>} : vector<8x16xbf16>, vector<16x128xbf16>, vector<8x128xf32> -> vector<8x128xf32>
    %138 = arith.addf %94, %137 : vector<8x128xf32>
    %c3 = arith.constant 3 : index
    %c0_93 = arith.constant 0 : index
    %c0_94 = arith.constant 0 : index
    %139 = vector.load %arg3[%c3, %c0_93, %c0_94] : memref<8x128x16xbf16, #tpu.memory_space<vmem>>, vector<1x128x16xbf16>
    %140 = vector.shape_cast %139 : vector<1x128x16xbf16> to vector<128x16xbf16>
    %cst_95 = arith.constant dense<0.000000e+00> : vector<8x16xf32>
    %141 = tpu.matmul %4, %140, %cst_95 {dimension_numbers = #tpu.dot_dimension_numbers<[1], [0], [0], [1], [0, 0, 1, 1], [], []>} : vector<8x128xbf16>, vector<128x16xbf16>, vector<8x16xf32> -> vector<8x16xf32>
    %c3_96 = arith.constant 3 : index
    %c0_97 = arith.constant 0 : index
    %c0_98 = arith.constant 0 : index
    %142 = vector.load %arg4[%c3_96, %c0_97, %c0_98] : memref<8x1x16xf32, #tpu.memory_space<vmem>>, vector<1x1x16xf32>
    %143 = vector.shape_cast %142 : vector<1x1x16xf32> to vector<1x16xf32>
    %144 = vector.broadcast %143 : vector<1x16xf32> to vector<8x16xf32>
    %145 = arith.addf %141, %144 : vector<8x16xf32>
    %c3_99 = arith.constant 3 : index
    %c0_100 = arith.constant 0 : index
    %c0_101 = arith.constant 0 : index
    %146 = vector.load %arg5[%c3_99, %c0_100, %c0_101] : memref<8x128x16xbf16, #tpu.memory_space<vmem>>, vector<1x128x16xbf16>
    %147 = vector.shape_cast %146 : vector<1x128x16xbf16> to vector<128x16xbf16>
    %cst_102 = arith.constant dense<0.000000e+00> : vector<8x16xf32>
    %148 = tpu.matmul %5, %147, %cst_102 {dimension_numbers = #tpu.dot_dimension_numbers<[1], [0], [0], [1], [0, 0, 1, 1], [], []>} : vector<8x128xbf16>, vector<128x16xbf16>, vector<8x16xf32> -> vector<8x16xf32>
    %c3_103 = arith.constant 3 : index
    %c0_104 = arith.constant 0 : index
    %c0_105 = arith.constant 0 : index
    %149 = vector.load %arg6[%c3_103, %c0_104, %c0_105] : memref<8x1x16xf32, #tpu.memory_space<vmem>>, vector<1x1x16xf32>
    %150 = vector.shape_cast %149 : vector<1x1x16xf32> to vector<1x16xf32>
    %151 = vector.broadcast %150 : vector<1x16xf32> to vector<8x16xf32>
    %152 = arith.addf %148, %151 : vector<8x16xf32>
    %c3_106 = arith.constant 3 : index
    %c0_107 = arith.constant 0 : index
    %c0_108 = arith.constant 0 : index
    %153 = vector.load %arg7[%c3_106, %c0_107, %c0_108] : memref<8x128x16xbf16, #tpu.memory_space<vmem>>, vector<1x128x16xbf16>
    %154 = vector.shape_cast %153 : vector<1x128x16xbf16> to vector<128x16xbf16>
    %cst_109 = arith.constant dense<0.000000e+00> : vector<8x16xf32>
    %155 = tpu.matmul %5, %154, %cst_109 {dimension_numbers = #tpu.dot_dimension_numbers<[1], [0], [0], [1], [0, 0, 1, 1], [], []>} : vector<8x128xbf16>, vector<128x16xbf16>, vector<8x16xf32> -> vector<8x16xf32>
    %c3_110 = arith.constant 3 : index
    %c0_111 = arith.constant 0 : index
    %c0_112 = arith.constant 0 : index
    %156 = vector.load %arg8[%c3_110, %c0_111, %c0_112] : memref<8x1x16xf32, #tpu.memory_space<vmem>>, vector<1x1x16xf32>
    %157 = vector.shape_cast %156 : vector<1x1x16xf32> to vector<1x16xf32>
    %158 = vector.broadcast %157 : vector<1x16xf32> to vector<8x16xf32>
    %159 = arith.addf %155, %158 : vector<8x16xf32>
    %160 = arith.truncf %145 : vector<8x16xf32> to vector<8x16xbf16>
    %161 = arith.truncf %152 : vector<8x16xf32> to vector<8x16xbf16>
    %cst_113 = arith.constant dense<0.000000e+00> : vector<8x8xf32>
    %162 = tpu.matmul %160, %161, %cst_113 {dimension_numbers = #tpu.dot_dimension_numbers<[1], [1], [0], [0], [0, 0, 1, 0], [], []>} : vector<8x16xbf16>, vector<8x16xbf16>, vector<8x8xf32> -> vector<8x8xf32>
    %cst_114 = arith.constant 2.500000e-01 : f32
    %163 = vector.broadcast %cst_114 : f32 to vector<8x8xf32>
    %164 = arith.mulf %162, %163 : vector<8x8xf32>
    %cst_115 = arith.constant dense<0xFF800000> : vector<8xf32>
    %165 = vector.multi_reduction <maximumf>, %164, %cst_115 [1] : vector<8x8xf32> to vector<8xf32>
    %166 = vector.shape_cast %165 : vector<8xf32> to vector<8x1xf32>
    %167 = vector.broadcast %166 : vector<8x1xf32> to vector<8x8xf32>
    %168 = arith.subf %164, %167 : vector<8x8xf32>
    %169 = math.exp %168 : vector<8x8xf32>
    %cst_116 = arith.constant dense<0.000000e+00> : vector<8xf32>
    %170 = vector.multi_reduction <add>, %169, %cst_116 [1] : vector<8x8xf32> to vector<8xf32>
    %171 = vector.shape_cast %170 : vector<8xf32> to vector<8x1xf32>
    %172 = tpu.reciprocal %171 {approx = true} : vector<8x1xf32> -> vector<8x1xf32>
    %173 = vector.broadcast %172 : vector<8x1xf32> to vector<8x8xf32>
    %174 = arith.mulf %169, %173 : vector<8x8xf32>
    %175 = arith.truncf %174 : vector<8x8xf32> to vector<8x8xbf16>
    %176 = arith.truncf %159 : vector<8x16xf32> to vector<8x16xbf16>
    %cst_117 = arith.constant dense<0.000000e+00> : vector<8x16xf32>
    %177 = tpu.matmul %175, %176, %cst_117 {dimension_numbers = #tpu.dot_dimension_numbers<[1], [0], [0], [1], [0, 0, 1, 1], [], []>} : vector<8x8xbf16>, vector<8x16xbf16>, vector<8x16xf32> -> vector<8x16xf32>
    %178 = arith.truncf %177 : vector<8x16xf32> to vector<8x16xbf16>
    %c3_118 = arith.constant 3 : index
    %c0_119 = arith.constant 0 : index
    %c0_120 = arith.constant 0 : index
    %179 = vector.load %arg9[%c3_118, %c0_119, %c0_120] : memref<8x16x128xbf16, #tpu.memory_space<vmem>>, vector<1x16x128xbf16>
    %180 = vector.shape_cast %179 : vector<1x16x128xbf16> to vector<16x128xbf16>
    %cst_121 = arith.constant dense<0.000000e+00> : vector<8x128xf32>
    %181 = tpu.matmul %178, %180, %cst_121 {dimension_numbers = #tpu.dot_dimension_numbers<[1], [0], [0], [1], [0, 0, 1, 1], [], []>} : vector<8x16xbf16>, vector<16x128xbf16>, vector<8x128xf32> -> vector<8x128xf32>
    %182 = arith.addf %138, %181 : vector<8x128xf32>
    %c4 = arith.constant 4 : index
    %c0_122 = arith.constant 0 : index
    %c0_123 = arith.constant 0 : index
    %183 = vector.load %arg3[%c4, %c0_122, %c0_123] : memref<8x128x16xbf16, #tpu.memory_space<vmem>>, vector<1x128x16xbf16>
    %184 = vector.shape_cast %183 : vector<1x128x16xbf16> to vector<128x16xbf16>
    %cst_124 = arith.constant dense<0.000000e+00> : vector<8x16xf32>
    %185 = tpu.matmul %4, %184, %cst_124 {dimension_numbers = #tpu.dot_dimension_numbers<[1], [0], [0], [1], [0, 0, 1, 1], [], []>} : vector<8x128xbf16>, vector<128x16xbf16>, vector<8x16xf32> -> vector<8x16xf32>
    %c4_125 = arith.constant 4 : index
    %c0_126 = arith.constant 0 : index
    %c0_127 = arith.constant 0 : index
    %186 = vector.load %arg4[%c4_125, %c0_126, %c0_127] : memref<8x1x16xf32, #tpu.memory_space<vmem>>, vector<1x1x16xf32>
    %187 = vector.shape_cast %186 : vector<1x1x16xf32> to vector<1x16xf32>
    %188 = vector.broadcast %187 : vector<1x16xf32> to vector<8x16xf32>
    %189 = arith.addf %185, %188 : vector<8x16xf32>
    %c4_128 = arith.constant 4 : index
    %c0_129 = arith.constant 0 : index
    %c0_130 = arith.constant 0 : index
    %190 = vector.load %arg5[%c4_128, %c0_129, %c0_130] : memref<8x128x16xbf16, #tpu.memory_space<vmem>>, vector<1x128x16xbf16>
    %191 = vector.shape_cast %190 : vector<1x128x16xbf16> to vector<128x16xbf16>
    %cst_131 = arith.constant dense<0.000000e+00> : vector<8x16xf32>
    %192 = tpu.matmul %5, %191, %cst_131 {dimension_numbers = #tpu.dot_dimension_numbers<[1], [0], [0], [1], [0, 0, 1, 1], [], []>} : vector<8x128xbf16>, vector<128x16xbf16>, vector<8x16xf32> -> vector<8x16xf32>
    %c4_132 = arith.constant 4 : index
    %c0_133 = arith.constant 0 : index
    %c0_134 = arith.constant 0 : index
    %193 = vector.load %arg6[%c4_132, %c0_133, %c0_134] : memref<8x1x16xf32, #tpu.memory_space<vmem>>, vector<1x1x16xf32>
    %194 = vector.shape_cast %193 : vector<1x1x16xf32> to vector<1x16xf32>
    %195 = vector.broadcast %194 : vector<1x16xf32> to vector<8x16xf32>
    %196 = arith.addf %192, %195 : vector<8x16xf32>
    %c4_135 = arith.constant 4 : index
    %c0_136 = arith.constant 0 : index
    %c0_137 = arith.constant 0 : index
    %197 = vector.load %arg7[%c4_135, %c0_136, %c0_137] : memref<8x128x16xbf16, #tpu.memory_space<vmem>>, vector<1x128x16xbf16>
    %198 = vector.shape_cast %197 : vector<1x128x16xbf16> to vector<128x16xbf16>
    %cst_138 = arith.constant dense<0.000000e+00> : vector<8x16xf32>
    %199 = tpu.matmul %5, %198, %cst_138 {dimension_numbers = #tpu.dot_dimension_numbers<[1], [0], [0], [1], [0, 0, 1, 1], [], []>} : vector<8x128xbf16>, vector<128x16xbf16>, vector<8x16xf32> -> vector<8x16xf32>
    %c4_139 = arith.constant 4 : index
    %c0_140 = arith.constant 0 : index
    %c0_141 = arith.constant 0 : index
    %200 = vector.load %arg8[%c4_139, %c0_140, %c0_141] : memref<8x1x16xf32, #tpu.memory_space<vmem>>, vector<1x1x16xf32>
    %201 = vector.shape_cast %200 : vector<1x1x16xf32> to vector<1x16xf32>
    %202 = vector.broadcast %201 : vector<1x16xf32> to vector<8x16xf32>
    %203 = arith.addf %199, %202 : vector<8x16xf32>
    %204 = arith.truncf %189 : vector<8x16xf32> to vector<8x16xbf16>
    %205 = arith.truncf %196 : vector<8x16xf32> to vector<8x16xbf16>
    %cst_142 = arith.constant dense<0.000000e+00> : vector<8x8xf32>
    %206 = tpu.matmul %204, %205, %cst_142 {dimension_numbers = #tpu.dot_dimension_numbers<[1], [1], [0], [0], [0, 0, 1, 0], [], []>} : vector<8x16xbf16>, vector<8x16xbf16>, vector<8x8xf32> -> vector<8x8xf32>
    %cst_143 = arith.constant 2.500000e-01 : f32
    %207 = vector.broadcast %cst_143 : f32 to vector<8x8xf32>
    %208 = arith.mulf %206, %207 : vector<8x8xf32>
    %cst_144 = arith.constant dense<0xFF800000> : vector<8xf32>
    %209 = vector.multi_reduction <maximumf>, %208, %cst_144 [1] : vector<8x8xf32> to vector<8xf32>
    %210 = vector.shape_cast %209 : vector<8xf32> to vector<8x1xf32>
    %211 = vector.broadcast %210 : vector<8x1xf32> to vector<8x8xf32>
    %212 = arith.subf %208, %211 : vector<8x8xf32>
    %213 = math.exp %212 : vector<8x8xf32>
    %cst_145 = arith.constant dense<0.000000e+00> : vector<8xf32>
    %214 = vector.multi_reduction <add>, %213, %cst_145 [1] : vector<8x8xf32> to vector<8xf32>
    %215 = vector.shape_cast %214 : vector<8xf32> to vector<8x1xf32>
    %216 = tpu.reciprocal %215 {approx = true} : vector<8x1xf32> -> vector<8x1xf32>
    %217 = vector.broadcast %216 : vector<8x1xf32> to vector<8x8xf32>
    %218 = arith.mulf %213, %217 : vector<8x8xf32>
    %219 = arith.truncf %218 : vector<8x8xf32> to vector<8x8xbf16>
    %220 = arith.truncf %203 : vector<8x16xf32> to vector<8x16xbf16>
    %cst_146 = arith.constant dense<0.000000e+00> : vector<8x16xf32>
    %221 = tpu.matmul %219, %220, %cst_146 {dimension_numbers = #tpu.dot_dimension_numbers<[1], [0], [0], [1], [0, 0, 1, 1], [], []>} : vector<8x8xbf16>, vector<8x16xbf16>, vector<8x16xf32> -> vector<8x16xf32>
    %222 = arith.truncf %221 : vector<8x16xf32> to vector<8x16xbf16>
    %c4_147 = arith.constant 4 : index
    %c0_148 = arith.constant 0 : index
    %c0_149 = arith.constant 0 : index
    %223 = vector.load %arg9[%c4_147, %c0_148, %c0_149] : memref<8x16x128xbf16, #tpu.memory_space<vmem>>, vector<1x16x128xbf16>
    %224 = vector.shape_cast %223 : vector<1x16x128xbf16> to vector<16x128xbf16>
    %cst_150 = arith.constant dense<0.000000e+00> : vector<8x128xf32>
    %225 = tpu.matmul %222, %224, %cst_150 {dimension_numbers = #tpu.dot_dimension_numbers<[1], [0], [0], [1], [0, 0, 1, 1], [], []>} : vector<8x16xbf16>, vector<16x128xbf16>, vector<8x128xf32> -> vector<8x128xf32>
    %226 = arith.addf %182, %225 : vector<8x128xf32>
    %c5 = arith.constant 5 : index
    %c0_151 = arith.constant 0 : index
    %c0_152 = arith.constant 0 : index
    %227 = vector.load %arg3[%c5, %c0_151, %c0_152] : memref<8x128x16xbf16, #tpu.memory_space<vmem>>, vector<1x128x16xbf16>
    %228 = vector.shape_cast %227 : vector<1x128x16xbf16> to vector<128x16xbf16>
    %cst_153 = arith.constant dense<0.000000e+00> : vector<8x16xf32>
    %229 = tpu.matmul %4, %228, %cst_153 {dimension_numbers = #tpu.dot_dimension_numbers<[1], [0], [0], [1], [0, 0, 1, 1], [], []>} : vector<8x128xbf16>, vector<128x16xbf16>, vector<8x16xf32> -> vector<8x16xf32>
    %c5_154 = arith.constant 5 : index
    %c0_155 = arith.constant 0 : index
    %c0_156 = arith.constant 0 : index
    %230 = vector.load %arg4[%c5_154, %c0_155, %c0_156] : memref<8x1x16xf32, #tpu.memory_space<vmem>>, vector<1x1x16xf32>
    %231 = vector.shape_cast %230 : vector<1x1x16xf32> to vector<1x16xf32>
    %232 = vector.broadcast %231 : vector<1x16xf32> to vector<8x16xf32>
    %233 = arith.addf %229, %232 : vector<8x16xf32>
    %c5_157 = arith.constant 5 : index
    %c0_158 = arith.constant 0 : index
    %c0_159 = arith.constant 0 : index
    %234 = vector.load %arg5[%c5_157, %c0_158, %c0_159] : memref<8x128x16xbf16, #tpu.memory_space<vmem>>, vector<1x128x16xbf16>
    %235 = vector.shape_cast %234 : vector<1x128x16xbf16> to vector<128x16xbf16>
    %cst_160 = arith.constant dense<0.000000e+00> : vector<8x16xf32>
    %236 = tpu.matmul %5, %235, %cst_160 {dimension_numbers = #tpu.dot_dimension_numbers<[1], [0], [0], [1], [0, 0, 1, 1], [], []>} : vector<8x128xbf16>, vector<128x16xbf16>, vector<8x16xf32> -> vector<8x16xf32>
    %c5_161 = arith.constant 5 : index
    %c0_162 = arith.constant 0 : index
    %c0_163 = arith.constant 0 : index
    %237 = vector.load %arg6[%c5_161, %c0_162, %c0_163] : memref<8x1x16xf32, #tpu.memory_space<vmem>>, vector<1x1x16xf32>
    %238 = vector.shape_cast %237 : vector<1x1x16xf32> to vector<1x16xf32>
    %239 = vector.broadcast %238 : vector<1x16xf32> to vector<8x16xf32>
    %240 = arith.addf %236, %239 : vector<8x16xf32>
    %c5_164 = arith.constant 5 : index
    %c0_165 = arith.constant 0 : index
    %c0_166 = arith.constant 0 : index
    %241 = vector.load %arg7[%c5_164, %c0_165, %c0_166] : memref<8x128x16xbf16, #tpu.memory_space<vmem>>, vector<1x128x16xbf16>
    %242 = vector.shape_cast %241 : vector<1x128x16xbf16> to vector<128x16xbf16>
    %cst_167 = arith.constant dense<0.000000e+00> : vector<8x16xf32>
    %243 = tpu.matmul %5, %242, %cst_167 {dimension_numbers = #tpu.dot_dimension_numbers<[1], [0], [0], [1], [0, 0, 1, 1], [], []>} : vector<8x128xbf16>, vector<128x16xbf16>, vector<8x16xf32> -> vector<8x16xf32>
    %c5_168 = arith.constant 5 : index
    %c0_169 = arith.constant 0 : index
    %c0_170 = arith.constant 0 : index
    %244 = vector.load %arg8[%c5_168, %c0_169, %c0_170] : memref<8x1x16xf32, #tpu.memory_space<vmem>>, vector<1x1x16xf32>
    %245 = vector.shape_cast %244 : vector<1x1x16xf32> to vector<1x16xf32>
    %246 = vector.broadcast %245 : vector<1x16xf32> to vector<8x16xf32>
    %247 = arith.addf %243, %246 : vector<8x16xf32>
    %248 = arith.truncf %233 : vector<8x16xf32> to vector<8x16xbf16>
    %249 = arith.truncf %240 : vector<8x16xf32> to vector<8x16xbf16>
    %cst_171 = arith.constant dense<0.000000e+00> : vector<8x8xf32>
    %250 = tpu.matmul %248, %249, %cst_171 {dimension_numbers = #tpu.dot_dimension_numbers<[1], [1], [0], [0], [0, 0, 1, 0], [], []>} : vector<8x16xbf16>, vector<8x16xbf16>, vector<8x8xf32> -> vector<8x8xf32>
    %cst_172 = arith.constant 2.500000e-01 : f32
    %251 = vector.broadcast %cst_172 : f32 to vector<8x8xf32>
    %252 = arith.mulf %250, %251 : vector<8x8xf32>
    %cst_173 = arith.constant dense<0xFF800000> : vector<8xf32>
    %253 = vector.multi_reduction <maximumf>, %252, %cst_173 [1] : vector<8x8xf32> to vector<8xf32>
    %254 = vector.shape_cast %253 : vector<8xf32> to vector<8x1xf32>
    %255 = vector.broadcast %254 : vector<8x1xf32> to vector<8x8xf32>
    %256 = arith.subf %252, %255 : vector<8x8xf32>
    %257 = math.exp %256 : vector<8x8xf32>
    %cst_174 = arith.constant dense<0.000000e+00> : vector<8xf32>
    %258 = vector.multi_reduction <add>, %257, %cst_174 [1] : vector<8x8xf32> to vector<8xf32>
    %259 = vector.shape_cast %258 : vector<8xf32> to vector<8x1xf32>
    %260 = tpu.reciprocal %259 {approx = true} : vector<8x1xf32> -> vector<8x1xf32>
    %261 = vector.broadcast %260 : vector<8x1xf32> to vector<8x8xf32>
    %262 = arith.mulf %257, %261 : vector<8x8xf32>
    %263 = arith.truncf %262 : vector<8x8xf32> to vector<8x8xbf16>
    %264 = arith.truncf %247 : vector<8x16xf32> to vector<8x16xbf16>
    %cst_175 = arith.constant dense<0.000000e+00> : vector<8x16xf32>
    %265 = tpu.matmul %263, %264, %cst_175 {dimension_numbers = #tpu.dot_dimension_numbers<[1], [0], [0], [1], [0, 0, 1, 1], [], []>} : vector<8x8xbf16>, vector<8x16xbf16>, vector<8x16xf32> -> vector<8x16xf32>
    %266 = arith.truncf %265 : vector<8x16xf32> to vector<8x16xbf16>
    %c5_176 = arith.constant 5 : index
    %c0_177 = arith.constant 0 : index
    %c0_178 = arith.constant 0 : index
    %267 = vector.load %arg9[%c5_176, %c0_177, %c0_178] : memref<8x16x128xbf16, #tpu.memory_space<vmem>>, vector<1x16x128xbf16>
    %268 = vector.shape_cast %267 : vector<1x16x128xbf16> to vector<16x128xbf16>
    %cst_179 = arith.constant dense<0.000000e+00> : vector<8x128xf32>
    %269 = tpu.matmul %266, %268, %cst_179 {dimension_numbers = #tpu.dot_dimension_numbers<[1], [0], [0], [1], [0, 0, 1, 1], [], []>} : vector<8x16xbf16>, vector<16x128xbf16>, vector<8x128xf32> -> vector<8x128xf32>
    %270 = arith.addf %226, %269 : vector<8x128xf32>
    %c6 = arith.constant 6 : index
    %c0_180 = arith.constant 0 : index
    %c0_181 = arith.constant 0 : index
    %271 = vector.load %arg3[%c6, %c0_180, %c0_181] : memref<8x128x16xbf16, #tpu.memory_space<vmem>>, vector<1x128x16xbf16>
    %272 = vector.shape_cast %271 : vector<1x128x16xbf16> to vector<128x16xbf16>
    %cst_182 = arith.constant dense<0.000000e+00> : vector<8x16xf32>
    %273 = tpu.matmul %4, %272, %cst_182 {dimension_numbers = #tpu.dot_dimension_numbers<[1], [0], [0], [1], [0, 0, 1, 1], [], []>} : vector<8x128xbf16>, vector<128x16xbf16>, vector<8x16xf32> -> vector<8x16xf32>
    %c6_183 = arith.constant 6 : index
    %c0_184 = arith.constant 0 : index
    %c0_185 = arith.constant 0 : index
    %274 = vector.load %arg4[%c6_183, %c0_184, %c0_185] : memref<8x1x16xf32, #tpu.memory_space<vmem>>, vector<1x1x16xf32>
    %275 = vector.shape_cast %274 : vector<1x1x16xf32> to vector<1x16xf32>
    %276 = vector.broadcast %275 : vector<1x16xf32> to vector<8x16xf32>
    %277 = arith.addf %273, %276 : vector<8x16xf32>
    %c6_186 = arith.constant 6 : index
    %c0_187 = arith.constant 0 : index
    %c0_188 = arith.constant 0 : index
    %278 = vector.load %arg5[%c6_186, %c0_187, %c0_188] : memref<8x128x16xbf16, #tpu.memory_space<vmem>>, vector<1x128x16xbf16>
    %279 = vector.shape_cast %278 : vector<1x128x16xbf16> to vector<128x16xbf16>
    %cst_189 = arith.constant dense<0.000000e+00> : vector<8x16xf32>
    %280 = tpu.matmul %5, %279, %cst_189 {dimension_numbers = #tpu.dot_dimension_numbers<[1], [0], [0], [1], [0, 0, 1, 1], [], []>} : vector<8x128xbf16>, vector<128x16xbf16>, vector<8x16xf32> -> vector<8x16xf32>
    %c6_190 = arith.constant 6 : index
    %c0_191 = arith.constant 0 : index
    %c0_192 = arith.constant 0 : index
    %281 = vector.load %arg6[%c6_190, %c0_191, %c0_192] : memref<8x1x16xf32, #tpu.memory_space<vmem>>, vector<1x1x16xf32>
    %282 = vector.shape_cast %281 : vector<1x1x16xf32> to vector<1x16xf32>
    %283 = vector.broadcast %282 : vector<1x16xf32> to vector<8x16xf32>
    %284 = arith.addf %280, %283 : vector<8x16xf32>
    %c6_193 = arith.constant 6 : index
    %c0_194 = arith.constant 0 : index
    %c0_195 = arith.constant 0 : index
    %285 = vector.load %arg7[%c6_193, %c0_194, %c0_195] : memref<8x128x16xbf16, #tpu.memory_space<vmem>>, vector<1x128x16xbf16>
    %286 = vector.shape_cast %285 : vector<1x128x16xbf16> to vector<128x16xbf16>
    %cst_196 = arith.constant dense<0.000000e+00> : vector<8x16xf32>
    %287 = tpu.matmul %5, %286, %cst_196 {dimension_numbers = #tpu.dot_dimension_numbers<[1], [0], [0], [1], [0, 0, 1, 1], [], []>} : vector<8x128xbf16>, vector<128x16xbf16>, vector<8x16xf32> -> vector<8x16xf32>
    %c6_197 = arith.constant 6 : index
    %c0_198 = arith.constant 0 : index
    %c0_199 = arith.constant 0 : index
    %288 = vector.load %arg8[%c6_197, %c0_198, %c0_199] : memref<8x1x16xf32, #tpu.memory_space<vmem>>, vector<1x1x16xf32>
    %289 = vector.shape_cast %288 : vector<1x1x16xf32> to vector<1x16xf32>
    %290 = vector.broadcast %289 : vector<1x16xf32> to vector<8x16xf32>
    %291 = arith.addf %287, %290 : vector<8x16xf32>
    %292 = arith.truncf %277 : vector<8x16xf32> to vector<8x16xbf16>
    %293 = arith.truncf %284 : vector<8x16xf32> to vector<8x16xbf16>
    %cst_200 = arith.constant dense<0.000000e+00> : vector<8x8xf32>
    %294 = tpu.matmul %292, %293, %cst_200 {dimension_numbers = #tpu.dot_dimension_numbers<[1], [1], [0], [0], [0, 0, 1, 0], [], []>} : vector<8x16xbf16>, vector<8x16xbf16>, vector<8x8xf32> -> vector<8x8xf32>
    %cst_201 = arith.constant 2.500000e-01 : f32
    %295 = vector.broadcast %cst_201 : f32 to vector<8x8xf32>
    %296 = arith.mulf %294, %295 : vector<8x8xf32>
    %cst_202 = arith.constant dense<0xFF800000> : vector<8xf32>
    %297 = vector.multi_reduction <maximumf>, %296, %cst_202 [1] : vector<8x8xf32> to vector<8xf32>
    %298 = vector.shape_cast %297 : vector<8xf32> to vector<8x1xf32>
    %299 = vector.broadcast %298 : vector<8x1xf32> to vector<8x8xf32>
    %300 = arith.subf %296, %299 : vector<8x8xf32>
    %301 = math.exp %300 : vector<8x8xf32>
    %cst_203 = arith.constant dense<0.000000e+00> : vector<8xf32>
    %302 = vector.multi_reduction <add>, %301, %cst_203 [1] : vector<8x8xf32> to vector<8xf32>
    %303 = vector.shape_cast %302 : vector<8xf32> to vector<8x1xf32>
    %304 = tpu.reciprocal %303 {approx = true} : vector<8x1xf32> -> vector<8x1xf32>
    %305 = vector.broadcast %304 : vector<8x1xf32> to vector<8x8xf32>
    %306 = arith.mulf %301, %305 : vector<8x8xf32>
    %307 = arith.truncf %306 : vector<8x8xf32> to vector<8x8xbf16>
    %308 = arith.truncf %291 : vector<8x16xf32> to vector<8x16xbf16>
    %cst_204 = arith.constant dense<0.000000e+00> : vector<8x16xf32>
    %309 = tpu.matmul %307, %308, %cst_204 {dimension_numbers = #tpu.dot_dimension_numbers<[1], [0], [0], [1], [0, 0, 1, 1], [], []>} : vector<8x8xbf16>, vector<8x16xbf16>, vector<8x16xf32> -> vector<8x16xf32>
    %310 = arith.truncf %309 : vector<8x16xf32> to vector<8x16xbf16>
    %c6_205 = arith.constant 6 : index
    %c0_206 = arith.constant 0 : index
    %c0_207 = arith.constant 0 : index
    %311 = vector.load %arg9[%c6_205, %c0_206, %c0_207] : memref<8x16x128xbf16, #tpu.memory_space<vmem>>, vector<1x16x128xbf16>
    %312 = vector.shape_cast %311 : vector<1x16x128xbf16> to vector<16x128xbf16>
    %cst_208 = arith.constant dense<0.000000e+00> : vector<8x128xf32>
    %313 = tpu.matmul %310, %312, %cst_208 {dimension_numbers = #tpu.dot_dimension_numbers<[1], [0], [0], [1], [0, 0, 1, 1], [], []>} : vector<8x16xbf16>, vector<16x128xbf16>, vector<8x128xf32> -> vector<8x128xf32>
    %314 = arith.addf %270, %313 : vector<8x128xf32>
    %c7 = arith.constant 7 : index
    %c0_209 = arith.constant 0 : index
    %c0_210 = arith.constant 0 : index
    %315 = vector.load %arg3[%c7, %c0_209, %c0_210] : memref<8x128x16xbf16, #tpu.memory_space<vmem>>, vector<1x128x16xbf16>
    %316 = vector.shape_cast %315 : vector<1x128x16xbf16> to vector<128x16xbf16>
    %cst_211 = arith.constant dense<0.000000e+00> : vector<8x16xf32>
    %317 = tpu.matmul %4, %316, %cst_211 {dimension_numbers = #tpu.dot_dimension_numbers<[1], [0], [0], [1], [0, 0, 1, 1], [], []>} : vector<8x128xbf16>, vector<128x16xbf16>, vector<8x16xf32> -> vector<8x16xf32>
    %c7_212 = arith.constant 7 : index
    %c0_213 = arith.constant 0 : index
    %c0_214 = arith.constant 0 : index
    %318 = vector.load %arg4[%c7_212, %c0_213, %c0_214] : memref<8x1x16xf32, #tpu.memory_space<vmem>>, vector<1x1x16xf32>
    %319 = vector.shape_cast %318 : vector<1x1x16xf32> to vector<1x16xf32>
    %320 = vector.broadcast %319 : vector<1x16xf32> to vector<8x16xf32>
    %321 = arith.addf %317, %320 : vector<8x16xf32>
    %c7_215 = arith.constant 7 : index
    %c0_216 = arith.constant 0 : index
    %c0_217 = arith.constant 0 : index
    %322 = vector.load %arg5[%c7_215, %c0_216, %c0_217] : memref<8x128x16xbf16, #tpu.memory_space<vmem>>, vector<1x128x16xbf16>
    %323 = vector.shape_cast %322 : vector<1x128x16xbf16> to vector<128x16xbf16>
    %cst_218 = arith.constant dense<0.000000e+00> : vector<8x16xf32>
    %324 = tpu.matmul %5, %323, %cst_218 {dimension_numbers = #tpu.dot_dimension_numbers<[1], [0], [0], [1], [0, 0, 1, 1], [], []>} : vector<8x128xbf16>, vector<128x16xbf16>, vector<8x16xf32> -> vector<8x16xf32>
    %c7_219 = arith.constant 7 : index
    %c0_220 = arith.constant 0 : index
    %c0_221 = arith.constant 0 : index
    %325 = vector.load %arg6[%c7_219, %c0_220, %c0_221] : memref<8x1x16xf32, #tpu.memory_space<vmem>>, vector<1x1x16xf32>
    %326 = vector.shape_cast %325 : vector<1x1x16xf32> to vector<1x16xf32>
    %327 = vector.broadcast %326 : vector<1x16xf32> to vector<8x16xf32>
    %328 = arith.addf %324, %327 : vector<8x16xf32>
    %c7_222 = arith.constant 7 : index
    %c0_223 = arith.constant 0 : index
    %c0_224 = arith.constant 0 : index
    %329 = vector.load %arg7[%c7_222, %c0_223, %c0_224] : memref<8x128x16xbf16, #tpu.memory_space<vmem>>, vector<1x128x16xbf16>
    %330 = vector.shape_cast %329 : vector<1x128x16xbf16> to vector<128x16xbf16>
    %cst_225 = arith.constant dense<0.000000e+00> : vector<8x16xf32>
    %331 = tpu.matmul %5, %330, %cst_225 {dimension_numbers = #tpu.dot_dimension_numbers<[1], [0], [0], [1], [0, 0, 1, 1], [], []>} : vector<8x128xbf16>, vector<128x16xbf16>, vector<8x16xf32> -> vector<8x16xf32>
    %c7_226 = arith.constant 7 : index
    %c0_227 = arith.constant 0 : index
    %c0_228 = arith.constant 0 : index
    %332 = vector.load %arg8[%c7_226, %c0_227, %c0_228] : memref<8x1x16xf32, #tpu.memory_space<vmem>>, vector<1x1x16xf32>
    %333 = vector.shape_cast %332 : vector<1x1x16xf32> to vector<1x16xf32>
    %334 = vector.broadcast %333 : vector<1x16xf32> to vector<8x16xf32>
    %335 = arith.addf %331, %334 : vector<8x16xf32>
    %336 = arith.truncf %321 : vector<8x16xf32> to vector<8x16xbf16>
    %337 = arith.truncf %328 : vector<8x16xf32> to vector<8x16xbf16>
    %cst_229 = arith.constant dense<0.000000e+00> : vector<8x8xf32>
    %338 = tpu.matmul %336, %337, %cst_229 {dimension_numbers = #tpu.dot_dimension_numbers<[1], [1], [0], [0], [0, 0, 1, 0], [], []>} : vector<8x16xbf16>, vector<8x16xbf16>, vector<8x8xf32> -> vector<8x8xf32>
    %cst_230 = arith.constant 2.500000e-01 : f32
    %339 = vector.broadcast %cst_230 : f32 to vector<8x8xf32>
    %340 = arith.mulf %338, %339 : vector<8x8xf32>
    %cst_231 = arith.constant dense<0xFF800000> : vector<8xf32>
    %341 = vector.multi_reduction <maximumf>, %340, %cst_231 [1] : vector<8x8xf32> to vector<8xf32>
    %342 = vector.shape_cast %341 : vector<8xf32> to vector<8x1xf32>
    %343 = vector.broadcast %342 : vector<8x1xf32> to vector<8x8xf32>
    %344 = arith.subf %340, %343 : vector<8x8xf32>
    %345 = math.exp %344 : vector<8x8xf32>
    %cst_232 = arith.constant dense<0.000000e+00> : vector<8xf32>
    %346 = vector.multi_reduction <add>, %345, %cst_232 [1] : vector<8x8xf32> to vector<8xf32>
    %347 = vector.shape_cast %346 : vector<8xf32> to vector<8x1xf32>
    %348 = tpu.reciprocal %347 {approx = true} : vector<8x1xf32> -> vector<8x1xf32>
    %349 = vector.broadcast %348 : vector<8x1xf32> to vector<8x8xf32>
    %350 = arith.mulf %345, %349 : vector<8x8xf32>
    %351 = arith.truncf %350 : vector<8x8xf32> to vector<8x8xbf16>
    %352 = arith.truncf %335 : vector<8x16xf32> to vector<8x16xbf16>
    %cst_233 = arith.constant dense<0.000000e+00> : vector<8x16xf32>
    %353 = tpu.matmul %351, %352, %cst_233 {dimension_numbers = #tpu.dot_dimension_numbers<[1], [0], [0], [1], [0, 0, 1, 1], [], []>} : vector<8x8xbf16>, vector<8x16xbf16>, vector<8x16xf32> -> vector<8x16xf32>
    %354 = arith.truncf %353 : vector<8x16xf32> to vector<8x16xbf16>
    %c7_234 = arith.constant 7 : index
    %c0_235 = arith.constant 0 : index
    %c0_236 = arith.constant 0 : index
    %355 = vector.load %arg9[%c7_234, %c0_235, %c0_236] : memref<8x16x128xbf16, #tpu.memory_space<vmem>>, vector<1x16x128xbf16>
    %356 = vector.shape_cast %355 : vector<1x16x128xbf16> to vector<16x128xbf16>
    %cst_237 = arith.constant dense<0.000000e+00> : vector<8x128xf32>
    %357 = tpu.matmul %354, %356, %cst_237 {dimension_numbers = #tpu.dot_dimension_numbers<[1], [0], [0], [1], [0, 0, 1, 1], [], []>} : vector<8x16xbf16>, vector<16x128xbf16>, vector<8x128xf32> -> vector<8x128xf32>
    %358 = arith.addf %314, %357 : vector<8x128xf32>
    %359 = arith.addf %1, %358 : vector<8x128xf32>
    %c0_238 = arith.constant 0 : index
    %c0_239 = arith.constant 0 : index
    %360 = vector.load %arg10[%c0_238, %c0_239] : memref<1x128xf32, #tpu.memory_space<vmem>>, vector<1x128xf32>
    %361 = vector.broadcast %360 : vector<1x128xf32> to vector<8x128xf32>
    %362 = arith.addf %359, %361 : vector<8x128xf32>
    %cst_240 = arith.constant dense<0.000000e+00> : vector<8xf32>
    %363 = vector.multi_reduction <add>, %362, %cst_240 [1] : vector<8x128xf32> to vector<8xf32>
    %364 = vector.shape_cast %363 : vector<8xf32> to vector<8x1xf32>
    %cst_241 = arith.constant 1.280000e+02 : f32
    %365 = vector.broadcast %cst_241 : f32 to vector<8x1xf32>
    %366 = arith.divf %364, %365 : vector<8x1xf32>
    %367 = vector.broadcast %366 : vector<8x1xf32> to vector<8x128xf32>
    %368 = arith.subf %362, %367 : vector<8x128xf32>
    %369 = arith.mulf %368, %368 : vector<8x128xf32>
    %cst_242 = arith.constant dense<0.000000e+00> : vector<8xf32>
    %370 = vector.multi_reduction <add>, %369, %cst_242 [1] : vector<8x128xf32> to vector<8xf32>
    %371 = vector.shape_cast %370 : vector<8xf32> to vector<8x1xf32>
    %cst_243 = arith.constant 1.280000e+02 : f32
    %372 = vector.broadcast %cst_243 : f32 to vector<8x1xf32>
    %373 = arith.divf %371, %372 : vector<8x1xf32>
    %374 = vector.broadcast %366 : vector<8x1xf32> to vector<8x128xf32>
    %375 = arith.subf %362, %374 : vector<8x128xf32>
    %cst_244 = arith.constant 9.99999974E-6 : f32
    %376 = vector.broadcast %cst_244 : f32 to vector<8x1xf32>
    %377 = arith.addf %373, %376 : vector<8x1xf32>
    %378 = math.rsqrt %377 : vector<8x1xf32>
    %379 = vector.broadcast %378 : vector<8x1xf32> to vector<8x128xf32>
    %380 = arith.mulf %375, %379 : vector<8x128xf32>
    %c0_245 = arith.constant 0 : index
    %c0_246 = arith.constant 0 : index
    %381 = vector.load %arg11[%c0_245, %c0_246] : memref<1x128xf32, #tpu.memory_space<vmem>>, vector<1x128xf32>
    %382 = vector.broadcast %381 : vector<1x128xf32> to vector<8x128xf32>
    %383 = arith.mulf %380, %382 : vector<8x128xf32>
    %c0_247 = arith.constant 0 : index
    %c0_248 = arith.constant 0 : index
    %384 = vector.load %arg12[%c0_247, %c0_248] : memref<1x128xf32, #tpu.memory_space<vmem>>, vector<1x128xf32>
    %385 = vector.broadcast %384 : vector<1x128xf32> to vector<8x128xf32>
    %386 = arith.addf %383, %385 : vector<8x128xf32>
    %c0_249 = arith.constant 0 : index
    %c0_250 = arith.constant 0 : index
    %c0_251 = arith.constant 0 : index
    %387 = vector.load %arg13[%c0_249, %c0_250, %c0_251] : memref<1x8x128xf32, #tpu.memory_space<vmem>>, vector<1x8x128xf32>
    %388 = vector.shape_cast %387 : vector<1x8x128xf32> to vector<8x128xf32>
    %389 = vector.shape_cast %386 : vector<8x128xf32> to vector<1x8x128xf32>
    tpu.vector_store %arg13[%c0_249, %c0_250, %c0_251], %389 {strides = array<i32>} : memref<1x8x128xf32, #tpu.memory_space<vmem>>, vector<1x8x128xf32>,
    return
  }
  func.func @transform_0(%arg0: i32) -> (i32, i32, i32) {
    %c0_i32 = arith.constant 0 : i32
    %c0_i32_0 = arith.constant 0 : i32
    %c0_i32_1 = arith.constant 0 : i32
    return %arg0, %c0_i32, %c0_i32_0 : i32, i32, i32
  }
  func.func @transform_1(%arg0: i32) -> (i32, i32, i32) {
    %c0_i32 = arith.constant 0 : i32
    %c0_i32_0 = arith.constant 0 : i32
    %c0_i32_1 = arith.constant 0 : i32
    return %arg0, %c0_i32, %c0_i32_0 : i32, i32, i32
  }
  func.func @transform_2(%arg0: i32) -> (i32, i32, i32) {
    %c0_i32 = arith.constant 0 : i32
    %c0_i32_0 = arith.constant 0 : i32
    %c0_i32_1 = arith.constant 0 : i32
    %c0_i32_2 = arith.constant 0 : i32
    return %c0_i32, %c0_i32_0, %c0_i32_1 : i32, i32, i32
  }
  func.func @transform_3(%arg0: i32) -> (i32, i32, i32) {
    %c0_i32 = arith.constant 0 : i32
    %c0_i32_0 = arith.constant 0 : i32
    %c0_i32_1 = arith.constant 0 : i32
    %c0_i32_2 = arith.constant 0 : i32
    return %c0_i32, %c0_i32_0, %c0_i32_1 : i32, i32, i32
  }
  func.func @transform_4(%arg0: i32) -> (i32, i32, i32) {
    %c0_i32 = arith.constant 0 : i32
    %c0_i32_0 = arith.constant 0 : i32
    %c0_i32_1 = arith.constant 0 : i32
    %c0_i32_2 = arith.constant 0 : i32
    return %c0_i32, %c0_i32_0, %c0_i32_1 : i32, i32, i32
  }
  func.func @transform_5(%arg0: i32) -> (i32, i32, i32) {
    %c0_i32 = arith.constant 0 : i32
    %c0_i32_0 = arith.constant 0 : i32
    %c0_i32_1 = arith.constant 0 : i32
    %c0_i32_2 = arith.constant 0 : i32
    return %c0_i32, %c0_i32_0, %c0_i32_1 : i32, i32, i32
  }
  func.func @transform_6(%arg0: i32) -> (i32, i32, i32) {
    %c0_i32 = arith.constant 0 : i32
    %c0_i32_0 = arith.constant 0 : i32
    %c0_i32_1 = arith.constant 0 : i32
    %c0_i32_2 = arith.constant 0 : i32
    return %c0_i32, %c0_i32_0, %c0_i32_1 : i32, i32, i32
  }
  func.func @transform_7(%arg0: i32) -> (i32, i32, i32) {
    %c0_i32 = arith.constant 0 : i32
    %c0_i32_0 = arith.constant 0 : i32
    %c0_i32_1 = arith.constant 0 : i32
    %c0_i32_2 = arith.constant 0 : i32
    return %c0_i32, %c0_i32_0, %c0_i32_1 : i32, i32, i32
  }
  func.func @transform_8(%arg0: i32) -> (i32, i32, i32) {
    %c0_i32 = arith.constant 0 : i32
    %c0_i32_0 = arith.constant 0 : i32
    %c0_i32_1 = arith.constant 0 : i32
    %c0_i32_2 = arith.constant 0 : i32
    return %c0_i32, %c0_i32_0, %c0_i32_1 : i32, i32, i32
  }
  func.func @transform_9(%arg0: i32) -> (i32, i32) {
    %c0_i32 = arith.constant 0 : i32
    %c0_i32_0 = arith.constant 0 : i32
    %c0_i32_1 = arith.constant 0 : i32
    return %c0_i32, %c0_i32_0 : i32, i32
  }
  func.func @transform_10(%arg0: i32) -> (i32, i32) {
    %c0_i32 = arith.constant 0 : i32
    %c0_i32_0 = arith.constant 0 : i32
    %c0_i32_1 = arith.constant 0 : i32
    return %c0_i32, %c0_i32_0 : i32, i32
  }
  func.func @transform_11(%arg0: i32) -> (i32, i32) {
    %c0_i32 = arith.constant 0 : i32
    %c0_i32_0 = arith.constant 0 : i32
    %c0_i32_1 = arith.constant 0 : i32
    return %c0_i32, %c0_i32_0 : i32, i32
  }
  func.func @transform_12(%arg0: i32) -> (i32, i32, i32) {
    %c0_i32 = arith.constant 0 : i32
    %c0_i32_0 = arith.constant 0 : i32
    %c0_i32_1 = arith.constant 0 : i32
    return %arg0, %c0_i32, %c0_i32_0 : i32, i32, i32
  }
}

module attributes {stable_mosaic.version = 11 : i64} {
  func.func @_moe_ln_kernel(%arg0: i32, %arg1: memref<8xi32, #tpu.memory_space<smem>>, %arg2: memref<16x128xf32, #tpu.memory_space<vmem>>, %arg3: memref<16x8xf32, #tpu.memory_space<vmem>>, %arg4: memref<1x128x512xbf16, #tpu.memory_space<vmem>>, %arg5: memref<1x1x512xf32, #tpu.memory_space<vmem>>, %arg6: memref<1x512x128xbf16, #tpu.memory_space<vmem>>, %arg7: memref<1x1x128xf32, #tpu.memory_space<vmem>>, %arg8: memref<1x128xf32, #tpu.memory_space<vmem>>, %arg9: memref<1x128xf32, #tpu.memory_space<vmem>>, %arg10: memref<16x128xf32, #tpu.memory_space<vmem>>, %arg11: memref<16x128xf32, #tpu.memory_space<vmem>>) attributes {dimension_semantics = [#tpu.dimension_semantics<arbitrary>], iteration_bounds = array<i64: 8>, scalar_prefetch = 1 : i64, scratch_operands = 1 : i64, tpu.core_type = #tpu.core_type<tc>, window_params = [{pipeline_mode = #tpu.pipeline_mode<synchronous>, transform_indices = @transform_0, window_bounds = array<i64: 16, 128>}, {pipeline_mode = #tpu.pipeline_mode<synchronous>, transform_indices = @transform_1, window_bounds = array<i64: 16, 8>}, {transform_indices = @transform_2, window_bounds = array<i64: 1, 128, 512>}, {transform_indices = @transform_3, window_bounds = array<i64: 1, 1, 512>}, {transform_indices = @transform_4, window_bounds = array<i64: 1, 512, 128>}, {transform_indices = @transform_5, window_bounds = array<i64: 1, 1, 128>}, {pipeline_mode = #tpu.pipeline_mode<synchronous>, transform_indices = @transform_6, window_bounds = array<i64: 1, 128>}, {pipeline_mode = #tpu.pipeline_mode<synchronous>, transform_indices = @transform_7, window_bounds = array<i64: 1, 128>}, {pipeline_mode = #tpu.pipeline_mode<synchronous>, transform_indices = @transform_8, window_bounds = array<i64: 16, 128>}]} {
    %c0_i32 = arith.constant 0 : i32
    %0 = arith.cmpi eq, %arg0, %c0_i32 : i32
    %1 = arith.extui %0 : i1 to i32
    %c0_i32_0 = arith.constant 0 : i32
    %2 = arith.cmpi ne, %1, %c0_i32_0 : i32
    scf.if %2 {
      %cst = arith.constant 0.000000e+00 : f32
      %11 = vector.broadcast %cst : f32 to vector<16x128xf32>
      %c0 = arith.constant 0 : index
      %c0_4 = arith.constant 0 : index
      %12 = vector.load %arg11[%c0, %c0_4] : memref<16x128xf32, #tpu.memory_space<vmem>>, vector<16x128xf32>
      tpu.vector_store %arg11[%c0, %c0_4], %11 {strides = array<i32>} : memref<16x128xf32, #tpu.memory_space<vmem>>, vector<16x128xf32>,
    } else {
    }
    %3 = arith.index_cast %arg0 : i32 to index
    %4 = memref.load %arg1[%3] : memref<8xi32, #tpu.memory_space<smem>>
    %c0_i32_1 = arith.constant 0 : i32
    %5 = arith.cmpi sgt, %4, %c0_i32_1 : i32
    %6 = arith.extui %5 : i1 to i32
    %c0_i32_2 = arith.constant 0 : i32
    %7 = arith.cmpi ne, %6, %c0_i32_2 : i32
    scf.if %7 {
      %c0 = arith.constant 0 : index
      %c0_4 = arith.constant 0 : index
      %11 = vector.load %arg2[%c0, %c0_4] : memref<16x128xf32, #tpu.memory_space<vmem>>, vector<16x128xf32>
      %12 = arith.truncf %11 : vector<16x128xf32> to vector<16x128xbf16>
      %c0_5 = arith.constant 0 : index
      %c0_6 = arith.constant 0 : index
      %c0_7 = arith.constant 0 : index
      %13 = vector.load %arg4[%c0_5, %c0_6, %c0_7] : memref<1x128x512xbf16, #tpu.memory_space<vmem>>, vector<1x128x512xbf16>
      %14 = vector.shape_cast %13 : vector<1x128x512xbf16> to vector<128x512xbf16>
      %cst = arith.constant dense<0.000000e+00> : vector<16x512xf32>
      %15 = tpu.matmul %12, %14, %cst {dimension_numbers = #tpu.dot_dimension_numbers<[1], [0], [0], [1], [0, 0, 1, 1], [], []>} : vector<16x128xbf16>, vector<128x512xbf16>, vector<16x512xf32> -> vector<16x512xf32>
      %c0_8 = arith.constant 0 : index
      %c0_9 = arith.constant 0 : index
      %c0_10 = arith.constant 0 : index
      %16 = vector.load %arg5[%c0_8, %c0_9, %c0_10] : memref<1x1x512xf32, #tpu.memory_space<vmem>>, vector<1x1x512xf32>
      %17 = vector.shape_cast %16 : vector<1x1x512xf32> to vector<1x512xf32>
      %18 = vector.broadcast %17 : vector<1x512xf32> to vector<16x512xf32>
      %19 = arith.addf %15, %18 : vector<16x512xf32>
      %cst_11 = arith.constant 0.000000e+00 : f32
      %20 = vector.broadcast %cst_11 : f32 to vector<16x512xf32>
      %21 = arith.maximumf %19, %20 : vector<16x512xf32>
      %22 = arith.truncf %21 : vector<16x512xf32> to vector<16x512xbf16>
      %c0_12 = arith.constant 0 : index
      %c0_13 = arith.constant 0 : index
      %c0_14 = arith.constant 0 : index
      %23 = vector.load %arg6[%c0_12, %c0_13, %c0_14] : memref<1x512x128xbf16, #tpu.memory_space<vmem>>, vector<1x512x128xbf16>
      %24 = vector.shape_cast %23 : vector<1x512x128xbf16> to vector<512x128xbf16>
      %cst_15 = arith.constant dense<0.000000e+00> : vector<16x128xf32>
      %25 = tpu.matmul %22, %24, %cst_15 {dimension_numbers = #tpu.dot_dimension_numbers<[1], [0], [0], [1], [0, 0, 1, 1], [], []>} : vector<16x512xbf16>, vector<512x128xbf16>, vector<16x128xf32> -> vector<16x128xf32>
      %c0_16 = arith.constant 0 : index
      %c0_17 = arith.constant 0 : index
      %c0_18 = arith.constant 0 : index
      %26 = vector.load %arg7[%c0_16, %c0_17, %c0_18] : memref<1x1x128xf32, #tpu.memory_space<vmem>>, vector<1x1x128xf32>
      %27 = vector.shape_cast %26 : vector<1x1x128xf32> to vector<1x128xf32>
      %28 = vector.broadcast %27 : vector<1x128xf32> to vector<16x128xf32>
      %29 = arith.addf %25, %28 : vector<16x128xf32>
      %30 = tpu.iota {dimensions = array<i32: 1>} : vector<16x8xi32>
      %31 = vector.broadcast %arg0 : i32 to vector<16x8xi32>
      %32 = arith.cmpi eq, %30, %31 : vector<16x8xi32>
      %c0_19 = arith.constant 0 : index
      %c0_20 = arith.constant 0 : index
      %33 = vector.load %arg3[%c0_19, %c0_20] : memref<16x8xf32, #tpu.memory_space<vmem>>, vector<16x8xf32>
      %cst_21 = arith.constant 0.000000e+00 : f32
      %34 = vector.broadcast %cst_21 : f32 to vector<16x8xf32>
      %35 = arith.select %32, %33, %34 : vector<16x8xi1>, vector<16x8xf32>
      %cst_22 = arith.constant dense<0.000000e+00> : vector<16xf32>
      %36 = vector.multi_reduction <add>, %35, %cst_22 [1] : vector<16x8xf32> to vector<16xf32>
      %37 = vector.shape_cast %36 : vector<16xf32> to vector<16x1xf32>
      %c0_23 = arith.constant 0 : index
      %c0_24 = arith.constant 0 : index
      %38 = vector.load %arg11[%c0_23, %c0_24] : memref<16x128xf32, #tpu.memory_space<vmem>>, vector<16x128xf32>
      %39 = vector.broadcast %37 : vector<16x1xf32> to vector<16x128xf32>
      %40 = arith.mulf %39, %29 : vector<16x128xf32>
      %41 = arith.addf %38, %40 : vector<16x128xf32>
      %c0_25 = arith.constant 0 : index
      %c0_26 = arith.constant 0 : index
      %42 = vector.load %arg11[%c0_25, %c0_26] : memref<16x128xf32, #tpu.memory_space<vmem>>, vector<16x128xf32>
      tpu.vector_store %arg11[%c0_25, %c0_26], %41 {strides = array<i32>} : memref<16x128xf32, #tpu.memory_space<vmem>>, vector<16x128xf32>,
    } else {
    }
    %c7_i32 = arith.constant 7 : i32
    %8 = arith.cmpi eq, %arg0, %c7_i32 : i32
    %9 = arith.extui %8 : i1 to i32
    %c0_i32_3 = arith.constant 0 : i32
    %10 = arith.cmpi ne, %9, %c0_i32_3 : i32
    scf.if %10 {
      %c0 = arith.constant 0 : index
      %c0_4 = arith.constant 0 : index
      %11 = vector.load %arg2[%c0, %c0_4] : memref<16x128xf32, #tpu.memory_space<vmem>>, vector<16x128xf32>
      %c0_5 = arith.constant 0 : index
      %c0_6 = arith.constant 0 : index
      %12 = vector.load %arg11[%c0_5, %c0_6] : memref<16x128xf32, #tpu.memory_space<vmem>>, vector<16x128xf32>
      %13 = arith.addf %11, %12 : vector<16x128xf32>
      %cst = arith.constant dense<0.000000e+00> : vector<16xf32>
      %14 = vector.multi_reduction <add>, %13, %cst [1] : vector<16x128xf32> to vector<16xf32>
      %15 = vector.shape_cast %14 : vector<16xf32> to vector<16x1xf32>
      %cst_7 = arith.constant 1.280000e+02 : f32
      %16 = vector.broadcast %cst_7 : f32 to vector<16x1xf32>
      %17 = arith.divf %15, %16 : vector<16x1xf32>
      %18 = vector.broadcast %17 : vector<16x1xf32> to vector<16x128xf32>
      %19 = arith.subf %13, %18 : vector<16x128xf32>
      %20 = arith.mulf %19, %19 : vector<16x128xf32>
      %cst_8 = arith.constant dense<0.000000e+00> : vector<16xf32>
      %21 = vector.multi_reduction <add>, %20, %cst_8 [1] : vector<16x128xf32> to vector<16xf32>
      %22 = vector.shape_cast %21 : vector<16xf32> to vector<16x1xf32>
      %cst_9 = arith.constant 1.280000e+02 : f32
      %23 = vector.broadcast %cst_9 : f32 to vector<16x1xf32>
      %24 = arith.divf %22, %23 : vector<16x1xf32>
      %25 = vector.broadcast %17 : vector<16x1xf32> to vector<16x128xf32>
      %26 = arith.subf %13, %25 : vector<16x128xf32>
      %cst_10 = arith.constant 9.99999974E-6 : f32
      %27 = vector.broadcast %cst_10 : f32 to vector<16x1xf32>
      %28 = arith.addf %24, %27 : vector<16x1xf32>
      %29 = math.rsqrt %28 : vector<16x1xf32>
      %30 = vector.broadcast %29 : vector<16x1xf32> to vector<16x128xf32>
      %31 = arith.mulf %26, %30 : vector<16x128xf32>
      %c0_11 = arith.constant 0 : index
      %c0_12 = arith.constant 0 : index
      %32 = vector.load %arg8[%c0_11, %c0_12] : memref<1x128xf32, #tpu.memory_space<vmem>>, vector<1x128xf32>
      %33 = vector.broadcast %32 : vector<1x128xf32> to vector<16x128xf32>
      %34 = arith.mulf %31, %33 : vector<16x128xf32>
      %c0_13 = arith.constant 0 : index
      %c0_14 = arith.constant 0 : index
      %35 = vector.load %arg9[%c0_13, %c0_14] : memref<1x128xf32, #tpu.memory_space<vmem>>, vector<1x128xf32>
      %36 = vector.broadcast %35 : vector<1x128xf32> to vector<16x128xf32>
      %37 = arith.addf %34, %36 : vector<16x128xf32>
      %c0_15 = arith.constant 0 : index
      %c0_16 = arith.constant 0 : index
      %38 = vector.load %arg10[%c0_15, %c0_16] : memref<16x128xf32, #tpu.memory_space<vmem>>, vector<16x128xf32>
      tpu.vector_store %arg10[%c0_15, %c0_16], %37 {strides = array<i32>} : memref<16x128xf32, #tpu.memory_space<vmem>>, vector<16x128xf32>,
    } else {
    }
    return
  }
  func.func @transform_0(%arg0: i32, %arg1: memref<8xi32, #tpu.memory_space<smem>>) -> (i32, i32) {
    %c0_i32 = arith.constant 0 : i32
    %c0_i32_0 = arith.constant 0 : i32
    %c0_i32_1 = arith.constant 0 : i32
    return %c0_i32, %c0_i32_0 : i32, i32
  }
  func.func @transform_1(%arg0: i32, %arg1: memref<8xi32, #tpu.memory_space<smem>>) -> (i32, i32) {
    %c0_i32 = arith.constant 0 : i32
    %c0_i32_0 = arith.constant 0 : i32
    %c0_i32_1 = arith.constant 0 : i32
    return %c0_i32, %c0_i32_0 : i32, i32
  }
  func.func @transform_2(%arg0: i32, %arg1: memref<8xi32, #tpu.memory_space<smem>>) -> (i32, i32, i32) {
    %c0_i32 = arith.constant 0 : i32
    %c0_i32_0 = arith.constant 0 : i32
    %c0_i32_1 = arith.constant 0 : i32
    return %arg0, %c0_i32, %c0_i32_0 : i32, i32, i32
  }
  func.func @transform_3(%arg0: i32, %arg1: memref<8xi32, #tpu.memory_space<smem>>) -> (i32, i32, i32) {
    %c0_i32 = arith.constant 0 : i32
    %c0_i32_0 = arith.constant 0 : i32
    %c0_i32_1 = arith.constant 0 : i32
    return %arg0, %c0_i32, %c0_i32_0 : i32, i32, i32
  }
  func.func @transform_4(%arg0: i32, %arg1: memref<8xi32, #tpu.memory_space<smem>>) -> (i32, i32, i32) {
    %c0_i32 = arith.constant 0 : i32
    %c0_i32_0 = arith.constant 0 : i32
    %c0_i32_1 = arith.constant 0 : i32
    return %arg0, %c0_i32, %c0_i32_0 : i32, i32, i32
  }
  func.func @transform_5(%arg0: i32, %arg1: memref<8xi32, #tpu.memory_space<smem>>) -> (i32, i32, i32) {
    %c0_i32 = arith.constant 0 : i32
    %c0_i32_0 = arith.constant 0 : i32
    %c0_i32_1 = arith.constant 0 : i32
    return %arg0, %c0_i32, %c0_i32_0 : i32, i32, i32
  }
  func.func @transform_6(%arg0: i32, %arg1: memref<8xi32, #tpu.memory_space<smem>>) -> (i32, i32) {
    %c0_i32 = arith.constant 0 : i32
    %c0_i32_0 = arith.constant 0 : i32
    %c0_i32_1 = arith.constant 0 : i32
    return %c0_i32, %c0_i32_0 : i32, i32
  }
  func.func @transform_7(%arg0: i32, %arg1: memref<8xi32, #tpu.memory_space<smem>>) -> (i32, i32) {
    %c0_i32 = arith.constant 0 : i32
    %c0_i32_0 = arith.constant 0 : i32
    %c0_i32_1 = arith.constant 0 : i32
    return %c0_i32, %c0_i32_0 : i32, i32
  }
  func.func @transform_8(%arg0: i32, %arg1: memref<8xi32, #tpu.memory_space<smem>>) -> (i32, i32) {
    %c0_i32 = arith.constant 0 : i32
    %c0_i32_0 = arith.constant 0 : i32
    %c0_i32_1 = arith.constant 0 : i32
    return %c0_i32, %c0_i32_0 : i32, i32
  }
}

</mosaic_0001>

<bundles_post_ra>
// kernel: decoder_layer.6
= control target key start
LH: loop header
LB: loop body
LE: loop exit
PB: predicated region body
PF: predicated region fallthrough
CT: control target
= control target key end

     0   :  { %v185_v0 = vmov 0.0   ;;  %vm186_vm0 = vmmov 0   ;;  %vm130_vm1 = vcmask 130048   ;;  %s246_s1 = inlined_call_operand.vmem [shape: bf16[128,16], index: 1, kind: input, shape index: {}]   ;;  %s247_s0 = inlined_call_operand.vmem [shape: f32[16,128], index: 0, kind: input, shape index: {}]   ;;  %s248_s2 = inlined_call_operand.vmem [shape: f32[1,16], index: 2, kind: input, shape index: {}]   ;;  %s249_s3 = inlined_call_operand.vmem [shape: f32[16,16], index: 3, kind: output, shape index: {}]  }
   0x1   :  { %155 = vmatprep.subr.bf16.mxu0 %v185_v0  ;;  %v177_v1 = vld [vmem:[%s246_s1] sm:$0xff]   ;;  %171 = vmatprep.mubr.msk.bf16.mxu0 %vm186_vm0, %v185_v0  ;;  %v178_v2 = vld [vmem:[%s246_s1 + $0x8] sm:$0xff]   ;;  %v179_v3 = vld [vmem:[%s246_s1 + $0x10] sm:$0xff]  }
   0x2   :  { %156 = vmatpush3.bf16.msra.mxu0 %v177_v1  ;;  %v180_v4 = vld [vmem:[%s246_s1 + $0x18] sm:$0xff]   ;;  %v181_v5 = vld [vmem:[%s246_s1 + $0x20] sm:$0xff]   ;;  %v182_v6 = vld [vmem:[%s246_s1 + $0x28] sm:$0xff]  }
   0x3   :  { %157 = vmatprep.subr.bf16.mxu0 %v185_v0  ;;  %v183_v7 = vld [vmem:[%s246_s1 + $0x30] sm:$0xff]   ;;  %v184_v8 = vld [vmem:[%s246_s1 + $0x38] sm:$0xff]   ;;  %v15_v9 = vld [vmem:[%s247_s0] sm:$0xff] }
   0x4   :  { %v16_v10 = vld [vmem:[%s247_s0 + $0x8] sm:$0xff]  ;;  %v137_v12 = vld [vmem:[%s248_s2] ss:$0 sm:$0xff] }
   0x5   :  { %v17_v11 = vpack.c.bf16 %v16_v10, %v15_v9 }
   0x6   :  { %158 = vmatpush3.bf16.msra.mxu0 %v178_v2 }
   0x7   :  { %159 = vmatprep.subr.bf16.mxu0 %v185_v0 }
   0xa   :  { %160 = vmatpush3.bf16.msra.mxu0 %v179_v3 }
   0xb   :  { %161 = vmatprep.subr.bf16.mxu0 %v185_v0 }
   0xe   :  { %162 = vmatpush3.bf16.msra.mxu0 %v180_v4 }
   0xf   :  { %163 = vmatprep.subr.bf16.mxu0 %v185_v0 }
  0x12   :  { %164 = vmatpush3.bf16.msra.mxu0 %v181_v5 }
  0x13   :  { %165 = vmatprep.subr.bf16.mxu0 %v185_v0 }
  0x16   :  { %166 = vmatpush3.bf16.msra.mxu0 %v182_v6 }
  0x17   :  { %167 = vmatprep.subr.bf16.mxu0 %v185_v0 }
  0x1a   :  { %168 = vmatpush3.bf16.msra.mxu0 %v183_v7 }
  0x1b   :  { %169 = vmatprep.subr.bf16.mxu0 %v185_v0 }
  0x1e   :  { %170 = vmatpush3.bf16.msra.mxu0 %v184_v8 }
  0x21   :  { %172 = vmatmul.mubr.bf16.vlgmr.msra.gmra.mrb[0].mxu0 %v17_v11 }
  0xf4   :  { %v123_v13 = vpop.f32.mrb[0].mxu0 }
  0xf5   :  { %v124_v14 = vadd.f32 %v137_v12, %v123_v13  ;;  %v173_v15 = vpop.f32.mrb[1].mxu0 }
  0xf6   :  { %v126_v16 = vpop.f32.mrb[2].mxu0 }
  0xf7   :  { %131 = vst.msk [vmem:[%s249_s3] sm:$0xff] %vm130_vm1, %v124_v14  ;;  %v127_v17 = vadd.f32 %v137_v12, %v126_v16  ;;  %v174_v18 = vpop.f32.mrb[3].mxu0 }
  0xf9   :  { %132 = vst.msk [vmem:[%s249_s3 + $0x8] sm:$0xff] %vm130_vm1, %v127_v17 }

// kernel: decoder_layer.7
= control target key start
LH: loop header
LB: loop body
LE: loop exit
PB: predicated region body
PF: predicated region fallthrough
CT: control target
= control target key end

     0   :  { %s1682_s0 = inlined_call_operand.vmem [shape: s32[8], index: 0, kind: input, shape index: {}]   ;;  %s1683_s1 = inlined_call_operand.vmem [shape: f32[16,128], index: 1, kind: input, shape index: {}]   ;;  %s1684_s2 = inlined_call_operand.vmem [shape: f32[16,8], index: 2, kind: input, shape index: {}]   ;;  %s1685_s3 = inlined_call_operand.vmem [shape: bf16[8,128,512], index: 3, kind: input, shape index: {}]   ;;  %s1686_s4 = inlined_call_operand.vmem [shape: f32[8,1,512], index: 4, kind: input, shape index: {}]   ;;  %s1687_s5 = inlined_call_operand.vmem [shape: bf16[8,512,128], index: 5, kind: input, shape index: {}]   ;;  %s1688_s6 = inlined_call_operand.vmem [shape: f32[8,1,128], index: 6, kind: input, shape index: {}]   ;;  %s1689_s7 = inlined_call_operand.vmem [shape: f32[1,128], index: 7, kind: input, shape index: {}]   ;;  %s1690_s8 = inlined_call_operand.vmem [shape: f32[1,128], index: 8, kind: input, shape index: {}]   ;;  %s1691_s9 = inlined_call_operand.hbm [shape: f32[16,128], index: 9, kind: output, shape index: {}]  }
   0x1   :  { %s14_s11 = sshll.u32 %s1682_s0, 4  ;;  %s15_s11 = int_to_ptr.vmem [resolvable:$true] %s14_s11 }
   0x2   :  { %s1412_s12 = scalar_lea.vmem %s15_s11, 16  ;;  %p1417_p1 = scmp.lt.s32.totalorder %s15_s11, %s15_s11 }
   0x3   :  { %p1413_p0 = scmp.ne.s32.totalorder %s15_s11, %s1412_s12  ;;  %p1418_p2 = scmp.lt.s32.totalorder %s1412_s12, %s1412_s12 }
   0x5   :  { %p1419_p3 = por %p1418_p2, %p1417_p1 }
   0x7   :  { %p1420_p4 = pnand %p1419_p3, %p1413_p0 }
   0x9   :  { %1423 = shalt.err (!%p1420_p4)  }
   0xa   :  { %s1464_s13 = smov [#allocation4]  }
   0xb   :  { %17 = dma.vmem_to_smem %s15_s11, 16, %s1464_s13, [#allocation3] }
   0xc   :  { %1454 = dma.done.wait [#allocation3], 16 }
   0xd   :  { %1455 = vsyncadd [#allocation3], 4294967280 }
   0xe   :  { %19 = sfence }
   0xf   :  { %20 = vsyncpa [#allocation6], 0  ;;  %s1523_s14 = smov 0  }
  0x10 LB: > { %s1529_s0 = sadd.s32 4294967295, %s1462_s14   ;;  %p1182_p5 = scmp.ge.s32.totalorder %s1462_s14, 1  ;;  %s1462_s14 = sphi %s1523_s14, %s26_s14  }
  0x11   : > { %p292_p6 = scmp.lt.s32.totalorder %s1462_s14, 9 }
  0x13   : > { %p293_p7 = pnand %p1182_p5, %p292_p6 }
  0x14   : > { %p333_p8 = scmp.lt.s32.totalorder (!%p293_p7), %s1529_s0, 7  ;;  %p1188_p9 = scmp.ne.s32.totalorder (!%p293_p7), %s1529_s0, 0 }
  0x15   : > { %296 = sbr.rel (%p293_p7) target bundleno = 874 (0x36a), region = 52 }
  0x1c   : > { %s1535_s15 = scalar_select %p333_p8, %s1529_s0, 7 }
  0x1d   : > { %354 = sbr.rel (%p1188_p9) target bundleno = 36 (0x24), region = 56  ;;  %v1465_v0 = vmov (!%p1188_p9), 0.0  }
  0x1e   : > { %s1262_s16 = sshll.u32 %s1535_s15, 8  ;;  %s1185_s17 = sshll.u32 %s1535_s15, 2  ;;  %355 = vst [vmem:[#allocation2] sm:$0xff] (!%p1188_p9), %v1465_v0  ;;  %356 = vst [vmem:[#allocation2 + $0x8] sm:$0xff] (!%p1188_p9), %v1465_v0 }
  0x1f   : > { %s1542_s20 = scalar_lea.vmem %s1685_s3, %s1262_s16  ;;  %s1547_s23 = scalar_lea.vmem %s1686_s4, %s1185_s17 }
  0x20   : > { %s1552_s26 = scalar_lea.vmem %s1687_s5, %s1262_s16  ;;  %s349_s29 = scalar_lea.vmem %s1688_s6, %s1535_s15 }
  0x24 PF: > { %s357_s30 = sld [smem:[#allocation4 + %s1529_s0]] }
  0x2a   : > { %p1189_p10 = scmp.le.s32.totalorder %s357_s30, 0 }
  0x2b   : > { %v1328_v1 = vld [vmem:[%s1542_s20 + $0x4] ss:$16 sps:$4 sm:$0xff] (!%p1189_p10)   ;;  %v1330_v2 = vld [vmem:[%s1542_s20 + $0xc] ss:$16 sps:$4 sm:$0xff] (!%p1189_p10)   ;;  %v1466_v3 = vmov (!%p1189_p10), 0   ;;  %vm1030_vm0 = vcmask (!%p1189_p10), 64512  }
  0x2c   : > { %361 = sbr.rel (%p1189_p10) target bundleno = 525 (0x20d), region = 60  ;;  %611 = vmatprep.mubr.bf16.mxu0 (!%p1189_p10), %v1466_v3  ;;  %654 = vmatprep.mubr.bf16.mxu1 (!%p1189_p10), %v1466_v3  ;;  %v1332_v4 = vld [vmem:[%s1542_s20] ss:$16 sps:$4 sm:$0xff] (!%p1189_p10)   ;;  %v1333_v5 = vld [vmem:[%s1542_s20 + $0x8] ss:$16 sps:$4 sm:$0xff] (!%p1189_p10)  }
  0x2d   : > { %579 = vmatprep.subr.bf16.mxu0 (!%p1189_p10), %v1328_v1  ;;  %622 = vmatprep.subr.bf16.mxu1 (!%p1189_p10), %v1330_v2  ;;  %v1334_v6 = vld [vmem:[%s1542_s20 + $0x24] ss:$16 sps:$4 sm:$0xff] (!%p1189_p10)   ;;  %v1336_v7 = vld [vmem:[%s1542_s20 + $0x2c] ss:$16 sps:$4 sm:$0xff] (!%p1189_p10)   ;;  %v1338_v8 = vld [vmem:[%s1542_s20 + $0x20] ss:$16 sps:$4 sm:$0xff] (!%p1189_p10)  }
  0x2e   : > { %580 = vmatpush1.bf16.msra.mxu0 (!%p1189_p10), %v1332_v4  ;;  %623 = vmatpush1.bf16.msra.mxu1 (!%p1189_p10), %v1333_v5  ;;  %v1339_v9 = vld [vmem:[%s1542_s20 + $0x28] ss:$16 sps:$4 sm:$0xff] (!%p1189_p10)   ;;  %v1340_v10 = vld [vmem:[%s1542_s20 + $0x44] ss:$16 sps:$4 sm:$0xff] (!%p1189_p10)   ;;  %v1342_v11 = vld [vmem:[%s1542_s20 + $0x4c] ss:$16 sps:$4 sm:$0xff] (!%p1189_p10)   ;;  %v399_v5 = vlaneseq (!%p1189_p10) }
  0x2f   : > { %581 = vmatprep.subr.bf16.mxu0 (!%p1189_p10), %v1334_v6  ;;  %624 = vmatprep.subr.bf16.mxu1 (!%p1189_p10), %v1336_v7  ;;  %v1344_v12 = vld [vmem:[%s1542_s20 + $0x40] ss:$16 sps:$4 sm:$0xff] (!%p1189_p10)   ;;  %v1345_v13 = vld [vmem:[%s1542_s20 + $0x48] ss:$16 sps:$4 sm:$0xff] (!%p1189_p10)   ;;  %v1346_v14 = vld [vmem:[%s1542_s20 + $0x64] ss:$16 sps:$4 sm:$0xff] (!%p1189_p10)   ;;  %v1024_v7 = vstv (!%p1189_p10), %s1529_s0 }
  0x30   : > { %v1348_v15 = vld [vmem:[%s1542_s20 + $0x6c] ss:$16 sps:$4 sm:$0xff] (!%p1189_p10)   ;;  %v1350_v16 = vld [vmem:[%s1542_s20 + $0x60] ss:$16 sps:$4 sm:$0xff] (!%p1189_p10)   ;;  %v1351_v17 = vld [vmem:[%s1542_s20 + $0x68] ss:$16 sps:$4 sm:$0xff] (!%p1189_p10)  }
  0x31   : > { %v1352_v18 = vld [vmem:[%s1542_s20 + $0x84] ss:$16 sps:$4 sm:$0xff] (!%p1189_p10)   ;;  %v1354_v19 = vld [vmem:[%s1542_s20 + $0x8c] ss:$16 sps:$4 sm:$0xff] (!%p1189_p10)   ;;  %v1356_v20 = vld [vmem:[%s1542_s20 + $0x80] ss:$16 sps:$4 sm:$0xff] (!%p1189_p10)  }
  0x32   : > { %582 = vmatpush1.bf16.msra.mxu0 (!%p1189_p10), %v1338_v8  ;;  %625 = vmatpush1.bf16.msra.mxu1 (!%p1189_p10), %v1339_v9  ;;  %v1357_v21 = vld [vmem:[%s1542_s20 + $0x88] ss:$16 sps:$4 sm:$0xff] (!%p1189_p10)   ;;  %v1358_v22 = vld [vmem:[%s1542_s20 + $0xa4] ss:$16 sps:$4 sm:$0xff] (!%p1189_p10)   ;;  %v1360_v23 = vld [vmem:[%s1542_s20 + $0xac] ss:$16 sps:$4 sm:$0xff] (!%p1189_p10)  }
  0x33   : > { %583 = vmatprep.subr.bf16.mxu0 %v1340_v10  ;;  %626 = vmatprep.subr.bf16.mxu1 %v1342_v11  ;;  %v1362_v24 = vld [vmem:[%s1542_s20 + $0xa0] ss:$16 sps:$4 sm:$0xff]   ;;  %v1363_v25 = vld [vmem:[%s1542_s20 + $0xa8] ss:$16 sps:$4 sm:$0xff]   ;;  %v1364_v26 = vld [vmem:[%s1542_s20 + $0xc4] ss:$16 sps:$4 sm:$0xff]  }
  0x34   : > { %v1366_v27 = vld [vmem:[%s1542_s20 + $0xcc] ss:$16 sps:$4 sm:$0xff]   ;;  %v1368_v28 = vld [vmem:[%s1542_s20 + $0xc0] ss:$16 sps:$4 sm:$0xff]   ;;  %v1369_v29 = vld [vmem:[%s1542_s20 + $0xc8] ss:$16 sps:$4 sm:$0xff]  }
  0x35   : > { %v1370_v30 = vld [vmem:[%s1542_s20 + $0xe4] ss:$16 sps:$4 sm:$0xff]   ;;  %v1372_v31 = vld [vmem:[%s1542_s20 + $0xec] ss:$16 sps:$4 sm:$0xff]   ;;  %v1374_v32 = vld [vmem:[%s1542_s20 + $0xe0] ss:$16 sps:$4 sm:$0xff]  }
  0x36   : > { %584 = vmatpush1.bf16.msra.mxu0 %v1344_v12  ;;  %627 = vmatpush1.bf16.msra.mxu1 %v1345_v13  ;;  %v1375_v33 = vld [vmem:[%s1542_s20 + $0xe8] ss:$16 sps:$4 sm:$0xff]   ;;  %v362_v34 = vld [vmem:[%s1683_s1] sm:$0xff]  ;;  %v1384_v45 = vld [vmem:[%s1552_s26 + $0x50] sm:$0xff]   ;;  %v1023_v6 = vand.u32 127, %v399_v5 }
  0x37   : > { %585 = vmatprep.subr.bf16.mxu0 %v1346_v14  ;;  %628 = vmatprep.subr.bf16.mxu1 %v1348_v15  ;;  %v363_v35 = vld [vmem:[%s1683_s1 + $0x8] sm:$0xff]  ;;  %v1376_v36 = vld [vmem:[%s1552_s26 + $0x40] sm:$0xff]   ;;  %v1385_v46 = vld [vmem:[%s1552_s26 + $0xd0] sm:$0xff]   ;;  %v400_v14 = vshrl.u32 %v399_v5, 7 }
  0x38   : > { %v1377_v37 = vld [vmem:[%s1552_s26 + $0xc0] sm:$0xff]   ;;  %v364_v39 = vpack.c.bf16 %v363_v35, %v362_v34  ;;  %v1380_v41 = vld [vmem:[%s1552_s26 + $0x48] sm:$0xff]   ;;  %v1386_v47 = vld [vmem:[%s1552_s26 + $0x10] sm:$0xff]   ;;  %vm1025_vm1 = vcmp.eq.s32.totalorder %v1023_v6, %v1024_v7 }
  0x39   : > { %v1378_v38 = vld [vmem:[%s1552_s26] sm:$0xff]   ;;  %v1381_v42 = vld [vmem:[%s1552_s26 + $0xc8] sm:$0xff]   ;;  %v1387_v48 = vld [vmem:[%s1552_s26 + $0x90] sm:$0xff]   ;;  %v401_v15 = vsub.s32 0, %v400_v14 }
  0x3a   : > { %586 = vmatpush1.bf16.msra.mxu0 %v1350_v16  ;;  %629 = vmatpush1.bf16.msra.mxu1 %v1351_v17  ;;  %v1379_v40 = vld [vmem:[%s1552_s26 + $0x80] sm:$0xff]   ;;  %v1382_v43 = vld [vmem:[%s1552_s26 + $0x8] sm:$0xff]   ;;  %v1388_v49 = vld [vmem:[%s1552_s26 + $0x58] sm:$0xff]   ;;  %v409_v16 = vsub.s32 2, %v400_v14 }
  0x3b   : > { %587 = vmatprep.subr.bf16.mxu0 %v1352_v18  ;;  %630 = vmatprep.subr.bf16.mxu1 %v1354_v19  ;;  %v1383_v44 = vld [vmem:[%s1552_s26 + $0x88] sm:$0xff]   ;;  %v1389_v50 = vld [vmem:[%s1552_s26 + $0xd8] sm:$0xff]   ;;  %v1392_v53 = vld [vmem:[%s1552_s26 + $0x60] sm:$0xff]   ;;  %v405_v18 = vsub.s32 1, %v400_v14  ;;  %v413_v19 = vsub.s32 3, %v400_v14 }
  0x3c   : > { %v1390_v51 = vld [vmem:[%s1552_s26 + $0x18] sm:$0xff]   ;;  %v1393_v54 = vld [vmem:[%s1552_s26 + $0xe0] sm:$0xff]   ;;  %v1396_v57 = vld [vmem:[%s1552_s26 + $0x68] sm:$0xff]  }
  0x3d   : > { %v1391_v52 = vld [vmem:[%s1552_s26 + $0x98] sm:$0xff]   ;;  %v1394_v55 = vld [vmem:[%s1552_s26 + $0x20] sm:$0xff]   ;;  %v1397_v58 = vld [vmem:[%s1552_s26 + $0xe8] sm:$0xff]  }
  0x3e   : > { %588 = vmatpush1.bf16.msra.mxu0 %v1356_v20  ;;  %631 = vmatpush1.bf16.msra.mxu1 %v1357_v21  ;;  %v1395_v56 = vld [vmem:[%s1552_s26 + $0xa0] sm:$0xff]   ;;  %v1398_v59 = vld [vmem:[%s1552_s26 + $0x28] sm:$0xff]   ;;  %v1400_v61 = vld [vmem:[%s1552_s26 + $0x70] sm:$0xff]  }
  0x3f   : > { %589 = vmatprep.subr.bf16.mxu0 %v1358_v22  ;;  %632 = vmatprep.subr.bf16.mxu1 %v1360_v23  ;;  %v1399_v60 = vld [vmem:[%s1552_s26 + $0xa8] sm:$0xff]   ;;  %v1401_v62 = vld [vmem:[%s1552_s26 + $0xf0] sm:$0xff]   ;;  %v1404_v1 = vld [vmem:[%s1552_s26 + $0x78] sm:$0xff]  }
  0x40   : > { %v1402_v63 = vld [vmem:[%s1552_s26 + $0x30] sm:$0xff]   ;;  %v1405_v2 = vld [vmem:[%s1552_s26 + $0xf8] sm:$0xff]   ;;  %v1026_v8 = vld [vmem:[%s1684_s2] sm:$0xff] }
  0x41   : > { %v1403_v0 = vld [vmem:[%s1552_s26 + $0xb0] sm:$0xff]   ;;  %v1406_v3 = vld [vmem:[%s1552_s26 + $0x38] sm:$0xff]   ;;  %v1027_v9 = vld [vmem:[%s1684_s2 + $0x8] sm:$0xff]  ;;  %v1028_v10 = vsel %vm1025_vm1, %v1026_v8, 0.0 }
  0x42   : > { %590 = vmatpush1.bf16.msra.mxu0 %v1362_v24  ;;  %633 = vmatpush1.bf16.msra.mxu1 %v1363_v25  ;;  %v1407_v4 = vld [vmem:[%s1552_s26 + $0xb8] sm:$0xff]   ;;  %v1029_v11 = vsel %vm1025_vm1, %v1027_v9, 0.0  ;;  %v1031_v12 = vsel %vm1030_vm0, %v1028_v10, 0.0  ;;  %v397_v17 = vld [vmem:[%s1547_s23] sm:$0xf]  ;;  %v1038_v9 = vld [vmem:[#allocation2 + $0x8] sm:$0xff] }
  0x43   : > { %591 = vmatprep.subr.bf16.mxu0 %v1364_v26  ;;  %634 = vmatprep.subr.bf16.mxu1 %v1366_v27  ;;  %v1034_v13 = vsel %vm1030_vm0, %v1029_v11, 0.0  ;;  %v402_v20 = vrot.slane %v397_v17, %v401_v15  ;;  %v410_v21 = vrot.slane %v397_v17, %v409_v16  ;;  %v406_v22 = vrot.slane %v397_v17, %v405_v18  ;;  %v1037_v5 = vld [vmem:[#allocation2] sm:$0xff] }
  0x44   : > { %1032 = vadd.xlane.f32.xlu0 %v1031_v12  ;;  %v414_v23 = vrot.slane %v397_v17, %v413_v19 }
  0x46   : > { %592 = vmatpush1.bf16.msra.mxu0 %v1368_v28  ;;  %635 = vmatpush1.bf16.msra.mxu1 %v1369_v29 }
  0x47   : > { %593 = vmatprep.subr.bf16.mxu0 %v1370_v30  ;;  %636 = vmatprep.subr.bf16.mxu1 %v1372_v31 }
  0x48   : > { %1035 = vadd.xlane.f32.xlu0 %v1034_v13 }
  0x4a   : > { %594 = vmatpush1.bf16.msra.mxu0 %v1374_v32  ;;  %637 = vmatpush1.bf16.msra.mxu1 %v1375_v33 }
  0x4b   : > { %1264 = vmatprep.subr.bf16.mxu0 %v1376_v36  ;;  %1286 = vmatprep.subr.bf16.mxu1 %v1377_v37 }
  0x4d   : > { %612 = vmatmul.mubr.bf16.vlgmr.msra.gmra.mrb[0].mxu0 %v364_v39  ;;  %655 = vmatmul.mubr.bf16.vlgmr.msra.gmra.mrb[0].mxu1 %v364_v39 }
  0x4e   : > { %1265 = vmatpush3.bf16.msra.mxu0 %v1378_v38  ;;  %1287 = vmatpush3.bf16.msra.mxu1 %v1379_v40 }
  0x4f   : > { %1266 = vmatprep.subr.bf16.mxu0 %v1380_v41  ;;  %1288 = vmatprep.subr.bf16.mxu1 %v1381_v42 }
  0x52   : > { %1267 = vmatpush3.bf16.msra.mxu0 %v1382_v43  ;;  %1289 = vmatpush3.bf16.msra.mxu1 %v1383_v44 }
  0x53   : > { %1268 = vmatprep.subr.bf16.mxu0 %v1384_v45  ;;  %1290 = vmatprep.subr.bf16.mxu1 %v1385_v46 }
  0x56   : > { %1269 = vmatpush3.bf16.msra.mxu0 %v1386_v47  ;;  %1291 = vmatpush3.bf16.msra.mxu1 %v1387_v48 }
  0x57   : > { %1270 = vmatprep.subr.bf16.mxu0 %v1388_v49  ;;  %1292 = vmatprep.subr.bf16.mxu1 %v1389_v50 }
  0x5a   : > { %1271 = vmatpush3.bf16.msra.mxu0 %v1390_v51  ;;  %1293 = vmatpush3.bf16.msra.mxu1 %v1391_v52 }
  0x5b   : > { %1272 = vmatprep.subr.bf16.mxu0 %v1392_v53  ;;  %1294 = vmatprep.subr.bf16.mxu1 %v1393_v54 }
  0x5e   : > { %1273 = vmatpush3.bf16.msra.mxu0 %v1394_v55  ;;  %1295 = vmatpush3.bf16.msra.mxu1 %v1395_v56  ;;  %v1222_v55 = vld [vmem:[%s349_s29] ss:$0 sm:$0xff] }
  0x5f   : > { %1274 = vmatprep.subr.bf16.mxu0 %v1396_v57  ;;  %1296 = vmatprep.subr.bf16.mxu1 %v1397_v58 }
  0x62   : > { %1275 = vmatpush3.bf16.msra.mxu0 %v1398_v59  ;;  %1297 = vmatpush3.bf16.msra.mxu1 %v1399_v60 }
  0x63   : > { %1276 = vmatprep.subr.bf16.mxu0 %v1400_v61  ;;  %1298 = vmatprep.subr.bf16.mxu1 %v1401_v62 }
  0x66   : > { %1277 = vmatpush3.bf16.msra.mxu0 %v1402_v63  ;;  %1299 = vmatpush3.bf16.msra.mxu1 %v1403_v0 }
  0x67   : > { %1278 = vmatprep.subr.bf16.mxu0 %v1404_v1  ;;  %1300 = vmatprep.subr.bf16.mxu1 %v1405_v2 }
  0x6a   : > { %1279 = vmatpush3.bf16.msra.mxu0 %v1406_v3  ;;  %1301 = vmatpush3.bf16.msra.mxu1 %v1407_v4 }
  0xd1   : > { %v1033_v52 = vpop.xlane.xlu0 %1032 }
  0xd5   : > { %v1036_v6 = vpop.xlane.xlu0 %1035 }
 0x120   : > { %v613_v24 = vpop.f32.mrb[0].mxu0  ;;  %v656_v25 = vpop.f32.mrb[0].mxu1 }
 0x121   : > { %v614_v26 = vadd.f32 %v613_v24, %v402_v20  ;;  %v657_v27 = vadd.f32 %v656_v25, %v410_v21  ;;  %v615_v28 = vpop.f32.mrb[1].mxu0  ;;  %v658_v29 = vpop.f32.mrb[1].mxu1 }
 0x122   : > { %v616_v30 = vadd.f32 %v615_v28, %v406_v22  ;;  %v659_v31 = vadd.f32 %v658_v29, %v414_v23  ;;  %v617_v32 = vpop.f32.mrb[2].mxu0  ;;  %v660_v33 = vpop.f32.mrb[2].mxu1 }
 0x123   : > { %v667_v34 = vmax.f32 %v657_v27, 0.0  ;;  %v618_v35 = vadd.f32 %v617_v32, %v402_v20  ;;  %v661_v36 = vadd.f32 %v660_v33, %v410_v21  ;;  %v619_v37 = vpop.f32.mrb[3].mxu0  ;;  %v662_v38 = vpop.f32.mrb[3].mxu1  ;;  %v665_v42 = vmax.f32 %v614_v26, 0.0 }
 0x124   : > { %v668_v39 = vmax.f32 %v659_v31, 0.0  ;;  %v620_v40 = vadd.f32 %v619_v37, %v406_v22  ;;  %v663_v41 = vadd.f32 %v662_v38, %v414_v23  ;;  %v666_v45 = vmax.f32 %v616_v30, 0.0 }
 0x125   : > { %v669_v43 = vmax.f32 %v618_v35, 0.0  ;;  %v671_v44 = vmax.f32 %v661_v36, 0.0 }
 0x126   : > { %v670_v46 = vmax.f32 %v620_v40, 0.0  ;;  %v672_v47 = vmax.f32 %v663_v41, 0.0 }
 0x127   : > { %v673_v48 = vpack.c.bf16 %v669_v43, %v665_v42  ;;  %v675_v49 = vpack.c.bf16 %v671_v44, %v667_v34 }
 0x128   : > { %v674_v50 = vpack.c.bf16 %v670_v46, %v666_v45  ;;  %v676_v51 = vpack.c.bf16 %v672_v47, %v668_v39 }
 0x12a   : > { %972 = vmatprep.mubr.bf16.mxu0 %v674_v50  ;;  %1013 = vmatprep.mubr.bf16.mxu1 %v676_v51 }
 0x12b   : > { %973 = vmatmul.mubr.bf16.vlgmr.msra.gmra.mrb[4].mxu0 %v673_v48  ;;  %1014 = vmatmul.mubr.bf16.vlgmr.msra.gmra.mrb[4].mxu1 %v675_v49 }
 0x1fe   : > { %v1280_v53 = vpop.f32.mrb[4].mxu0  ;;  %v1302_v54 = vpop.f32.mrb[4].mxu1 }
 0x1ff   : > { %v1281_v56 = vpop.f32.mrb[5].mxu0  ;;  %v1303_v57 = vpop.f32.mrb[5].mxu1 }
 0x200   : > { %v1282_v58 = vadd.f32 %v1281_v56, %v1280_v53  ;;  %v1304_v59 = vadd.f32 %v1303_v57, %v1302_v54  ;;  %v1283_v60 = vpop.f32.mrb[6].mxu0  ;;  %v1305_v61 = vpop.f32.mrb[6].mxu1 }
 0x201   : > { %v1284_v62 = vpop.f32.mrb[7].mxu0  ;;  %v1306_v63 = vpop.f32.mrb[7].mxu1 }
 0x202   : > { %v975_v0 = vadd.f32 %v1282_v58, %v1222_v55  ;;  %v1285_v1 = vadd.f32 %v1284_v62, %v1283_v60  ;;  %v1307_v2 = vadd.f32 %v1306_v63, %v1305_v61 }
 0x204   : > { %v978_v3 = vadd.f32 %v1285_v1, %v1222_v55  ;;  %v1016_v4 = vadd.f32 %v1304_v59, %v975_v0 }
 0x206   : > { %v1039_v7 = vmul.f32 %v1033_v52, %v1016_v4  ;;  %v1019_v8 = vadd.f32 %v1307_v2, %v978_v3 }
 0x208   : > { %v1041_v10 = vadd.f32 %v1039_v7, %v1037_v5  ;;  %v1040_v11 = vmul.f32 %v1036_v6, %v1019_v8 }
 0x20a   : > { %1043 = vst [vmem:[#allocation2] sm:$0xff] %v1041_v10  ;;  %v1042_v12 = vadd.f32 %v1040_v11, %v1038_v9 }
 0x20c   : > { %1044 = vst [vmem:[#allocation2 + $0x8] sm:$0xff] %v1042_v12 }
 0x20d PF: > { %p1255_p11 = scmp.ne.s32.totalorder %s1529_s0, 7 }
 0x20e   : > { %v1049_v13 = vld [vmem:[%s1683_s1] sm:$0xff] (!%p1255_p11)  ;;  %v1050_v15 = vld [vmem:[%s1683_s1 + $0x8] sm:$0xff] (!%p1255_p11) }
 0x20f   : > { %1048 = sbr.rel (%p1255_p11) target bundleno = 848 (0x350), region = 64  ;;  %v1256_v34 = vld [vmem:[%s1689_s7] ss:$0 sm:$0xff] (!%p1255_p11) }
 0x210   : > { %v1257_v36 = vld [vmem:[%s1690_s8] ss:$0 sm:$0xff] (!%p1255_p11) }
 0x211   : > { %v1051_v14 = vld [vmem:[#allocation2] sm:$0xff] (!%p1255_p11) }
 0x212   : > { %v1053_v16 = vadd.f32 (!%p1255_p11), %v1051_v14, %v1049_v13 }
 0x213   : > { %v1052_v17 = vld [vmem:[#allocation2 + $0x8] sm:$0xff] (!%p1255_p11) }
 0x214   : > { %1055 = vadd.xlane.f32.xlu0 (!%p1255_p11), %v1053_v16  ;;  %v1054_v18 = vadd.f32 (!%p1255_p11), %v1052_v17, %v1050_v15 }
 0x218   : > { %1057 = vadd.xlane.f32.xlu0 %v1054_v18 }
 0x2a1   : > { %v1056_v19 = vpop.xlane.xlu0 %1055 }
 0x2a2   : > { %v1060_v20 = vmul.f32 0.0078125, %v1056_v19 }
 0x2a4   : > { %v1062_v21 = vsub.f32 %v1053_v16, %v1060_v20 }
 0x2a5   : > { %v1058_v22 = vpop.xlane.xlu0 %1057 }
 0x2a6   : > { %v1061_v23 = vmul.f32 0.0078125, %v1058_v22  ;;  %v1064_v24 = vmul.f32 %v1062_v21, %v1062_v21 }
 0x2a8   : > { %v1063_v25 = vsub.f32 %v1054_v18, %v1061_v23  ;;  %1066 = vadd.xlane.f32.xlu1 %v1064_v24 }
 0x2aa   : > { %v1065_v26 = vmul.f32 %v1063_v25, %v1063_v25 }
 0x2ac   : > { %1068 = vadd.xlane.f32.xlu1 %v1065_v26 }
 0x335   : > { %v1067_v27 = vpop.xlane.xlu1 %1066 }
 0x336   : > { %v1070_v28 = vmul.f32 0.0078125, %v1067_v27 }
 0x338   : > { %v1072_v29 = vadd.f32 1e-05, %v1070_v28 }
 0x339   : > { %v1069_v30 = vpop.xlane.xlu1 %1068 }
 0x33a   : > { %1408 = vrsqrt.f32 %v1072_v29  ;;  %v1071_v31 = vmul.f32 0.0078125, %v1069_v30 }
 0x33c   : > { %v1073_v32 = vadd.f32 1e-05, %v1071_v31 }
 0x33e   : > { %1410 = vrsqrt.f32 %v1073_v32 }
 0x344   : > { %v1409_v33 = vpop.eup %1408 }
 0x345   : > { %v1076_v35 = vmul.f32 %v1409_v33, %v1062_v21 }
 0x347   : > { %v1085_v37 = vmul.f32 %v1256_v34, %v1076_v35 }
 0x348   : > { %v1411_v38 = vpop.eup %1410 }
 0x349   : > { %v1094_v39 = vadd.f32 %v1257_v36, %v1085_v37  ;;  %v1077_v40 = vmul.f32 %v1411_v38, %v1063_v25 }
 0x34b   : > { %1096 = vst [vmem:[#allocation5] sm:$0xff] %v1094_v39  ;;  %v1086_v41 = vmul.f32 %v1256_v34, %v1077_v40 }
 0x34d   : > { %v1095_v42 = vadd.f32 %v1257_v36, %v1086_v41 }
 0x34f   : > { %1097 = vst [vmem:[#allocation5 + $0x8] sm:$0xff] %v1095_v42 }
 0x350 PF: > { %p1312_p12 = scmp.eq.s32.totalorder %s1529_s0, 7  ;;  %s1467_s29 = smov [#allocation5]  }
 0x351   : > { %s1104_s30 = sshll.u32 %s1467_s29, 4  ;;  %s1105_s30 = int_to_ptr.vmem [resolvable:$true] %s1104_s30 }
 0x352   : > { %s1424_s10 = scalar_lea.vmem %s1105_s30, 256  ;;  %p1431_p2 = scmp.lt.s32.totalorder %s1105_s30, %s1105_s30 }
 0x353   : > { %p1425_p13 = scmp.ne.s32.totalorder %s1105_s30, %s1424_s10  ;;  %p1432_p3 = scmp.lt.s32.totalorder %s1424_s10, %s1424_s10 }
 0x355   : > { %p1426_p0 = pnand %p1425_p13, %p1312_p12  ;;  %p1433_p4 = por %p1432_p3, %p1431_p2 }
 0x357   : > { %p1427_p1 = pneg %p1426_p0 }
 0x359   : > { %p1434_p5 = pnand %p1433_p4, %p1427_p1 }
 0x35b   : > { %1437 = shalt.err (!%p1434_p5)
}
 0x35c   : > { %s1438_s13 = scalar_lea.hbm %s1691_s9, 256 }
 0x35d   : > { %p1439_p6 = scmp.ne.s32.totalorder %s1691_s9, %s1438_s13  ;;  %p1444_p9 = scmp.lt.u32.totalorder %s1438_s13, %s1691_s9 }
 0x35f   : > { %p1440_p7 = pnand %p1439_p6, %p1312_p12 }
 0x361   : > { %p1441_p8 = pneg %p1440_p7 }
 0x363   : > { %p1446_p10 = pnand %p1444_p9, %p1441_p8 }
 0x365   : > { %1449 = shalt.err (!%p1446_p10)
}
 0x366   : > { %s1468_s20 = smov 128   ;;  %s1469_s21 = smov 8  }
 0x367   : > { %1309 = dma.vmem_to_hbm [thread:$0]  (%p1312_p12), %s1105_s30, 256, %s1691_s9, [#allocation6], %s1468_s20, %s1468_s20, %s1469_s21  }
 0x368   : > { %1457 = dma.done.wait (%p1312_p12), [#allocation6], 256  }
 0x369   : > { %1459 = vsyncadd (%p1312_p12), [#allocation6], 4294967040 }
 0x36a PF: > { %s26_s14 = sadd.s32 1, %s1462_s14  }
 0x36b   : > { %p23_p11 = scmp.ge.s32.totalorder %s26_s14, 10  }
 0x36d   :  { %25 = sbr.rel (!%p23_p11) target bundleno = 16 (0x10), region = 100 }
 0x374   :  { %1120 = vsyncpa [#allocation6], 1 }
 0x375   :  { %1122 = vsyncpa [#allocation6 + $0x1], 1 }

// kernel: decoder_layer.4
= control target key start
LH: loop header
LB: loop body
LE: loop exit
PB: predicated region body
PF: predicated region fallthrough
CT: control target
= control target key end

     0   :  { %s6376_s21 = smov 0   ;;  %s7507_s0 = inlined_call_operand.vmem [shape: f32[2,8,128], index: 0, kind: input, shape index: {}, may-alias: {0,1}]   ;;  %s7508_s1 = inlined_call_operand.vmem [shape: f32[2,8,128], index: 1, kind: input, shape index: {}, may-alias: {0,1}]   ;;  %s7509_s2 = inlined_call_operand.vmem [shape: bf16[8,128,16], index: 2, kind: input, shape index: {}]   ;;  %s7510_s3 = inlined_call_operand.vmem [shape: f32[8,1,16], index: 3, kind: input, shape index: {}]   ;;  %s7511_s4 = inlined_call_operand.vmem [shape: bf16[8,128,16], index: 4, kind: input, shape index: {}]   ;;  %s7512_s5 = inlined_call_operand.vmem [shape: f32[8,1,16], index: 5, kind: input, shape index: {}]   ;;  %s7513_s6 = inlined_call_operand.vmem [shape: bf16[8,128,16], index: 6, kind: input, shape index: {}]   ;;  %s7514_s7 = inlined_call_operand.vmem [shape: f32[8,1,16], index: 7, kind: input, shape index: {}]   ;;  %s7515_s8 = inlined_call_operand.vmem [shape: bf16[8,16,128], index: 8, kind: input, shape index: {}]   ;;  %s7516_s9 = inlined_call_operand.vmem [shape: f32[1,128], index: 9, kind: input, shape index: {}]   ;;  %s7517_s10 = inlined_call_operand.vmem [shape: f32[1,128], index: 10, kind: input, shape index: {}]   ;;  %s7518_s11 = inlined_call_operand.vmem [shape: f32[1,128], index: 11, kind: input, shape index: {}]   ;;  %s7519_s12 = inlined_call_operand.vmem [shape: f32[2,8,128], index: 12, kind: output, shape index: {}]  }
   0x1 LB: > { %s4536_s22 = sadd.s32 4294967295, %s6307_s21   ;;  %p4540_p0 = scmp.ge.s32.totalorder %s6307_s21, 1  ;;  %s6307_s21 = sphi %s6376_s21, %s22_s21  }
   0x2   : > { %p370_p1 = scmp.lt.s32.totalorder %s6307_s21, 3 }
   0x4   : > { %p371_p2 = pnand %p4540_p0, %p370_p1 }
   0x5   : > { %v6066_v0 = vld [vmem:[%s7511_s4] sm:$0xff] (!%p371_p2)   ;;  %v6309_v1 = vmov (!%p371_p2), 0.0   ;;  %v6067_v2 = vld [vmem:[%s7511_s4 + $0x8] sm:$0xff] (!%p371_p2)   ;;  %vm6310_vm0 = vmmov (!%p371_p2), 0   ;;  %v6069_v5 = vld [vmem:[%s7511_s4 + $0x10] sm:$0xff] (!%p371_p2)   ;;  %p414_p3 = scmp.lt.s32.totalorder (!%p371_p2), %s4536_s22, 1 }
   0x6   : > { %374 = sbr.rel (%p371_p2) target bundleno = 8266 (0x204a), region = 68  ;;  %5452 = vmatprep.subr.bf16.mxu1 (!%p371_p2), %v6309_v1  ;;  %5432 = vmatprep.subr.bf16.mxu0 (!%p371_p2), %v6309_v1  ;;  %v6068_v3 = vld [vmem:[%s7509_s2] sm:$0xff] (!%p371_p2)   ;;  %v6070_v4 = vld [vmem:[%s7509_s2 + $0x8] sm:$0xff] (!%p371_p2)   ;;  %v6072_v6 = vld [vmem:[%s7509_s2 + $0x10] sm:$0xff] (!%p371_p2)   ;;  %vm766_vm1 = vcmask (!%p371_p2), 130048   ;;  %vm814_vm2 = vcmask (!%p371_p2), 64512  }
   0x7   : > { %5453 = vmatpush3.bf16.msra.mxu1 (!%p371_p2), %v6066_v0  ;;  %5468 = vmatprep.mubr.msk.bf16.mxu1 (!%p371_p2), %vm6310_vm0, %v6309_v1  ;;  %v6071_v7 = vld [vmem:[%s7511_s4 + $0x18] sm:$0xff] (!%p371_p2)   ;;  %v6073_v9 = vld [vmem:[%s7511_s4 + $0x20] sm:$0xff] (!%p371_p2)   ;;  %v6075_v10 = vld [vmem:[%s7511_s4 + $0x28] sm:$0xff] (!%p371_p2)   ;;  %vm831_vm3 = vcmask (!%p371_p2), 1043456  }
   0x8   : > { %5454 = vmatprep.subr.bf16.mxu1 (!%p371_p2), %v6309_v1  ;;  %5448 = vmatprep.mubr.msk.bf16.mxu0 (!%p371_p2), %vm6310_vm0, %v6309_v1  ;;  %v6074_v8 = vld [vmem:[%s7509_s2 + $0x18] sm:$0xff] (!%p371_p2)   ;;  %v6076_v11 = vld [vmem:[%s7509_s2 + $0x20] sm:$0xff] (!%p371_p2)   ;;  %v6078_v12 = vld [vmem:[%s7509_s2 + $0x28] sm:$0xff] (!%p371_p2)  }
   0x9   : > { %5433 = vmatpush3.bf16.msra.mxu0 (!%p371_p2), %v6068_v3  ;;  %v6077_v13 = vld [vmem:[%s7511_s4 + $0x30] sm:$0xff] (!%p371_p2)   ;;  %v6079_v15 = vld [vmem:[%s7511_s4 + $0x38] sm:$0xff] (!%p371_p2)   ;;  %v4553_v21 = vld [vmem:[%s7512_s5] ss:$0 sm:$0xff] (!%p371_p2) }
   0xa   : > { %5434 = vmatprep.subr.bf16.mxu0 (!%p371_p2), %v6309_v1  ;;  %v6080_v14 = vld [vmem:[%s7509_s2 + $0x30] sm:$0xff] (!%p371_p2)   ;;  %v6081_v17 = vld [vmem:[%s7509_s2 + $0x38] sm:$0xff] (!%p371_p2)   ;;  %v4544_v26 = vld [vmem:[%s7510_s3] ss:$0 sm:$0xff] (!%p371_p2) }
   0xb   : > { %5455 = vmatpush3.bf16.msra.mxu1 (!%p371_p2), %v6067_v2  ;;  %v6082_v36 = vld [vmem:[%s7513_s6] sm:$0xff] (!%p371_p2)   ;;  %v6083_v37 = vld [vmem:[%s7513_s6 + $0x8] sm:$0xff] (!%p371_p2)   ;;  %v6084_v38 = vld [vmem:[%s7513_s6 + $0x10] sm:$0xff] (!%p371_p2)  }
   0xc   : > { %5456 = vmatprep.subr.bf16.mxu1 (!%p371_p2), %v6309_v1  ;;  %v6085_v39 = vld [vmem:[%s7513_s6 + $0x18] sm:$0xff] (!%p371_p2)   ;;  %v6086_v40 = vld [vmem:[%s7513_s6 + $0x20] sm:$0xff] (!%p371_p2)   ;;  %v6087_v41 = vld [vmem:[%s7513_s6 + $0x28] sm:$0xff] (!%p371_p2)  }
   0xd   : > { %5435 = vmatpush3.bf16.msra.mxu0 %v6070_v4  ;;  %s7521_s22 = smov (!%p414_p3, %s4536_s22), 1  ;;  %v6088_v42 = vld [vmem:[%s7513_s6 + $0x30] sm:$0xff]   ;;  %v6089_v43 = vld [vmem:[%s7513_s6 + $0x38] sm:$0xff]   ;;  %v6090_v56 = vld [vmem:[%s7511_s4 + $0x40] sm:$0xff]  }
   0xe   : > { %5436 = vmatprep.subr.bf16.mxu0 %v6309_v1  ;;  %s6434_s29 = sshll.u32 %s7521_s22, 3  ;;  %v4562_v59 = vld [vmem:[%s7514_s7] ss:$0 sm:$0xff]  ;;  %v6091_v62 = vld [vmem:[%s7511_s4 + $0x48] sm:$0xff]   ;;  %v6092_v2 = vld [vmem:[%s7511_s4 + $0x50] sm:$0xff]  }
   0xf   : > { %5457 = vmatpush3.bf16.msra.mxu1 %v6069_v5  ;;  %s421_s17 = scalar_lea.vmem %s7508_s1, %s6434_s29  ;;  %s6457_s24 = scalar_lea.vmem %s7507_s0, %s6434_s29  ;;  %v6094_v3 = vld [vmem:[%s7511_s4 + $0x58] sm:$0xff]   ;;  %v6096_v4 = vld [vmem:[%s7511_s4 + $0x60] sm:$0xff]   ;;  %v6098_v5 = vld [vmem:[%s7511_s4 + $0x68] sm:$0xff]  }
  0x10   : > { %5458 = vmatprep.subr.bf16.mxu1 %v6309_v1  ;;  %v428_v16 = vld [vmem:[%s421_s17] sm:$0xff]  ;;  %s425_s15 = scalar_lea.vmem %s7519_s12, %s6434_s29 }
  0x11   : > { %5437 = vmatpush3.bf16.msra.mxu0 %v6072_v6  ;;  %v427_v18 = vld [vmem:[%s6457_s24] sm:$0xff]  ;;  %v6468_v19 = vpack.c.bf16 %v428_v16, %v428_v16  ;;  %v6100_v6 = vld [vmem:[%s7511_s4 + $0x70] sm:$0xff]  }
  0x12   : > { %5438 = vmatprep.subr.bf16.mxu0 %v6309_v1  ;;  %v6471_v20 = vpack.c.bf16 %v427_v18, %v427_v18  ;;  %v6101_v16 = vld [vmem:[%s7509_s2 + $0x60] sm:$0xff]   ;;  %v6104_v18 = vld [vmem:[%s7509_s2 + $0x70] sm:$0xff]  }
  0x13   : > { %5459 = vmatpush3.bf16.msra.mxu1 %v6071_v7  ;;  %v6102_v7 = vld [vmem:[%s7511_s4 + $0x78] sm:$0xff]  }
  0x14   : > { %5460 = vmatprep.subr.bf16.mxu1 %v6309_v1 }
  0x15   : > { %5439 = vmatpush3.bf16.msra.mxu0 %v6074_v8 }
  0x16   : > { %5440 = vmatprep.subr.bf16.mxu0 %v6309_v1 }
  0x17   : > { %5461 = vmatpush3.bf16.msra.mxu1 %v6073_v9 }
  0x18   : > { %5462 = vmatprep.subr.bf16.mxu1 %v6309_v1 }
  0x19   : > { %5441 = vmatpush3.bf16.msra.mxu0 %v6076_v11  ;;  %v6093_v11 = vld [vmem:[%s7509_s2 + $0x40] sm:$0xff]  }
  0x1a   : > { %5442 = vmatprep.subr.bf16.mxu0 %v6309_v1 }
  0x1b   : > { %5463 = vmatpush3.bf16.msra.mxu1 %v6075_v10 }
  0x1c   : > { %5464 = vmatprep.subr.bf16.mxu1 %v6309_v1 }
  0x1d   : > { %5443 = vmatpush3.bf16.msra.mxu0 %v6078_v12 }
  0x1e   : > { %5444 = vmatprep.subr.bf16.mxu0 %v6309_v1 }
  0x1f   : > { %5465 = vmatpush3.bf16.msra.mxu1 %v6077_v13  ;;  %v6095_v13 = vld [vmem:[%s7509_s2 + $0x48] sm:$0xff]  }
  0x20   : > { %5466 = vmatprep.subr.bf16.mxu1 %v6309_v1 }
  0x21   : > { %5445 = vmatpush3.bf16.msra.mxu0 %v6080_v14  ;;  %v6097_v14 = vld [vmem:[%s7509_s2 + $0x50] sm:$0xff]  }
  0x22   : > { %5446 = vmatprep.subr.bf16.mxu0 %v6309_v1 }
  0x23   : > { %5467 = vmatpush3.bf16.msra.mxu1 %v6079_v15  ;;  %v6099_v15 = vld [vmem:[%s7509_s2 + $0x58] sm:$0xff]  }
  0x24   : > { %5492 = vmatprep.subr.bf16.mxu1 %v6309_v1 }
  0x25   : > { %5447 = vmatpush3.bf16.msra.mxu0 %v6081_v17  ;;  %v6103_v17 = vld [vmem:[%s7509_s2 + $0x68] sm:$0xff]  }
  0x26   : > { %5469 = vmatmul.mubr.bf16.vlgmr.msra.gmra.mrb[0].mxu1 %v6468_v19  ;;  %5472 = vmatprep.subr.bf16.mxu0 %v6309_v1 }
  0x27   : > { %5494 = vmatprep.mubr.msk.bf16.mxu1 %vm6310_vm0, %v6309_v1 }
  0x28   : > { %5449 = vmatmul.mubr.bf16.vlgmr.msra.gmra.mrb[0].mxu0 %v6471_v20 }
  0x29   : > { %5488 = vmatprep.mubr.msk.bf16.mxu0 %vm6310_vm0, %v6309_v1  ;;  %5473 = vmatpush3.bf16.msra.mxu0 %v6082_v36 }
  0x2a   : > { %5474 = vmatprep.subr.bf16.mxu0 %v6309_v1 }
  0x2d   : > { %5475 = vmatpush3.bf16.msra.mxu0 %v6083_v37 }
  0x2e   : > { %5476 = vmatprep.subr.bf16.mxu0 %v6309_v1 }
  0x31   : > { %5477 = vmatpush3.bf16.msra.mxu0 %v6084_v38 }
  0x32   : > { %5478 = vmatprep.subr.bf16.mxu0 %v6309_v1 }
  0x35   : > { %5479 = vmatpush3.bf16.msra.mxu0 %v6085_v39 }
  0x36   : > { %5480 = vmatprep.subr.bf16.mxu0 %v6309_v1 }
  0x39   : > { %5481 = vmatpush3.bf16.msra.mxu0 %v6086_v40 }
  0x3a   : > { %5482 = vmatprep.subr.bf16.mxu0 %v6309_v1 }
  0x3d   : > { %5483 = vmatpush3.bf16.msra.mxu0 %v6087_v41 }
  0x3e   : > { %5484 = vmatprep.subr.bf16.mxu0 %v6309_v1 }
  0x41   : > { %5485 = vmatpush3.bf16.msra.mxu0 %v6088_v42 }
  0x42   : > { %5486 = vmatprep.subr.bf16.mxu0 %v6309_v1 }
  0x45   : > { %5487 = vmatpush3.bf16.msra.mxu0 %v6089_v43 }
  0x46   : > { %5524 = vmatprep.subr.bf16.mxu0 %v6309_v1 }
  0x48   : > { %5489 = vmatmul.mubr.bf16.vlgmr.msra.gmra.mrb[4].mxu0 %v6468_v19 }
  0x49   : > { %5540 = vmatprep.mubr.msk.bf16.mxu0 %vm6310_vm0, %v6309_v1  ;;  %5525 = vmatpush3.bf16.msra.mxu0 %v6090_v56 }
  0x4a   : > { %5526 = vmatprep.subr.bf16.mxu0 %v6309_v1 }
  0x4d   : > { %5527 = vmatpush3.bf16.msra.mxu0 %v6091_v62 }
  0x4e   : > { %5528 = vmatprep.subr.bf16.mxu0 %v6309_v1 }
  0x51   : > { %5529 = vmatpush3.bf16.msra.mxu0 %v6092_v2 }
  0x52   : > { %5530 = vmatprep.subr.bf16.mxu0 %v6309_v1 }
  0x55   : > { %5531 = vmatpush3.bf16.msra.mxu0 %v6094_v3 }
  0x56   : > { %5532 = vmatprep.subr.bf16.mxu0 %v6309_v1 }
  0x59   : > { %5533 = vmatpush3.bf16.msra.mxu0 %v6096_v4 }
  0x5a   : > { %5534 = vmatprep.subr.bf16.mxu0 %v6309_v1 }
  0x5d   : > { %5535 = vmatpush3.bf16.msra.mxu0 %v6098_v5 }
  0x5e   : > { %5536 = vmatprep.subr.bf16.mxu0 %v6309_v1 }
  0x61   : > { %5537 = vmatpush3.bf16.msra.mxu0 %v6100_v6 }
  0x62   : > { %5538 = vmatprep.subr.bf16.mxu0 %v6309_v1 }
  0x65   : > { %5539 = vmatpush3.bf16.msra.mxu0 %v6102_v7 }
  0x66   : > { %5564 = vmatprep.subr.bf16.mxu0 %v6309_v1 }
  0x68   : > { %5541 = vmatmul.mubr.bf16.vlgmr.msra.gmra.mrb[8].mxu0 %v6468_v19 }
  0x69   : > { %5566 = vmatprep.mubr.msk.bf16.mxu0 %vm6310_vm0, %v6309_v1 }
  0xf9   : > { %v647_v22 = vpop.f32.mrb[0].mxu1 }
  0xfa   : > { %v648_v23 = vadd.f32 %v4553_v21, %v647_v22  ;;  %v5470_v24 = vpop.f32.mrb[1].mxu1  ;;  %v6105_v21 = vld [vmem:[%s7509_s2 + $0x78] sm:$0xff]   ;;  %v6106_v22 = vld [vmem:[%s7513_s6 + $0x40] sm:$0xff]  }
  0xfb   : > { %v650_v25 = vpop.f32.mrb[2].mxu1  ;;  %v536_v27 = vpop.f32.mrb[0].mxu0  ;;  %v6108_v24 = vld [vmem:[%s7513_s6 + $0x50] sm:$0xff]  }
  0xfc   : > { %v765_v28 = vpack.c.bf16 %v648_v23, %v648_v23  ;;  %v5471_v29 = vpop.f32.mrb[3].mxu1  ;;  %v5450_v30 = vpop.f32.mrb[1].mxu0  ;;  %v537_v33 = vadd.f32 %v4544_v26, %v536_v27  ;;  %v6107_v23 = vld [vmem:[%s7513_s6 + $0x48] sm:$0xff]   ;;  %v6109_v25 = vld [vmem:[%s7513_s6 + $0x58] sm:$0xff]   ;;  %v6110_v26 = vld [vmem:[%s7513_s6 + $0x60] sm:$0xff]  }
  0xfd   : > { %v539_v31 = vpop.f32.mrb[2].mxu0  ;;  %v6111_v27 = vld [vmem:[%s7513_s6 + $0x68] sm:$0xff]   ;;  %v6113_v29 = vld [vmem:[%s7513_s6 + $0x78] sm:$0xff]   ;;  %v6114_v30 = vld [vmem:[%s7515_s8] sm:$0xff]  }
  0xfe   : > { %v771_v32 = vsel %vm766_vm1, %v765_v28, 0  ;;  %v5451_v34 = vpop.f32.mrb[3].mxu0  ;;  %v764_v35 = vpack.c.bf16 %v537_v33, %v537_v33  ;;  %v6112_v28 = vld [vmem:[%s7513_s6 + $0x70] sm:$0xff]   ;;  %v4616_v31 = vld [vmem:[%s7512_s5 + $0x1] ss:$0 sm:$0xff] }
  0xff   : > { %5493 = vmatpush3.bf16.xpose.msra.mxu1 %v771_v32 }
 0x100   : > { %5498 = vmatprep.subr.bf16.mxu1 %v6309_v1 }
 0x106   : > { %5495 = vmatmul.mubr.msk.bf16.vlgmr.msra.gmra.mrb[4].mxu1 %vm766_vm1, %v764_v35 }
 0x107   : > { %5500 = vmatprep.mubr.msk.bf16.mxu1 %vm6310_vm0, %v6309_v1 }
 0x11b   : > { %v758_v55 = vpop.f32.mrb[4].mxu0 }
 0x11c   : > { %v5490_v57 = vpop.f32.mrb[5].mxu0  ;;  %v759_v61 = vadd.f32 %v4562_v59, %v758_v55 }
 0x11d   : > { %v761_v58 = vpop.f32.mrb[6].mxu0 }
 0x11e   : > { %v5491_v60 = vpop.f32.mrb[7].mxu0  ;;  %v827_v63 = vpack.c.bf16 %v759_v61, %v759_v61 }
 0x120   : > { %v833_v0 = vsel %vm831_vm3, %v827_v63, 0 }
 0x121   : > { %5499 = vmatpush3.bf16.msra.mxu1 %v833_v0 }
 0x122   : > { %5504 = vmatprep.subr.bf16.mxu1 %v6309_v1 }
 0x13b   : > { %v1098_v32 = vpop.f32.mrb[8].mxu0 }
 0x13c   : > { %v1099_v33 = vadd.f32 %v4616_v31, %v1098_v32  ;;  %v5542_v34 = vpop.f32.mrb[9].mxu0  ;;  %v6121_v32 = vld [vmem:[%s7509_s2 + $0x88] sm:$0xff]  }
 0x13d   : > { %v1101_v35 = vpop.f32.mrb[10].mxu0  ;;  %v6125_v34 = vld [vmem:[%s7509_s2 + $0x98] sm:$0xff]  }
 0x13e   : > { %v1218_v36 = vpack.c.bf16 %v1099_v33, %v1099_v33  ;;  %v5543_v37 = vpop.f32.mrb[11].mxu0  ;;  %v6123_v33 = vld [vmem:[%s7509_s2 + $0x90] sm:$0xff]   ;;  %v6127_v35 = vld [vmem:[%s7509_s2 + $0xa0] sm:$0xff]  }
 0x13f   : > { %v6130_v37 = vld [vmem:[%s7509_s2 + $0xb0] sm:$0xff]  }
 0x140   : > { %v1223_v38 = vsel %vm766_vm1, %v1218_v36, 0  ;;  %v6129_v36 = vld [vmem:[%s7509_s2 + $0xa8] sm:$0xff]  }
 0x141   : > { %5565 = vmatpush3.bf16.xpose.msra.mxu0 %v1223_v38  ;;  %v6131_v38 = vld [vmem:[%s7509_s2 + $0xb8] sm:$0xff]  }
 0x142   : > { %5570 = vmatprep.subr.bf16.mxu0 %v6309_v1 }
 0x1d9   : > { %v807_v44 = vpop.f32.mrb[4].mxu1 }
 0x1da   : > { %v813_v45 = vmul.f32 0.25, %v807_v44  ;;  %v5496_v46 = vpop.f32.mrb[5].mxu1  ;;  %v4590_v44 = vld [vmem:[%s7510_s3 + $0x1] ss:$0 sm:$0xff] }
 0x1db   : > { %v810_v47 = vpop.f32.mrb[6].mxu1 }
 0x1dc   : > { %v5497_v48 = vpop.f32.mrb[7].mxu1  ;;  %v815_v49 = vsel %vm814_vm2, %v813_v45, -inf }
 0x1dd   : > { %816 = vmax.xlane.f32.xlu0 %v815_v49 }
 0x26a   : > { %v817_v50 = vpop.xlane.xlu0 %816 }
 0x26b   : > { %v818_v51 = vsub.f32 %v813_v45, %v817_v50 }
 0x26d   : > { %v819_v52 = vmul.f32 1.442695, %v818_v51  ;;  %v4642_v51 = vld [vmem:[%s7514_s7 + $0x1] ss:$0 sm:$0xff] }
 0x26f   : > { %6266 = vpow2.f32 %v819_v52 }
 0x279   : > { %v6267_v53 = vpop.eup %6266 }
 0x27a   : > { %v821_v54 = vsel %vm814_vm2, %v6267_v53, 0.0 }
 0x27b   : > { %822 = vadd.xlane.f32.xlu0 %v821_v54 }
 0x308   : > { %v823_v8 = vpop.xlane.xlu0 %822 }
 0x309   : > { %6268 = vrcp.f32 %v823_v8 }
 0x313   : > { %v6269_v9 = vpop.eup %6268 }
 0x314   : > { %v825_v10 = vmul.f32 %v6269_v9, %v6267_v53 }
 0x316   : > { %v826_v12 = vpack.c.bf16 %v825_v10, %v825_v10 }
 0x318   : > { %5501 = vmatmul.mubr.msk.bf16.vlgmr.msra.gmra.mrb[8].mxu1 %vm814_vm2, %v826_v12  ;;  %v6117_v12 = vld [vmem:[%s7511_s4 + $0x88] sm:$0xff]  }
 0x319   : > { %5505 = vmatpush3.bf16.msra.mxu1 %v6093_v11  ;;  %5520 = vmatprep.mubr.msk.bf16.mxu1 %vm6310_vm0, %v6309_v1  ;;  %v6115_v11 = vld [vmem:[%s7511_s4 + $0x80] sm:$0xff]  }
 0x31a   : > { %5506 = vmatprep.subr.bf16.mxu1 %v6309_v1 }
 0x31d   : > { %5507 = vmatpush3.bf16.msra.mxu1 %v6095_v13 }
 0x31e   : > { %5508 = vmatprep.subr.bf16.mxu1 %v6309_v1 }
 0x321   : > { %5509 = vmatpush3.bf16.msra.mxu1 %v6097_v14 }
 0x322   : > { %5510 = vmatprep.subr.bf16.mxu1 %v6309_v1 }
 0x325   : > { %5511 = vmatpush3.bf16.msra.mxu1 %v6099_v15 }
 0x326   : > { %5512 = vmatprep.subr.bf16.mxu1 %v6309_v1 }
 0x329   : > { %5513 = vmatpush3.bf16.msra.mxu1 %v6101_v16  ;;  %v6116_v16 = vld [vmem:[%s7515_s8 + $0x8] sm:$0xff]  }
 0x32a   : > { %5514 = vmatprep.subr.bf16.mxu1 %v6309_v1 }
 0x32d   : > { %5515 = vmatpush3.bf16.msra.mxu1 %v6103_v17 }
 0x32e   : > { %5516 = vmatprep.subr.bf16.mxu1 %v6309_v1 }
 0x331   : > { %5517 = vmatpush3.bf16.msra.mxu1 %v6104_v18  ;;  %v6118_v18 = vld [vmem:[%s7511_s4 + $0x90] sm:$0xff]  }
 0x332   : > { %5518 = vmatprep.subr.bf16.mxu1 %v6309_v1 }
 0x335   : > { %5519 = vmatpush3.bf16.msra.mxu1 %v6105_v21  ;;  %v6120_v21 = vld [vmem:[%s7511_s4 + $0x98] sm:$0xff]  }
 0x336   : > { %5544 = vmatprep.subr.bf16.mxu1 %v6309_v1 }
 0x338   : > { %5521 = vmatmul.mubr.bf16.vlgmr.msra.gmra.mrb[12].mxu1 %v6471_v20 }
 0x339   : > { %5545 = vmatpush3.bf16.msra.mxu1 %v6106_v22  ;;  %5560 = vmatprep.mubr.msk.bf16.mxu1 %vm6310_vm0, %v6309_v1  ;;  %v6122_v22 = vld [vmem:[%s7511_s4 + $0xa0] sm:$0xff]  }
 0x33a   : > { %5546 = vmatprep.subr.bf16.mxu1 %v6309_v1 }
 0x33d   : > { %5547 = vmatpush3.bf16.msra.mxu1 %v6107_v23  ;;  %v6124_v23 = vld [vmem:[%s7511_s4 + $0xa8] sm:$0xff]  }
 0x33e   : > { %5548 = vmatprep.subr.bf16.mxu1 %v6309_v1 }
 0x341   : > { %5549 = vmatpush3.bf16.msra.mxu1 %v6108_v24  ;;  %v6126_v24 = vld [vmem:[%s7511_s4 + $0xb0] sm:$0xff]  }
 0x342   : > { %5550 = vmatprep.subr.bf16.mxu1 %v6309_v1 }
 0x345   : > { %5551 = vmatpush3.bf16.msra.mxu1 %v6109_v25  ;;  %v6128_v25 = vld [vmem:[%s7511_s4 + $0xb8] sm:$0xff]  }
 0x346   : > { %5552 = vmatprep.subr.bf16.mxu1 %v6309_v1 }
 0x349   : > { %5553 = vmatpush3.bf16.msra.mxu1 %v6110_v26 }
 0x34a   : > { %5554 = vmatprep.subr.bf16.mxu1 %v6309_v1 }
 0x34d   : > { %5555 = vmatpush3.bf16.msra.mxu1 %v6111_v27  ;;  %v6119_v27 = vld [vmem:[%s7509_s2 + $0x80] sm:$0xff]  }
 0x34e   : > { %5556 = vmatprep.subr.bf16.mxu1 %v6309_v1 }
 0x351   : > { %5557 = vmatpush3.bf16.msra.mxu1 %v6112_v28 }
 0x352   : > { %5558 = vmatprep.subr.bf16.mxu1 %v6309_v1 }
 0x355   : > { %5559 = vmatpush3.bf16.msra.mxu1 %v6113_v29 }
 0x356   : > { %5582 = vmatprep.subr.bf16.mxu1 %v6309_v1 }
 0x358   : > { %5561 = vmatmul.mubr.bf16.vlgmr.msra.gmra.mrb[16].mxu1 %v6468_v19 }
 0x359   : > { %5584 = vmatprep.mubr.msk.bf16.mxu1 %vm6310_vm0, %v6309_v1  ;;  %5583 = vmatpush3.bf16.msra.mxu1 %v6114_v30 }
 0x35a   : > { %5608 = vmatprep.subr.bf16.mxu1 %v6309_v1 }
 0x3eb   : > { %v869_v39 = vpop.f32.mrb[8].mxu1 }
 0x3ec   : > { %v875_v40 = vpack.c.bf16 %v869_v39, %v869_v39  ;;  %v5502_v41 = vpop.f32.mrb[9].mxu1  ;;  %v4702_v39 = vld [vmem:[%s7512_s5 + $0x2] ss:$0 sm:$0xff] }
 0x3ed   : > { %v872_v42 = vpop.f32.mrb[10].mxu1 }
 0x3ee   : > { %v5503_v43 = vpop.f32.mrb[11].mxu1  ;;  %5585 = vmatmul.mubr.msk.bf16.vlgmr.msra.gmra.mrb[20].mxu1 %vm766_vm1, %v875_v40 }
 0x3ef   : > { %5624 = vmatprep.mubr.msk.bf16.mxu1 %vm6310_vm0, %v6309_v1  ;;  %5609 = vmatpush3.bf16.msra.mxu1 %v6115_v11 }
 0x3f0   : > { %5610 = vmatprep.subr.bf16.mxu1 %v6309_v1 }
 0x3f3   : > { %5611 = vmatpush3.bf16.msra.mxu1 %v6117_v12 }
 0x3f4   : > { %5612 = vmatprep.subr.bf16.mxu1 %v6309_v1 }
 0x3f7   : > { %5613 = vmatpush3.bf16.msra.mxu1 %v6118_v18  ;;  %v4728_v18 = vld [vmem:[%s7514_s7 + $0x2] ss:$0 sm:$0xff] }
 0x3f8   : > { %5614 = vmatprep.subr.bf16.mxu1 %v6309_v1 }
 0x3fb   : > { %5615 = vmatpush3.bf16.msra.mxu1 %v6120_v21 }
 0x3fc   : > { %5616 = vmatprep.subr.bf16.mxu1 %v6309_v1 }
 0x3ff   : > { %5617 = vmatpush3.bf16.msra.mxu1 %v6122_v22 }
 0x400   : > { %5618 = vmatprep.subr.bf16.mxu1 %v6309_v1 }
 0x403   : > { %5619 = vmatpush3.bf16.msra.mxu1 %v6124_v23 }
 0x404   : > { %5620 = vmatprep.subr.bf16.mxu1 %v6309_v1 }
 0x407   : > { %5621 = vmatpush3.bf16.msra.mxu1 %v6126_v24 }
 0x408   : > { %5622 = vmatprep.subr.bf16.mxu1 %v6309_v1 }
 0x40b   : > { %v985_v45 = vpop.f32.mrb[12].mxu1  ;;  %5623 = vmatpush3.bf16.msra.mxu1 %v6128_v25  ;;  %v6140_v25 = vld [vmem:[%s7511_s4 + $0xc0] sm:$0xff]  }
 0x40c   : > { %v986_v46 = vadd.f32 %v4590_v44, %v985_v45  ;;  %v5522_v47 = vpop.f32.mrb[13].mxu1  ;;  %5648 = vmatprep.subr.bf16.mxu1 %v6309_v1 }
 0x40d   : > { %v988_v48 = vpop.f32.mrb[14].mxu1 }
 0x40e   : > { %v1217_v49 = vpack.c.bf16 %v986_v46, %v986_v46  ;;  %v5523_v50 = vpop.f32.mrb[15].mxu1  ;;  %5625 = vmatmul.mubr.bf16.vlgmr.msra.gmra.mrb[24].mxu1 %v6468_v19 }
 0x40f   : > { %5650 = vmatprep.mubr.msk.bf16.mxu1 %vm6310_vm0, %v6309_v1 }
 0x410   : > { %5567 = vmatmul.mubr.msk.bf16.vlgmr.msra.gmra.mrb[12].mxu0 %vm766_vm1, %v1217_v49 }
 0x411   : > { %5572 = vmatprep.mubr.msk.bf16.mxu0 %vm6310_vm0, %v6309_v1 }
 0x42b   : > { %v1211_v52 = vpop.f32.mrb[16].mxu1 }
 0x42c   : > { %v1212_v53 = vadd.f32 %v4642_v51, %v1211_v52  ;;  %v5562_v54 = vpop.f32.mrb[17].mxu1  ;;  %v4676_v52 = vld [vmem:[%s7510_s3 + $0x2] ss:$0 sm:$0xff] }
 0x42d   : > { %v1214_v55 = vpop.f32.mrb[18].mxu1 }
 0x42e   : > { %v1278_v56 = vpack.c.bf16 %v1212_v53, %v1212_v53  ;;  %v5563_v57 = vpop.f32.mrb[19].mxu1 }
 0x430   : > { %v1283_v58 = vsel %vm831_vm3, %v1278_v56, 0 }
 0x431   : > { %5571 = vmatpush3.bf16.msra.mxu0 %v1283_v58 }
 0x432   : > { %5576 = vmatprep.subr.bf16.mxu0 %v6309_v1 }
 0x4c1   : > { %v6665_v59 = vpop.f32.mrb[20].mxu1 }
 0x4c2   : > { %v5586_v60 = vpop.f32.mrb[21].mxu1 }
 0x4c3   : > { %v1424_v61 = vpop.f32.mrb[22].mxu1  ;;  %v6133_v60 = vld [vmem:[%s7513_s6 + $0x88] sm:$0xff]  }
 0x4c4   : > { %v5587_v62 = vpop.f32.mrb[23].mxu1  ;;  %v6134_v61 = vld [vmem:[%s7513_s6 + $0x90] sm:$0xff]  }
 0x4c5   : > { %v6135_v62 = vld [vmem:[%s7513_s6 + $0x98] sm:$0xff]  }
 0x4e1   : > { %v1647_v40 = vpop.f32.mrb[24].mxu1 }
 0x4e2   : > { %v1648_v41 = vadd.f32 %v4702_v39, %v1647_v40  ;;  %v5626_v42 = vpop.f32.mrb[25].mxu1  ;;  %v6144_v39 = vld [vmem:[%s7509_s2 + $0xc0] sm:$0xff]  }
 0x4e3   : > { %v1259_v63 = vpop.f32.mrb[12].mxu0  ;;  %v1650_v43 = vpop.f32.mrb[26].mxu1 }
 0x4e4   : > { %v1265_v0 = vmul.f32 0.25, %v1259_v63  ;;  %v5568_v2 = vpop.f32.mrb[13].mxu0  ;;  %v1767_v44 = vpack.c.bf16 %v1648_v41, %v1648_v41  ;;  %v5627_v45 = vpop.f32.mrb[27].mxu1  ;;  %v6136_v63 = vld [vmem:[%s7513_s6 + $0xa0] sm:$0xff]  }
 0x4e5   : > { %v1262_v3 = vpop.f32.mrb[14].mxu0  ;;  %v6138_v2 = vld [vmem:[%s7513_s6 + $0xb0] sm:$0xff]  }
 0x4e6   : > { %v5569_v4 = vpop.f32.mrb[15].mxu0  ;;  %v1266_v5 = vsel %vm814_vm2, %v1265_v0, -inf  ;;  %v1772_v46 = vsel %vm766_vm1, %v1767_v44, 0  ;;  %v6139_v3 = vld [vmem:[%s7513_s6 + $0xb8] sm:$0xff]   ;;  %v6146_v44 = vld [vmem:[%s7509_s2 + $0xc8] sm:$0xff]   ;;  %v6148_v45 = vld [vmem:[%s7509_s2 + $0xd0] sm:$0xff]  }
 0x4e7   : > { %1267 = vmax.xlane.f32.xlu1 %v1266_v5  ;;  %5649 = vmatpush3.bf16.xpose.msra.mxu1 %v1772_v46  ;;  %v6150_v46 = vld [vmem:[%s7509_s2 + $0xd8] sm:$0xff]  }
 0x4e8   : > { %5654 = vmatprep.subr.bf16.mxu1 %v6309_v1 }
 0x574   : > { %v1268_v6 = vpop.xlane.xlu1 %1267 }
 0x575   : > { %v1269_v7 = vsub.f32 %v1265_v0, %v1268_v6  ;;  %v6137_v0 = vld [vmem:[%s7513_s6 + $0xa8] sm:$0xff]  }
 0x577   : > { %v1270_v8 = vmul.f32 1.442695, %v1269_v7 }
 0x579   : > { %6270 = vpow2.f32 %v1270_v8 }
 0x583   : > { %v6271_v9 = vpop.eup %6270 }
 0x584   : > { %v1272_v10 = vsel %vm814_vm2, %v6271_v9, 0.0 }
 0x585   : > { %1273 = vadd.xlane.f32.xlu1 %v1272_v10 }
 0x612   : > { %v1274_v13 = vpop.xlane.xlu1 %1273 }
 0x613   : > { %6272 = vrcp.f32 %v1274_v13 }
 0x61d   : > { %v6273_v14 = vpop.eup %6272 }
 0x61e   : > { %v1276_v15 = vmul.f32 %v6273_v14, %v6271_v9 }
 0x620   : > { %v1277_v17 = vpack.c.bf16 %v1276_v15, %v1276_v15 }
 0x622   : > { %5573 = vmatmul.mubr.msk.bf16.vlgmr.msra.gmra.mrb[16].mxu0 %vm814_vm2, %v1277_v17 }
 0x623   : > { %5577 = vmatpush3.bf16.msra.mxu0 %v6116_v16  ;;  %5578 = vmatprep.mubr.msk.bf16.mxu0 %vm6310_vm0, %v6309_v1 }
 0x624   : > { %5588 = vmatprep.subr.bf16.mxu0 %v6309_v1 }
 0x6f5   : > { %v1319_v26 = vpop.f32.mrb[16].mxu0 }
 0x6f6   : > { %v1325_v28 = vpack.c.bf16 %v1319_v26, %v1319_v26  ;;  %v5574_v29 = vpop.f32.mrb[17].mxu0  ;;  %v6142_v26 = vld [vmem:[%s7511_s4 + $0xc8] sm:$0xff]  }
 0x6f7   : > { %v1322_v30 = vpop.f32.mrb[18].mxu0 }
 0x6f8   : > { %v5575_v31 = vpop.f32.mrb[19].mxu0  ;;  %5579 = vmatmul.mubr.msk.bf16.vlgmr.msra.gmra.mrb[20].mxu0 %vm766_vm1, %v1325_v28  ;;  %v6141_v30 = vld [vmem:[%s7515_s8 + $0x10] sm:$0xff]  }
 0x6f9   : > { %5589 = vmatpush3.bf16.msra.mxu0 %v6119_v27  ;;  %5604 = vmatprep.mubr.msk.bf16.mxu0 %vm6310_vm0, %v6309_v1 }
 0x6fa   : > { %5590 = vmatprep.subr.bf16.mxu0 %v6309_v1 }
 0x6fd   : > { %5591 = vmatpush3.bf16.msra.mxu0 %v6121_v32  ;;  %v6143_v32 = vld [vmem:[%s7511_s4 + $0xd0] sm:$0xff]  }
 0x6fe   : > { %5592 = vmatprep.subr.bf16.mxu0 %v6309_v1 }
 0x701   : > { %5593 = vmatpush3.bf16.msra.mxu0 %v6123_v33  ;;  %v6145_v33 = vld [vmem:[%s7511_s4 + $0xd8] sm:$0xff]  }
 0x702   : > { %5594 = vmatprep.subr.bf16.mxu0 %v6309_v1 }
 0x705   : > { %5595 = vmatpush3.bf16.msra.mxu0 %v6125_v34  ;;  %v6147_v34 = vld [vmem:[%s7511_s4 + $0xe0] sm:$0xff]  }
 0x706   : > { %5596 = vmatprep.subr.bf16.mxu0 %v6309_v1 }
 0x709   : > { %5597 = vmatpush3.bf16.msra.mxu0 %v6127_v35  ;;  %v6149_v35 = vld [vmem:[%s7511_s4 + $0xe8] sm:$0xff]  }
 0x70a   : > { %5598 = vmatprep.subr.bf16.mxu0 %v6309_v1 }
 0x70d   : > { %5599 = vmatpush3.bf16.msra.mxu0 %v6129_v36  ;;  %v6151_v36 = vld [vmem:[%s7511_s4 + $0xf0] sm:$0xff]  }
 0x70e   : > { %5600 = vmatprep.subr.bf16.mxu0 %v6309_v1 }
 0x711   : > { %5601 = vmatpush3.bf16.msra.mxu0 %v6130_v37  ;;  %v6153_v37 = vld [vmem:[%s7511_s4 + $0xf8] sm:$0xff]  }
 0x712   : > { %5602 = vmatprep.subr.bf16.mxu0 %v6309_v1 }
 0x715   : > { %5603 = vmatpush3.bf16.msra.mxu0 %v6131_v38 }
 0x716   : > { %5628 = vmatprep.subr.bf16.mxu0 %v6309_v1 }
 0x718   : > { %5605 = vmatmul.mubr.bf16.vlgmr.msra.gmra.mrb[24].mxu0 %v6471_v20 }
 0x719   : > { %5644 = vmatprep.mubr.msk.bf16.mxu0 %vm6310_vm0, %v6309_v1 }
 0x7cb   : > { %v1372_v47 = vpop.f32.mrb[20].mxu0 }
 0x7cc   : > { %v6755_v48 = vadd.f32 %v6665_v59, %v1372_v47  ;;  %v5580_v49 = vpop.f32.mrb[21].mxu0  ;;  %v6132_v59 = vld [vmem:[%s7513_s6 + $0x80] sm:$0xff]  }
 0x7cd   : > { %v1375_v50 = vpop.f32.mrb[22].mxu0  ;;  %5629 = vmatpush3.bf16.msra.mxu0 %v6132_v59  ;;  %v6152_v47 = vld [vmem:[%s7509_s2 + $0xe0] sm:$0xff]   ;;  %v6154_v49 = vld [vmem:[%s7509_s2 + $0xe8] sm:$0xff]  }
 0x7ce   : > { %v5581_v51 = vpop.f32.mrb[23].mxu0  ;;  %5630 = vmatprep.subr.bf16.mxu0 %v6309_v1  ;;  %v6155_v50 = vld [vmem:[%s7509_s2 + $0xf0] sm:$0xff]  }
 0x7cf   : > { %v6156_v51 = vld [vmem:[%s7509_s2 + $0xf8] sm:$0xff]  }
 0x7d1   : > { %5631 = vmatpush3.bf16.msra.mxu0 %v6133_v60 }
 0x7d2   : > { %5632 = vmatprep.subr.bf16.mxu0 %v6309_v1 }
 0x7d5   : > { %5633 = vmatpush3.bf16.msra.mxu0 %v6134_v61 }
 0x7d6   : > { %5634 = vmatprep.subr.bf16.mxu0 %v6309_v1 }
 0x7d9   : > { %5635 = vmatpush3.bf16.msra.mxu0 %v6135_v62 }
 0x7da   : > { %5636 = vmatprep.subr.bf16.mxu0 %v6309_v1 }
 0x7dd   : > { %5637 = vmatpush3.bf16.msra.mxu0 %v6136_v63 }
 0x7de   : > { %5638 = vmatprep.subr.bf16.mxu0 %v6309_v1 }
 0x7e1   : > { %5639 = vmatpush3.bf16.msra.mxu0 %v6137_v0 }
 0x7e2   : > { %5640 = vmatprep.subr.bf16.mxu0 %v6309_v1 }
 0x7e5   : > { %5641 = vmatpush3.bf16.msra.mxu0 %v6138_v2  ;;  %v4760_v2 = vld [vmem:[%s7510_s3 + $0x3] ss:$0 sm:$0xff] }
 0x7e6   : > { %5642 = vmatprep.subr.bf16.mxu0 %v6309_v1 }
 0x7e9   : > { %5643 = vmatpush3.bf16.msra.mxu0 %v6139_v3 }
 0x7ea   : > { %5686 = vmatprep.subr.bf16.mxu0 %v6309_v1 }
 0x7eb   : > { %v1534_v53 = vpop.f32.mrb[24].mxu0 }
 0x7ec   : > { %v1535_v54 = vadd.f32 %v4676_v52, %v1534_v53  ;;  %v5606_v55 = vpop.f32.mrb[25].mxu0  ;;  %5645 = vmatmul.mubr.bf16.vlgmr.msra.gmra.mrb[28].mxu0 %v6468_v19  ;;  %v4786_v52 = vld [vmem:[%s7512_s5 + $0x3] ss:$0 sm:$0xff] }
 0x7ed   : > { %v1537_v56 = vpop.f32.mrb[26].mxu0  ;;  %5702 = vmatprep.mubr.msk.bf16.mxu0 %vm6310_vm0, %v6309_v1  ;;  %5687 = vmatpush3.bf16.msra.mxu0 %v6140_v25 }
 0x7ee   : > { %v1766_v57 = vpack.c.bf16 %v1535_v54, %v1535_v54  ;;  %v5607_v58 = vpop.f32.mrb[27].mxu0  ;;  %5688 = vmatprep.subr.bf16.mxu0 %v6309_v1 }
 0x7f0   : > { %5651 = vmatmul.mubr.msk.bf16.vlgmr.msra.gmra.mrb[28].mxu1 %vm766_vm1, %v1766_v57 }
 0x7f1   : > { %5656 = vmatprep.mubr.msk.bf16.mxu1 %vm6310_vm0, %v6309_v1  ;;  %5689 = vmatpush3.bf16.msra.mxu0 %v6142_v26 }
 0x7f2   : > { %5690 = vmatprep.subr.bf16.mxu0 %v6309_v1 }
 0x7f5   : > { %5691 = vmatpush3.bf16.msra.mxu0 %v6143_v32 }
 0x7f6   : > { %5692 = vmatprep.subr.bf16.mxu0 %v6309_v1 }
 0x7f9   : > { %5693 = vmatpush3.bf16.msra.mxu0 %v6145_v33 }
 0x7fa   : > { %5694 = vmatprep.subr.bf16.mxu0 %v6309_v1 }
 0x7fd   : > { %5695 = vmatpush3.bf16.msra.mxu0 %v6147_v34 }
 0x7fe   : > { %5696 = vmatprep.subr.bf16.mxu0 %v6309_v1 }
 0x801   : > { %5697 = vmatpush3.bf16.msra.mxu0 %v6149_v35 }
 0x802   : > { %5698 = vmatprep.subr.bf16.mxu0 %v6309_v1 }
 0x805   : > { %5699 = vmatpush3.bf16.msra.mxu0 %v6151_v36 }
 0x806   : > { %5700 = vmatprep.subr.bf16.mxu0 %v6309_v1 }
 0x809   : > { %5701 = vmatpush3.bf16.msra.mxu0 %v6153_v37  ;;  %v6165_v37 = vld [vmem:[%s7511_s4 + $0x100] sm:$0xff]  }
 0x80a   : > { %5726 = vmatprep.subr.bf16.mxu0 %v6309_v1 }
 0x80c   : > { %5703 = vmatmul.mubr.bf16.vlgmr.msra.gmra.mrb[32].mxu0 %v6468_v19 }
 0x80d   : > { %5728 = vmatprep.mubr.msk.bf16.mxu0 %vm6310_vm0, %v6309_v1 }
 0x8bf   : > { %v1760_v15 = vpop.f32.mrb[28].mxu0 }
 0x8c0   : > { %v5646_v16 = vpop.f32.mrb[29].mxu0  ;;  %v1761_v22 = vadd.f32 %v4728_v18, %v1760_v15  ;;  %v6164_v15 = vld [vmem:[%s7513_s6 + $0xf8] sm:$0xff]  }
 0x8c1   : > { %v1763_v17 = vpop.f32.mrb[30].mxu0 }
 0x8c2   : > { %v5647_v21 = vpop.f32.mrb[31].mxu0  ;;  %v1827_v23 = vpack.c.bf16 %v1761_v22, %v1761_v22 }
 0x8c3   : > { %v1808_v4 = vpop.f32.mrb[28].mxu1 }
 0x8c4   : > { %v1814_v5 = vmul.f32 0.25, %v1808_v4  ;;  %v5652_v6 = vpop.f32.mrb[29].mxu1  ;;  %v1832_v24 = vsel %vm831_vm3, %v1827_v23, 0 }
 0x8c5   : > { %v1811_v7 = vpop.f32.mrb[30].mxu1  ;;  %5655 = vmatpush3.bf16.msra.mxu1 %v1832_v24  ;;  %v4812_v24 = vld [vmem:[%s7514_s7 + $0x3] ss:$0 sm:$0xff] }
 0x8c6   : > { %v5653_v8 = vpop.f32.mrb[31].mxu1  ;;  %v1815_v9 = vsel %vm814_vm2, %v1814_v5, -inf  ;;  %5660 = vmatprep.subr.bf16.mxu1 %v6309_v1 }
 0x8c7   : > { %1816 = vmax.xlane.f32.xlu0 %v1815_v9  ;;  %v6158_v9 = vld [vmem:[%s7513_s6 + $0xc8] sm:$0xff]  }
 0x8df   : > { %v2148_v53 = vpop.f32.mrb[32].mxu0 }
 0x8e0   : > { %v2149_v54 = vadd.f32 %v4786_v52, %v2148_v53  ;;  %v5704_v55 = vpop.f32.mrb[33].mxu0  ;;  %v6169_v52 = vld [vmem:[%s7509_s2 + $0x100] sm:$0xff]  }
 0x8e1   : > { %v2151_v56 = vpop.f32.mrb[34].mxu0 }
 0x8e2   : > { %v2268_v57 = vpack.c.bf16 %v2149_v54, %v2149_v54  ;;  %v5705_v58 = vpop.f32.mrb[35].mxu0 }
 0x8e3   : > { %v6173_v58 = vld [vmem:[%s7509_s2 + $0x110] sm:$0xff]  }
 0x8e4   : > { %v2273_v59 = vsel %vm766_vm1, %v2268_v57, 0  ;;  %v6171_v57 = vld [vmem:[%s7509_s2 + $0x108] sm:$0xff]  }
 0x8e5   : > { %5727 = vmatpush3.bf16.xpose.msra.mxu0 %v2273_v59  ;;  %v6175_v59 = vld [vmem:[%s7509_s2 + $0x118] sm:$0xff]  }
 0x8e6   : > { %5732 = vmatprep.subr.bf16.mxu0 %v6309_v1 }
 0x954   : > { %v1817_v10 = vpop.xlane.xlu0 %1816 }
 0x955   : > { %v1818_v11 = vsub.f32 %v1814_v5, %v1817_v10  ;;  %v6159_v10 = vld [vmem:[%s7513_s6 + $0xd0] sm:$0xff]  }
 0x957   : > { %v1819_v12 = vmul.f32 1.442695, %v1818_v11  ;;  %v6160_v11 = vld [vmem:[%s7513_s6 + $0xd8] sm:$0xff]  }
 0x959   : > { %6274 = vpow2.f32 %v1819_v12  ;;  %v6161_v12 = vld [vmem:[%s7513_s6 + $0xe0] sm:$0xff]  }
 0x963   : > { %v6275_v13 = vpop.eup %6274 }
 0x964   : > { %v1821_v14 = vsel %vm814_vm2, %v6275_v13, 0.0 }
 0x965   : > { %1822 = vadd.xlane.f32.xlu1 %v1821_v14  ;;  %v6163_v14 = vld [vmem:[%s7513_s6 + $0xf0] sm:$0xff]  }
 0x9f2   : > { %v1823_v27 = vpop.xlane.xlu1 %1822 }
 0x9f3   : > { %6276 = vrcp.f32 %v1823_v27 }
 0x9fd   : > { %v6277_v28 = vpop.eup %6276 }
 0x9fe   : > { %v1825_v29 = vmul.f32 %v6277_v28, %v6275_v13  ;;  %v6162_v13 = vld [vmem:[%s7513_s6 + $0xe8] sm:$0xff]  }
 0xa00   : > { %v1826_v31 = vpack.c.bf16 %v1825_v29, %v1825_v29 }
 0xa02   : > { %5657 = vmatmul.mubr.msk.bf16.vlgmr.msra.gmra.mrb[32].mxu1 %vm814_vm2, %v1826_v31 }
 0xa03   : > { %5661 = vmatpush3.bf16.msra.mxu1 %v6141_v30  ;;  %5662 = vmatprep.mubr.msk.bf16.mxu1 %vm6310_vm0, %v6309_v1 }
 0xa04   : > { %5666 = vmatprep.subr.bf16.mxu1 %v6309_v1 }
 0xad5   : > { %v1868_v38 = vpop.f32.mrb[32].mxu1 }
 0xad6   : > { %v1874_v40 = vpack.c.bf16 %v1868_v38, %v1868_v38  ;;  %v5658_v41 = vpop.f32.mrb[33].mxu1  ;;  %v6167_v38 = vld [vmem:[%s7511_s4 + $0x108] sm:$0xff]  }
 0xad7   : > { %v1871_v42 = vpop.f32.mrb[34].mxu1 }
 0xad8   : > { %v5659_v43 = vpop.f32.mrb[35].mxu1  ;;  %5663 = vmatmul.mubr.msk.bf16.vlgmr.msra.gmra.mrb[36].mxu1 %vm766_vm1, %v1874_v40  ;;  %v6166_v42 = vld [vmem:[%s7515_s8 + $0x18] sm:$0xff]  }
 0xad9   : > { %5667 = vmatpush3.bf16.msra.mxu1 %v6144_v39  ;;  %5682 = vmatprep.mubr.msk.bf16.mxu1 %vm6310_vm0, %v6309_v1 }
 0xada   : > { %5668 = vmatprep.subr.bf16.mxu1 %v6309_v1 }
 0xadd   : > { %5669 = vmatpush3.bf16.msra.mxu1 %v6146_v44  ;;  %v6168_v44 = vld [vmem:[%s7511_s4 + $0x110] sm:$0xff]  }
 0xade   : > { %5670 = vmatprep.subr.bf16.mxu1 %v6309_v1 }
 0xae1   : > { %5671 = vmatpush3.bf16.msra.mxu1 %v6148_v45  ;;  %v6170_v45 = vld [vmem:[%s7511_s4 + $0x118] sm:$0xff]  }
 0xae2   : > { %5672 = vmatprep.subr.bf16.mxu1 %v6309_v1 }
 0xae5   : > { %5673 = vmatpush3.bf16.msra.mxu1 %v6150_v46  ;;  %v6172_v46 = vld [vmem:[%s7511_s4 + $0x120] sm:$0xff]  }
 0xae6   : > { %5674 = vmatprep.subr.bf16.mxu1 %v6309_v1 }
 0xae9   : > { %5675 = vmatpush3.bf16.msra.mxu1 %v6152_v47  ;;  %v6174_v47 = vld [vmem:[%s7511_s4 + $0x128] sm:$0xff]  }
 0xaea   : > { %5676 = vmatprep.subr.bf16.mxu1 %v6309_v1 }
 0xaed   : > { %5677 = vmatpush3.bf16.msra.mxu1 %v6154_v49  ;;  %v6176_v49 = vld [vmem:[%s7511_s4 + $0x130] sm:$0xff]  }
 0xaee   : > { %5678 = vmatprep.subr.bf16.mxu1 %v6309_v1 }
 0xaf1   : > { %5679 = vmatpush3.bf16.msra.mxu1 %v6155_v50  ;;  %v6178_v50 = vld [vmem:[%s7511_s4 + $0x138] sm:$0xff]  }
 0xaf2   : > { %5680 = vmatprep.subr.bf16.mxu1 %v6309_v1 }
 0xaf5   : > { %5681 = vmatpush3.bf16.msra.mxu1 %v6156_v51 }
 0xaf6   : > { %5706 = vmatprep.subr.bf16.mxu1 %v6309_v1 }
 0xaf8   : > { %5683 = vmatmul.mubr.bf16.vlgmr.msra.gmra.mrb[40].mxu1 %v6471_v20 }
 0xaf9   : > { %5722 = vmatprep.mubr.msk.bf16.mxu1 %vm6310_vm0, %v6309_v1 }
 0xbab   : > { %v1921_v60 = vpop.f32.mrb[36].mxu1 }
 0xbac   : > { %v6891_v61 = vadd.f32 %v1921_v60, %v6755_v48  ;;  %v5664_v62 = vpop.f32.mrb[37].mxu1  ;;  %v6157_v48 = vld [vmem:[%s7513_s6 + $0xc0] sm:$0xff]  }
 0xbad   : > { %v1924_v63 = vpop.f32.mrb[38].mxu1  ;;  %5707 = vmatpush3.bf16.msra.mxu1 %v6157_v48  ;;  %v6177_v60 = vld [vmem:[%s7509_s2 + $0x120] sm:$0xff]   ;;  %v6179_v62 = vld [vmem:[%s7509_s2 + $0x128] sm:$0xff]  }
 0xbae   : > { %v5665_v0 = vpop.f32.mrb[39].mxu1  ;;  %5708 = vmatprep.subr.bf16.mxu1 %v6309_v1  ;;  %v6180_v63 = vld [vmem:[%s7509_s2 + $0x130] sm:$0xff]  }
 0xbaf   : > { %v6181_v0 = vld [vmem:[%s7509_s2 + $0x138] sm:$0xff]  }
 0xbb1   : > { %5709 = vmatpush3.bf16.msra.mxu1 %v6158_v9 }
 0xbb2   : > { %5710 = vmatprep.subr.bf16.mxu1 %v6309_v1 }
 0xbb5   : > { %5711 = vmatpush3.bf16.msra.mxu1 %v6159_v10 }
 0xbb6   : > { %5712 = vmatprep.subr.bf16.mxu1 %v6309_v1 }
 0xbb9   : > { %5713 = vmatpush3.bf16.msra.mxu1 %v6160_v11 }
 0xbba   : > { %5714 = vmatprep.subr.bf16.mxu1 %v6309_v1 }
 0xbbd   : > { %5715 = vmatpush3.bf16.msra.mxu1 %v6161_v12 }
 0xbbe   : > { %5716 = vmatprep.subr.bf16.mxu1 %v6309_v1 }
 0xbc1   : > { %5717 = vmatpush3.bf16.msra.mxu1 %v6162_v13 }
 0xbc2   : > { %5718 = vmatprep.subr.bf16.mxu1 %v6309_v1 }
 0xbc5   : > { %5719 = vmatpush3.bf16.msra.mxu1 %v6163_v14  ;;  %v4844_v14 = vld [vmem:[%s7510_s3 + $0x4] ss:$0 sm:$0xff] }
 0xbc6   : > { %5720 = vmatprep.subr.bf16.mxu1 %v6309_v1 }
 0xbc9   : > { %5721 = vmatpush3.bf16.msra.mxu1 %v6164_v15 }
 0xbca   : > { %5764 = vmatprep.subr.bf16.mxu1 %v6309_v1 }
 0xbcb   : > { %v2035_v3 = vpop.f32.mrb[40].mxu1 }
 0xbcc   : > { %v2036_v4 = vadd.f32 %v4760_v2, %v2035_v3  ;;  %v5684_v5 = vpop.f32.mrb[41].mxu1  ;;  %5723 = vmatmul.mubr.bf16.vlgmr.msra.gmra.mrb[44].mxu1 %v6468_v19  ;;  %v4870_v2 = vld [vmem:[%s7512_s5 + $0x4] ss:$0 sm:$0xff] }
 0xbcd   : > { %v2038_v6 = vpop.f32.mrb[42].mxu1  ;;  %5780 = vmatprep.mubr.msk.bf16.mxu1 %vm6310_vm0, %v6309_v1  ;;  %5765 = vmatpush3.bf16.msra.mxu1 %v6165_v37 }
 0xbce   : > { %v2267_v7 = vpack.c.bf16 %v2036_v4, %v2036_v4  ;;  %v5685_v8 = vpop.f32.mrb[43].mxu1  ;;  %5766 = vmatprep.subr.bf16.mxu1 %v6309_v1 }
 0xbd0   : > { %5729 = vmatmul.mubr.msk.bf16.vlgmr.msra.gmra.mrb[36].mxu0 %vm766_vm1, %v2267_v7 }
 0xbd1   : > { %5734 = vmatprep.mubr.msk.bf16.mxu0 %vm6310_vm0, %v6309_v1  ;;  %5767 = vmatpush3.bf16.msra.mxu1 %v6167_v38 }
 0xbd2   : > { %5768 = vmatprep.subr.bf16.mxu1 %v6309_v1 }
 0xbd5   : > { %5769 = vmatpush3.bf16.msra.mxu1 %v6168_v44  ;;  %v4896_v44 = vld [vmem:[%s7514_s7 + $0x4] ss:$0 sm:$0xff] }
 0xbd6   : > { %5770 = vmatprep.subr.bf16.mxu1 %v6309_v1 }
 0xbd9   : > { %5771 = vmatpush3.bf16.msra.mxu1 %v6170_v45 }
 0xbda   : > { %5772 = vmatprep.subr.bf16.mxu1 %v6309_v1 }
 0xbdd   : > { %5773 = vmatpush3.bf16.msra.mxu1 %v6172_v46 }
 0xbde   : > { %5774 = vmatprep.subr.bf16.mxu1 %v6309_v1 }
 0xbe1   : > { %5775 = vmatpush3.bf16.msra.mxu1 %v6174_v47 }
 0xbe2   : > { %5776 = vmatprep.subr.bf16.mxu1 %v6309_v1 }
 0xbe5   : > { %5777 = vmatpush3.bf16.msra.mxu1 %v6176_v49 }
 0xbe6   : > { %5778 = vmatprep.subr.bf16.mxu1 %v6309_v1 }
 0xbe9   : > { %5779 = vmatpush3.bf16.msra.mxu1 %v6178_v50  ;;  %v6190_v50 = vld [vmem:[%s7511_s4 + $0x140] sm:$0xff]  }
 0xbea   : > { %5804 = vmatprep.subr.bf16.mxu1 %v6309_v1 }
 0xbec   : > { %5781 = vmatmul.mubr.bf16.vlgmr.msra.gmra.mrb[48].mxu1 %v6468_v19 }
 0xbed   : > { %5806 = vmatprep.mubr.msk.bf16.mxu1 %vm6310_vm0, %v6309_v1 }
 0xc9f   : > { %v2261_v25 = vpop.f32.mrb[44].mxu1 }
 0xca0   : > { %v2262_v26 = vadd.f32 %v4812_v24, %v2261_v25  ;;  %v5724_v27 = vpop.f32.mrb[45].mxu1  ;;  %v6184_v24 = vld [vmem:[%s7513_s6 + $0x110] sm:$0xff]   ;;  %v6185_v25 = vld [vmem:[%s7513_s6 + $0x118] sm:$0xff]  }
 0xca1   : > { %v2264_v28 = vpop.f32.mrb[46].mxu1  ;;  %v6187_v27 = vld [vmem:[%s7513_s6 + $0x128] sm:$0xff]  }
 0xca2   : > { %v2328_v29 = vpack.c.bf16 %v2262_v26, %v2262_v26  ;;  %v5725_v30 = vpop.f32.mrb[47].mxu1  ;;  %v6186_v26 = vld [vmem:[%s7513_s6 + $0x120] sm:$0xff]   ;;  %v6188_v28 = vld [vmem:[%s7513_s6 + $0x130] sm:$0xff]  }
 0xca3   : > { %v2309_v16 = vpop.f32.mrb[36].mxu0 }
 0xca4   : > { %v2315_v17 = vmul.f32 0.25, %v2309_v16  ;;  %v5730_v18 = vpop.f32.mrb[37].mxu0  ;;  %v2333_v31 = vsel %vm831_vm3, %v2328_v29, 0  ;;  %v6189_v29 = vld [vmem:[%s7513_s6 + $0x138] sm:$0xff]  }
 0xca5   : > { %v2312_v21 = vpop.f32.mrb[38].mxu0  ;;  %5733 = vmatpush3.bf16.msra.mxu0 %v2333_v31 }
 0xca6   : > { %v5731_v22 = vpop.f32.mrb[39].mxu0  ;;  %v2316_v23 = vsel %vm814_vm2, %v2315_v17, -inf  ;;  %5738 = vmatprep.subr.bf16.mxu0 %v6309_v1 }
 0xca7   : > { %2317 = vmax.xlane.f32.xlu0 %v2316_v23  ;;  %v6183_v23 = vld [vmem:[%s7513_s6 + $0x108] sm:$0xff]  }
 0xcbf   : > { %v2649_v3 = vpop.f32.mrb[48].mxu1 }
 0xcc0   : > { %v2650_v4 = vadd.f32 %v4870_v2, %v2649_v3  ;;  %v5782_v5 = vpop.f32.mrb[49].mxu1  ;;  %v6194_v2 = vld [vmem:[%s7509_s2 + $0x140] sm:$0xff]  }
 0xcc1   : > { %v2652_v6 = vpop.f32.mrb[50].mxu1 }
 0xcc2   : > { %v2769_v7 = vpack.c.bf16 %v2650_v4, %v2650_v4  ;;  %v5783_v8 = vpop.f32.mrb[51].mxu1 }
 0xcc3   : > { %v6198_v8 = vld [vmem:[%s7509_s2 + $0x150] sm:$0xff]  }
 0xcc4   : > { %v2774_v48 = vsel %vm766_vm1, %v2769_v7, 0  ;;  %v6196_v7 = vld [vmem:[%s7509_s2 + $0x148] sm:$0xff]  }
 0xcc5   : > { %5805 = vmatpush3.bf16.xpose.msra.mxu1 %v2774_v48  ;;  %v6200_v48 = vld [vmem:[%s7509_s2 + $0x158] sm:$0xff]  }
 0xcc6   : > { %5810 = vmatprep.subr.bf16.mxu1 %v6309_v1 }
 0xd34   : > { %v2318_v32 = vpop.xlane.xlu0 %2317 }
 0xd35   : > { %v2319_v33 = vsub.f32 %v2315_v17, %v2318_v32 }
 0xd37   : > { %v2320_v34 = vmul.f32 1.442695, %v2319_v33 }
 0xd39   : > { %6278 = vpow2.f32 %v2320_v34 }
 0xd43   : > { %v6279_v35 = vpop.eup %6278 }
 0xd44   : > { %v2322_v36 = vsel %vm814_vm2, %v6279_v35, 0.0 }
 0xd45   : > { %2323 = vadd.xlane.f32.xlu1 %v2322_v36 }
 0xdd2   : > { %v2324_v39 = vpop.xlane.xlu1 %2323 }
 0xdd3   : > { %6280 = vrcp.f32 %v2324_v39 }
 0xddd   : > { %v6281_v40 = vpop.eup %6280 }
 0xdde   : > { %v2326_v41 = vmul.f32 %v6281_v40, %v6279_v35 }
 0xde0   : > { %v2327_v43 = vpack.c.bf16 %v2326_v41, %v2326_v41 }
 0xde2   : > { %5735 = vmatmul.mubr.msk.bf16.vlgmr.msra.gmra.mrb[40].mxu0 %vm814_vm2, %v2327_v43 }
 0xde3   : > { %5739 = vmatpush3.bf16.msra.mxu0 %v6166_v42  ;;  %5740 = vmatprep.mubr.msk.bf16.mxu0 %vm6310_vm0, %v6309_v1 }
 0xde4   : > { %5744 = vmatprep.subr.bf16.mxu0 %v6309_v1 }
 0xeb5   : > { %v2369_v51 = vpop.f32.mrb[40].mxu0 }
 0xeb6   : > { %v2375_v53 = vpack.c.bf16 %v2369_v51, %v2369_v51  ;;  %v5736_v54 = vpop.f32.mrb[41].mxu0  ;;  %v6192_v51 = vld [vmem:[%s7511_s4 + $0x148] sm:$0xff]  }
 0xeb7   : > { %v2372_v55 = vpop.f32.mrb[42].mxu0 }
 0xeb8   : > { %v5737_v56 = vpop.f32.mrb[43].mxu0  ;;  %5741 = vmatmul.mubr.msk.bf16.vlgmr.msra.gmra.mrb[44].mxu0 %vm766_vm1, %v2375_v53  ;;  %v6191_v55 = vld [vmem:[%s7515_s8 + $0x20] sm:$0xff]  }
 0xeb9   : > { %5745 = vmatpush3.bf16.msra.mxu0 %v6169_v52  ;;  %5760 = vmatprep.mubr.msk.bf16.mxu0 %vm6310_vm0, %v6309_v1 }
 0xeba   : > { %5746 = vmatprep.subr.bf16.mxu0 %v6309_v1 }
 0xebd   : > { %5747 = vmatpush3.bf16.msra.mxu0 %v6171_v57  ;;  %v6193_v57 = vld [vmem:[%s7511_s4 + $0x150] sm:$0xff]  }
 0xebe   : > { %5748 = vmatprep.subr.bf16.mxu0 %v6309_v1 }
 0xec1   : > { %5749 = vmatpush3.bf16.msra.mxu0 %v6173_v58  ;;  %v6195_v58 = vld [vmem:[%s7511_s4 + $0x158] sm:$0xff]  }
 0xec2   : > { %5750 = vmatprep.subr.bf16.mxu0 %v6309_v1 }
 0xec5   : > { %5751 = vmatpush3.bf16.msra.mxu0 %v6175_v59  ;;  %v6197_v59 = vld [vmem:[%s7511_s4 + $0x160] sm:$0xff]  }
 0xec6   : > { %5752 = vmatprep.subr.bf16.mxu0 %v6309_v1 }
 0xec9   : > { %5753 = vmatpush3.bf16.msra.mxu0 %v6177_v60  ;;  %v6199_v60 = vld [vmem:[%s7511_s4 + $0x168] sm:$0xff]  }
 0xeca   : > { %5754 = vmatprep.subr.bf16.mxu0 %v6309_v1 }
 0xecd   : > { %5755 = vmatpush3.bf16.msra.mxu0 %v6179_v62  ;;  %v6201_v62 = vld [vmem:[%s7511_s4 + $0x170] sm:$0xff]  }
 0xece   : > { %5756 = vmatprep.subr.bf16.mxu0 %v6309_v1 }
 0xed1   : > { %5757 = vmatpush3.bf16.msra.mxu0 %v6180_v63  ;;  %v6203_v63 = vld [vmem:[%s7511_s4 + $0x178] sm:$0xff]  }
 0xed2   : > { %5758 = vmatprep.subr.bf16.mxu0 %v6309_v1 }
 0xed5   : > { %5759 = vmatpush3.bf16.msra.mxu0 %v6181_v0 }
 0xed6   : > { %5784 = vmatprep.subr.bf16.mxu0 %v6309_v1 }
 0xed8   : > { %5761 = vmatmul.mubr.bf16.vlgmr.msra.gmra.mrb[48].mxu0 %v6471_v20 }
 0xed9   : > { %5800 = vmatprep.mubr.msk.bf16.mxu0 %vm6310_vm0, %v6309_v1 }
 0xf8b   : > { %v2422_v9 = vpop.f32.mrb[44].mxu0 }
 0xf8c   : > { %v7027_v10 = vadd.f32 %v2422_v9, %v6891_v61  ;;  %v5742_v11 = vpop.f32.mrb[45].mxu0  ;;  %v6182_v61 = vld [vmem:[%s7513_s6 + $0x100] sm:$0xff]  }
 0xf8d   : > { %v2425_v12 = vpop.f32.mrb[46].mxu0  ;;  %5785 = vmatpush3.bf16.msra.mxu0 %v6182_v61  ;;  %v6202_v9 = vld [vmem:[%s7509_s2 + $0x160] sm:$0xff]   ;;  %v6204_v11 = vld [vmem:[%s7509_s2 + $0x168] sm:$0xff]  }
 0xf8e   : > { %v5743_v13 = vpop.f32.mrb[47].mxu0  ;;  %5786 = vmatprep.subr.bf16.mxu0 %v6309_v1  ;;  %v6205_v12 = vld [vmem:[%s7509_s2 + $0x170] sm:$0xff]  }
 0xf8f   : > { %v6206_v13 = vld [vmem:[%s7509_s2 + $0x178] sm:$0xff]  }
 0xf91   : > { %5787 = vmatpush3.bf16.msra.mxu0 %v6183_v23 }
 0xf92   : > { %5788 = vmatprep.subr.bf16.mxu0 %v6309_v1 }
 0xf95   : > { %5789 = vmatpush3.bf16.msra.mxu0 %v6184_v24 }
 0xf96   : > { %5790 = vmatprep.subr.bf16.mxu0 %v6309_v1 }
 0xf99   : > { %5791 = vmatpush3.bf16.msra.mxu0 %v6185_v25 }
 0xf9a   : > { %5792 = vmatprep.subr.bf16.mxu0 %v6309_v1 }
 0xf9d   : > { %5793 = vmatpush3.bf16.msra.mxu0 %v6186_v26 }
 0xf9e   : > { %5794 = vmatprep.subr.bf16.mxu0 %v6309_v1 }
 0xfa1   : > { %5795 = vmatpush3.bf16.msra.mxu0 %v6187_v27 }
 0xfa2   : > { %5796 = vmatprep.subr.bf16.mxu0 %v6309_v1 }
 0xfa5   : > { %5797 = vmatpush3.bf16.msra.mxu0 %v6188_v28  ;;  %v4928_v28 = vld [vmem:[%s7510_s3 + $0x5] ss:$0 sm:$0xff] }
 0xfa6   : > { %5798 = vmatprep.subr.bf16.mxu0 %v6309_v1 }
 0xfa9   : > { %5799 = vmatpush3.bf16.msra.mxu0 %v6189_v29 }
 0xfaa   : > { %5842 = vmatprep.subr.bf16.mxu0 %v6309_v1 }
 0xfab   : > { %v2536_v15 = vpop.f32.mrb[48].mxu0 }
 0xfac   : > { %v2537_v16 = vadd.f32 %v4844_v14, %v2536_v15  ;;  %v5762_v17 = vpop.f32.mrb[49].mxu0  ;;  %5801 = vmatmul.mubr.bf16.vlgmr.msra.gmra.mrb[52].mxu0 %v6468_v19  ;;  %v4954_v14 = vld [vmem:[%s7512_s5 + $0x5] ss:$0 sm:$0xff] }
 0xfad   : > { %v2539_v18 = vpop.f32.mrb[50].mxu0  ;;  %5858 = vmatprep.mubr.msk.bf16.mxu0 %vm6310_vm0, %v6309_v1  ;;  %5843 = vmatpush3.bf16.msra.mxu0 %v6190_v50 }
 0xfae   : > { %v2768_v21 = vpack.c.bf16 %v2537_v16, %v2537_v16  ;;  %v5763_v22 = vpop.f32.mrb[51].mxu0  ;;  %5844 = vmatprep.subr.bf16.mxu0 %v6309_v1 }
 0xfb0   : > { %5807 = vmatmul.mubr.msk.bf16.vlgmr.msra.gmra.mrb[52].mxu1 %vm766_vm1, %v2768_v21 }
 0xfb1   : > { %5812 = vmatprep.mubr.msk.bf16.mxu1 %vm6310_vm0, %v6309_v1  ;;  %5845 = vmatpush3.bf16.msra.mxu0 %v6192_v51 }
 0xfb2   : > { %5846 = vmatprep.subr.bf16.mxu0 %v6309_v1 }
 0xfb5   : > { %5847 = vmatpush3.bf16.msra.mxu0 %v6193_v57 }
 0xfb6   : > { %5848 = vmatprep.subr.bf16.mxu0 %v6309_v1 }
 0xfb9   : > { %5849 = vmatpush3.bf16.msra.mxu0 %v6195_v58 }
 0xfba   : > { %5850 = vmatprep.subr.bf16.mxu0 %v6309_v1 }
 0xfbd   : > { %5851 = vmatpush3.bf16.msra.mxu0 %v6197_v59 }
 0xfbe   : > { %5852 = vmatprep.subr.bf16.mxu0 %v6309_v1 }
 0xfc1   : > { %5853 = vmatpush3.bf16.msra.mxu0 %v6199_v60 }
 0xfc2   : > { %5854 = vmatprep.subr.bf16.mxu0 %v6309_v1 }
 0xfc5   : > { %5855 = vmatpush3.bf16.msra.mxu0 %v6201_v62 }
 0xfc6   : > { %5856 = vmatprep.subr.bf16.mxu0 %v6309_v1 }
 0xfc9   : > { %5857 = vmatpush3.bf16.msra.mxu0 %v6203_v63  ;;  %v6215_v63 = vld [vmem:[%s7511_s4 + $0x180] sm:$0xff]  }
 0xfca   : > { %5882 = vmatprep.subr.bf16.mxu0 %v6309_v1 }
 0xfcc   : > { %5859 = vmatmul.mubr.bf16.vlgmr.msra.gmra.mrb[56].mxu0 %v6468_v19 }
 0xfcd   : > { %5884 = vmatprep.mubr.msk.bf16.mxu0 %vm6310_vm0, %v6309_v1 }
0x107f   : > { %v2762_v41 = vpop.f32.mrb[52].mxu0 }
0x1080   : > { %v5802_v42 = vpop.f32.mrb[53].mxu0  ;;  %v2763_v46 = vadd.f32 %v4896_v44, %v2762_v41  ;;  %v6214_v41 = vld [vmem:[%s7513_s6 + $0x178] sm:$0xff]  }
0x1081   : > { %v2765_v43 = vpop.f32.mrb[54].mxu0 }
0x1082   : > { %v5803_v45 = vpop.f32.mrb[55].mxu0  ;;  %v2829_v47 = vpack.c.bf16 %v2763_v46, %v2763_v46 }
0x1083   : > { %v2810_v30 = vpop.f32.mrb[52].mxu1 }
0x1084   : > { %v2816_v31 = vmul.f32 0.25, %v2810_v30  ;;  %v5808_v32 = vpop.f32.mrb[53].mxu1  ;;  %v2834_v49 = vsel %vm831_vm3, %v2829_v47, 0 }
0x1085   : > { %v2813_v33 = vpop.f32.mrb[54].mxu1  ;;  %5811 = vmatpush3.bf16.msra.mxu1 %v2834_v49  ;;  %v4980_v49 = vld [vmem:[%s7514_s7 + $0x5] ss:$0 sm:$0xff] }
0x1086   : > { %v5809_v34 = vpop.f32.mrb[55].mxu1  ;;  %v2817_v35 = vsel %vm814_vm2, %v2816_v31, -inf  ;;  %5816 = vmatprep.subr.bf16.mxu1 %v6309_v1 }
0x1087   : > { %2818 = vmax.xlane.f32.xlu0 %v2817_v35  ;;  %v6208_v35 = vld [vmem:[%s7513_s6 + $0x148] sm:$0xff]  }
0x109f   : > { %v3150_v15 = vpop.f32.mrb[56].mxu0 }
0x10a0   : > { %v3151_v16 = vadd.f32 %v4954_v14, %v3150_v15  ;;  %v5860_v17 = vpop.f32.mrb[57].mxu0  ;;  %v6219_v14 = vld [vmem:[%s7509_s2 + $0x180] sm:$0xff]  }
0x10a1   : > { %v3153_v18 = vpop.f32.mrb[58].mxu0 }
0x10a2   : > { %v3270_v21 = vpack.c.bf16 %v3151_v16, %v3151_v16  ;;  %v5861_v22 = vpop.f32.mrb[59].mxu0 }
0x10a3   : > { %v6223_v22 = vld [vmem:[%s7509_s2 + $0x190] sm:$0xff]  }
0x10a4   : > { %v3275_v61 = vsel %vm766_vm1, %v3270_v21, 0  ;;  %v6221_v21 = vld [vmem:[%s7509_s2 + $0x188] sm:$0xff]  }
0x10a5   : > { %5883 = vmatpush3.bf16.xpose.msra.mxu0 %v3275_v61  ;;  %v6225_v61 = vld [vmem:[%s7509_s2 + $0x198] sm:$0xff]  }
0x10a6   : > { %5888 = vmatprep.subr.bf16.mxu0 %v6309_v1 }
0x1114   : > { %v2819_v36 = vpop.xlane.xlu0 %2818 }
0x1115   : > { %v2820_v37 = vsub.f32 %v2816_v31, %v2819_v36  ;;  %v6209_v36 = vld [vmem:[%s7513_s6 + $0x150] sm:$0xff]  }
0x1117   : > { %v2821_v38 = vmul.f32 1.442695, %v2820_v37  ;;  %v6210_v37 = vld [vmem:[%s7513_s6 + $0x158] sm:$0xff]  }
0x1119   : > { %6282 = vpow2.f32 %v2821_v38  ;;  %v6211_v38 = vld [vmem:[%s7513_s6 + $0x160] sm:$0xff]  }
0x1123   : > { %v6283_v39 = vpop.eup %6282 }
0x1124   : > { %v2823_v40 = vsel %vm814_vm2, %v6283_v39, 0.0 }
0x1125   : > { %2824 = vadd.xlane.f32.xlu1 %v2823_v40  ;;  %v6213_v40 = vld [vmem:[%s7513_s6 + $0x170] sm:$0xff]  }
0x11b2   : > { %v2825_v52 = vpop.xlane.xlu1 %2824 }
0x11b3   : > { %6284 = vrcp.f32 %v2825_v52 }
0x11bd   : > { %v6285_v53 = vpop.eup %6284 }
0x11be   : > { %v2827_v54 = vmul.f32 %v6285_v53, %v6283_v39  ;;  %v6212_v39 = vld [vmem:[%s7513_s6 + $0x168] sm:$0xff]  }
0x11c0   : > { %v2828_v56 = vpack.c.bf16 %v2827_v54, %v2827_v54 }
0x11c2   : > { %5813 = vmatmul.mubr.msk.bf16.vlgmr.msra.gmra.mrb[56].mxu1 %vm814_vm2, %v2828_v56 }
0x11c3   : > { %5817 = vmatpush3.bf16.msra.mxu1 %v6191_v55  ;;  %5818 = vmatprep.mubr.msk.bf16.mxu1 %vm6310_vm0, %v6309_v1 }
0x11c4   : > { %5822 = vmatprep.subr.bf16.mxu1 %v6309_v1 }
0x1295   : > { %v2870_v0 = vpop.f32.mrb[56].mxu1 }
0x1296   : > { %v2876_v3 = vpack.c.bf16 %v2870_v0, %v2870_v0  ;;  %v5814_v4 = vpop.f32.mrb[57].mxu1  ;;  %v6217_v0 = vld [vmem:[%s7511_s4 + $0x188] sm:$0xff]  }
0x1297   : > { %v2873_v5 = vpop.f32.mrb[58].mxu1 }
0x1298   : > { %v5815_v6 = vpop.f32.mrb[59].mxu1  ;;  %5819 = vmatmul.mubr.msk.bf16.vlgmr.msra.gmra.mrb[60].mxu1 %vm766_vm1, %v2876_v3  ;;  %v6216_v5 = vld [vmem:[%s7515_s8 + $0x28] sm:$0xff]  }
0x1299   : > { %5823 = vmatpush3.bf16.msra.mxu1 %v6194_v2  ;;  %5838 = vmatprep.mubr.msk.bf16.mxu1 %vm6310_vm0, %v6309_v1 }
0x129a   : > { %5824 = vmatprep.subr.bf16.mxu1 %v6309_v1 }
0x129d   : > { %5825 = vmatpush3.bf16.msra.mxu1 %v6196_v7  ;;  %v6218_v7 = vld [vmem:[%s7511_s4 + $0x190] sm:$0xff]  }
0x129e   : > { %5826 = vmatprep.subr.bf16.mxu1 %v6309_v1 }
0x12a1   : > { %5827 = vmatpush3.bf16.msra.mxu1 %v6198_v8  ;;  %v6220_v8 = vld [vmem:[%s7511_s4 + $0x198] sm:$0xff]  }
0x12a2   : > { %5828 = vmatprep.subr.bf16.mxu1 %v6309_v1 }
0x12a5   : > { %5829 = vmatpush3.bf16.msra.mxu1 %v6200_v48  ;;  %v6222_v48 = vld [vmem:[%s7511_s4 + $0x1a0] sm:$0xff]  }
0x12a6   : > { %5830 = vmatprep.subr.bf16.mxu1 %v6309_v1 }
0x12a9   : > { %5831 = vmatpush3.bf16.msra.mxu1 %v6202_v9  ;;  %v6224_v9 = vld [vmem:[%s7511_s4 + $0x1a8] sm:$0xff]  }
0x12aa   : > { %5832 = vmatprep.subr.bf16.mxu1 %v6309_v1 }
0x12ad   : > { %5833 = vmatpush3.bf16.msra.mxu1 %v6204_v11  ;;  %v6226_v11 = vld [vmem:[%s7511_s4 + $0x1b0] sm:$0xff]  }
0x12ae   : > { %5834 = vmatprep.subr.bf16.mxu1 %v6309_v1 }
0x12b1   : > { %5835 = vmatpush3.bf16.msra.mxu1 %v6205_v12  ;;  %v6228_v12 = vld [vmem:[%s7511_s4 + $0x1b8] sm:$0xff]  }
0x12b2   : > { %5836 = vmatprep.subr.bf16.mxu1 %v6309_v1 }
0x12b5   : > { %5837 = vmatpush3.bf16.msra.mxu1 %v6206_v13 }
0x12b6   : > { %5862 = vmatprep.subr.bf16.mxu1 %v6309_v1 }
0x12b8   : > { %5839 = vmatmul.mubr.bf16.vlgmr.msra.gmra.mrb[64].mxu1 %v6471_v20 }
0x12b9   : > { %5878 = vmatprep.mubr.msk.bf16.mxu1 %vm6310_vm0, %v6309_v1 }
0x136b   : > { %v2923_v23 = vpop.f32.mrb[60].mxu1 }
0x136c   : > { %v7163_v24 = vadd.f32 %v2923_v23, %v7027_v10  ;;  %v5820_v25 = vpop.f32.mrb[61].mxu1  ;;  %v6207_v10 = vld [vmem:[%s7513_s6 + $0x140] sm:$0xff]  }
0x136d   : > { %v2926_v26 = vpop.f32.mrb[62].mxu1  ;;  %5863 = vmatpush3.bf16.msra.mxu1 %v6207_v10  ;;  %v6227_v23 = vld [vmem:[%s7509_s2 + $0x1a0] sm:$0xff]   ;;  %v6229_v25 = vld [vmem:[%s7509_s2 + $0x1a8] sm:$0xff]  }
0x136e   : > { %v5821_v27 = vpop.f32.mrb[63].mxu1  ;;  %5864 = vmatprep.subr.bf16.mxu1 %v6309_v1  ;;  %v6230_v26 = vld [vmem:[%s7509_s2 + $0x1b0] sm:$0xff]  }
0x136f   : > { %v6231_v27 = vld [vmem:[%s7509_s2 + $0x1b8] sm:$0xff]  }
0x1371   : > { %5865 = vmatpush3.bf16.msra.mxu1 %v6208_v35 }
0x1372   : > { %5866 = vmatprep.subr.bf16.mxu1 %v6309_v1 }
0x1375   : > { %5867 = vmatpush3.bf16.msra.mxu1 %v6209_v36 }
0x1376   : > { %5868 = vmatprep.subr.bf16.mxu1 %v6309_v1 }
0x1379   : > { %5869 = vmatpush3.bf16.msra.mxu1 %v6210_v37 }
0x137a   : > { %5870 = vmatprep.subr.bf16.mxu1 %v6309_v1 }
0x137d   : > { %5871 = vmatpush3.bf16.msra.mxu1 %v6211_v38 }
0x137e   : > { %5872 = vmatprep.subr.bf16.mxu1 %v6309_v1 }
0x1381   : > { %5873 = vmatpush3.bf16.msra.mxu1 %v6212_v39 }
0x1382   : > { %5874 = vmatprep.subr.bf16.mxu1 %v6309_v1 }
0x1385   : > { %5875 = vmatpush3.bf16.msra.mxu1 %v6213_v40  ;;  %v5012_v40 = vld [vmem:[%s7510_s3 + $0x6] ss:$0 sm:$0xff] }
0x1386   : > { %5876 = vmatprep.subr.bf16.mxu1 %v6309_v1 }
0x1389   : > { %5877 = vmatpush3.bf16.msra.mxu1 %v6214_v41 }
0x138a   : > { %5920 = vmatprep.subr.bf16.mxu1 %v6309_v1 }
0x138b   : > { %v3037_v29 = vpop.f32.mrb[64].mxu1 }
0x138c   : > { %v3038_v30 = vadd.f32 %v4928_v28, %v3037_v29  ;;  %v5840_v31 = vpop.f32.mrb[65].mxu1  ;;  %5879 = vmatmul.mubr.bf16.vlgmr.msra.gmra.mrb[68].mxu1 %v6468_v19  ;;  %v5038_v28 = vld [vmem:[%s7512_s5 + $0x6] ss:$0 sm:$0xff] }
0x138d   : > { %v3040_v32 = vpop.f32.mrb[66].mxu1  ;;  %5936 = vmatprep.mubr.msk.bf16.mxu1 %vm6310_vm0, %v6309_v1  ;;  %5921 = vmatpush3.bf16.msra.mxu1 %v6215_v63 }
0x138e   : > { %v3269_v33 = vpack.c.bf16 %v3038_v30, %v3038_v30  ;;  %v5841_v34 = vpop.f32.mrb[67].mxu1  ;;  %5922 = vmatprep.subr.bf16.mxu1 %v6309_v1 }
0x1390   : > { %5885 = vmatmul.mubr.msk.bf16.vlgmr.msra.gmra.mrb[60].mxu0 %vm766_vm1, %v3269_v33 }
0x1391   : > { %5890 = vmatprep.mubr.msk.bf16.mxu0 %vm6310_vm0, %v6309_v1  ;;  %5923 = vmatpush3.bf16.msra.mxu1 %v6217_v0 }
0x1392   : > { %5924 = vmatprep.subr.bf16.mxu1 %v6309_v1 }
0x1395   : > { %5925 = vmatpush3.bf16.msra.mxu1 %v6218_v7  ;;  %v5064_v7 = vld [vmem:[%s7514_s7 + $0x6] ss:$0 sm:$0xff] }
0x1396   : > { %5926 = vmatprep.subr.bf16.mxu1 %v6309_v1 }
0x1399   : > { %5927 = vmatpush3.bf16.msra.mxu1 %v6220_v8 }
0x139a   : > { %5928 = vmatprep.subr.bf16.mxu1 %v6309_v1 }
0x139d   : > { %5929 = vmatpush3.bf16.msra.mxu1 %v6222_v48 }
0x139e   : > { %5930 = vmatprep.subr.bf16.mxu1 %v6309_v1 }
0x13a1   : > { %5931 = vmatpush3.bf16.msra.mxu1 %v6224_v9 }
0x13a2   : > { %5932 = vmatprep.subr.bf16.mxu1 %v6309_v1 }
0x13a5   : > { %5933 = vmatpush3.bf16.msra.mxu1 %v6226_v11 }
0x13a6   : > { %5934 = vmatprep.subr.bf16.mxu1 %v6309_v1 }
0x13a9   : > { %5935 = vmatpush3.bf16.msra.mxu1 %v6228_v12  ;;  %v6240_v12 = vld [vmem:[%s7511_s4 + $0x1c0] sm:$0xff]  }
0x13aa   : > { %5960 = vmatprep.subr.bf16.mxu1 %v6309_v1 }
0x13ac   : > { %5937 = vmatmul.mubr.bf16.vlgmr.msra.gmra.mrb[72].mxu1 %v6468_v19 }
0x13ad   : > { %5962 = vmatprep.mubr.msk.bf16.mxu1 %vm6310_vm0, %v6309_v1 }
0x145f   : > { %v3263_v50 = vpop.f32.mrb[68].mxu1 }
0x1460   : > { %v3264_v51 = vadd.f32 %v4980_v49, %v3263_v50  ;;  %v5880_v52 = vpop.f32.mrb[69].mxu1  ;;  %v6234_v49 = vld [vmem:[%s7513_s6 + $0x190] sm:$0xff]   ;;  %v6235_v50 = vld [vmem:[%s7513_s6 + $0x198] sm:$0xff]  }
0x1461   : > { %v3266_v53 = vpop.f32.mrb[70].mxu1  ;;  %v6237_v52 = vld [vmem:[%s7513_s6 + $0x1a8] sm:$0xff]  }
0x1462   : > { %v3330_v54 = vpack.c.bf16 %v3264_v51, %v3264_v51  ;;  %v5881_v55 = vpop.f32.mrb[71].mxu1  ;;  %v6236_v51 = vld [vmem:[%s7513_s6 + $0x1a0] sm:$0xff]   ;;  %v6238_v53 = vld [vmem:[%s7513_s6 + $0x1b0] sm:$0xff]  }
0x1463   : > { %v3311_v42 = vpop.f32.mrb[60].mxu0 }
0x1464   : > { %v3317_v43 = vmul.f32 0.25, %v3311_v42  ;;  %v5886_v44 = vpop.f32.mrb[61].mxu0  ;;  %v3335_v56 = vsel %vm831_vm3, %v3330_v54, 0  ;;  %v6239_v54 = vld [vmem:[%s7513_s6 + $0x1b8] sm:$0xff]  }
0x1465   : > { %v3314_v45 = vpop.f32.mrb[62].mxu0  ;;  %5889 = vmatpush3.bf16.msra.mxu0 %v3335_v56 }
0x1466   : > { %v5887_v46 = vpop.f32.mrb[63].mxu0  ;;  %v3318_v47 = vsel %vm814_vm2, %v3317_v43, -inf  ;;  %5894 = vmatprep.subr.bf16.mxu0 %v6309_v1 }
0x1467   : > { %3319 = vmax.xlane.f32.xlu0 %v3318_v47  ;;  %v6233_v47 = vld [vmem:[%s7513_s6 + $0x188] sm:$0xff]  }
0x147f   : > { %v3651_v29 = vpop.f32.mrb[72].mxu1 }
0x1480   : > { %v3652_v30 = vadd.f32 %v5038_v28, %v3651_v29  ;;  %v5938_v31 = vpop.f32.mrb[73].mxu1  ;;  %v6244_v28 = vld [vmem:[%s7509_s2 + $0x1c0] sm:$0xff]  }
0x1481   : > { %v3654_v32 = vpop.f32.mrb[74].mxu1 }
0x1482   : > { %v3771_v33 = vpack.c.bf16 %v3652_v30, %v3652_v30  ;;  %v5939_v34 = vpop.f32.mrb[75].mxu1 }
0x1483   : > { %v6248_v34 = vld [vmem:[%s7509_s2 + $0x1d0] sm:$0xff]  }
0x1484   : > { %v3776_v10 = vsel %vm766_vm1, %v3771_v33, 0  ;;  %v6246_v33 = vld [vmem:[%s7509_s2 + $0x1c8] sm:$0xff]  }
0x1485   : > { %5961 = vmatpush3.bf16.xpose.msra.mxu1 %v3776_v10  ;;  %v6250_v10 = vld [vmem:[%s7509_s2 + $0x1d8] sm:$0xff]  }
0x1486   : > { %5966 = vmatprep.subr.bf16.mxu1 %v6309_v1 }
0x14f4   : > { %v3320_v57 = vpop.xlane.xlu0 %3319 }
0x14f5   : > { %v3321_v58 = vsub.f32 %v3317_v43, %v3320_v57 }
0x14f7   : > { %v3322_v59 = vmul.f32 1.442695, %v3321_v58 }
0x14f9   : > { %6286 = vpow2.f32 %v3322_v59 }
0x1503   : > { %v6287_v60 = vpop.eup %6286 }
0x1504   : > { %v3324_v62 = vsel %vm814_vm2, %v6287_v60, 0.0 }
0x1505   : > { %3325 = vadd.xlane.f32.xlu1 %v3324_v62 }
0x1592   : > { %v3326_v2 = vpop.xlane.xlu1 %3325 }
0x1593   : > { %6288 = vrcp.f32 %v3326_v2 }
0x159d   : > { %v6289_v3 = vpop.eup %6288 }
0x159e   : > { %v3328_v4 = vmul.f32 %v6289_v3, %v6287_v60 }
0x15a0   : > { %v3329_v6 = vpack.c.bf16 %v3328_v4, %v3328_v4 }
0x15a2   : > { %5891 = vmatmul.mubr.msk.bf16.vlgmr.msra.gmra.mrb[64].mxu0 %vm814_vm2, %v3329_v6 }
0x15a3   : > { %5895 = vmatpush3.bf16.msra.mxu0 %v6216_v5  ;;  %5896 = vmatprep.mubr.msk.bf16.mxu0 %vm6310_vm0, %v6309_v1 }
0x15a4   : > { %5900 = vmatprep.subr.bf16.mxu0 %v6309_v1 }
0x1675   : > { %v3371_v13 = vpop.f32.mrb[64].mxu0 }
0x1676   : > { %v3377_v15 = vpack.c.bf16 %v3371_v13, %v3371_v13  ;;  %v5892_v16 = vpop.f32.mrb[65].mxu0  ;;  %v6242_v13 = vld [vmem:[%s7511_s4 + $0x1c8] sm:$0xff]  }
0x1677   : > { %v3374_v17 = vpop.f32.mrb[66].mxu0 }
0x1678   : > { %v5893_v18 = vpop.f32.mrb[67].mxu0  ;;  %5897 = vmatmul.mubr.msk.bf16.vlgmr.msra.gmra.mrb[68].mxu0 %vm766_vm1, %v3377_v15  ;;  %v6241_v17 = vld [vmem:[%s7515_s8 + $0x30] sm:$0xff]  }
0x1679   : > { %5901 = vmatpush3.bf16.msra.mxu0 %v6219_v14  ;;  %5916 = vmatprep.mubr.msk.bf16.mxu0 %vm6310_vm0, %v6309_v1 }
0x167a   : > { %5902 = vmatprep.subr.bf16.mxu0 %v6309_v1 }
0x167d   : > { %5903 = vmatpush3.bf16.msra.mxu0 %v6221_v21  ;;  %v6243_v21 = vld [vmem:[%s7511_s4 + $0x1d0] sm:$0xff]  }
0x167e   : > { %5904 = vmatprep.subr.bf16.mxu0 %v6309_v1 }
0x1681   : > { %5905 = vmatpush3.bf16.msra.mxu0 %v6223_v22  ;;  %v6245_v22 = vld [vmem:[%s7511_s4 + $0x1d8] sm:$0xff]  }
0x1682   : > { %5906 = vmatprep.subr.bf16.mxu0 %v6309_v1 }
0x1685   : > { %5907 = vmatpush3.bf16.msra.mxu0 %v6225_v61  ;;  %v6247_v61 = vld [vmem:[%s7511_s4 + $0x1e0] sm:$0xff]  }
0x1686   : > { %5908 = vmatprep.subr.bf16.mxu0 %v6309_v1 }
0x1689   : > { %5909 = vmatpush3.bf16.msra.mxu0 %v6227_v23  ;;  %v6249_v23 = vld [vmem:[%s7511_s4 + $0x1e8] sm:$0xff]  }
0x168a   : > { %5910 = vmatprep.subr.bf16.mxu0 %v6309_v1 }
0x168d   : > { %5911 = vmatpush3.bf16.msra.mxu0 %v6229_v25  ;;  %v6251_v25 = vld [vmem:[%s7511_s4 + $0x1f0] sm:$0xff]  }
0x168e   : > { %5912 = vmatprep.subr.bf16.mxu0 %v6309_v1 }
0x1691   : > { %5913 = vmatpush3.bf16.msra.mxu0 %v6230_v26  ;;  %v6253_v26 = vld [vmem:[%s7511_s4 + $0x1f8] sm:$0xff]  }
0x1692   : > { %5914 = vmatprep.subr.bf16.mxu0 %v6309_v1 }
0x1695   : > { %5915 = vmatpush3.bf16.msra.mxu0 %v6231_v27 }
0x1696   : > { %5940 = vmatprep.subr.bf16.mxu0 %v6309_v1 }
0x1698   : > { %5917 = vmatmul.mubr.bf16.vlgmr.msra.gmra.mrb[72].mxu0 %v6471_v20 }
0x1699   : > { %5956 = vmatprep.mubr.msk.bf16.mxu0 %vm6310_vm0, %v6309_v1 }
0x174b   : > { %v3424_v35 = vpop.f32.mrb[68].mxu0 }
0x174c   : > { %v7299_v36 = vadd.f32 %v3424_v35, %v7163_v24  ;;  %v5898_v37 = vpop.f32.mrb[69].mxu0  ;;  %v6232_v24 = vld [vmem:[%s7513_s6 + $0x180] sm:$0xff]  }
0x174d   : > { %v3427_v38 = vpop.f32.mrb[70].mxu0  ;;  %5941 = vmatpush3.bf16.msra.mxu0 %v6232_v24  ;;  %v6252_v35 = vld [vmem:[%s7509_s2 + $0x1e0] sm:$0xff]   ;;  %v6254_v37 = vld [vmem:[%s7509_s2 + $0x1e8] sm:$0xff]  }
0x174e   : > { %v5899_v39 = vpop.f32.mrb[71].mxu0  ;;  %5942 = vmatprep.subr.bf16.mxu0 %v6309_v1  ;;  %v6255_v38 = vld [vmem:[%s7509_s2 + $0x1f0] sm:$0xff]  }
0x174f   : > { %v6256_v39 = vld [vmem:[%s7509_s2 + $0x1f8] sm:$0xff]  }
0x1751   : > { %5943 = vmatpush3.bf16.msra.mxu0 %v6233_v47 }
0x1752   : > { %5944 = vmatprep.subr.bf16.mxu0 %v6309_v1 }
0x1755   : > { %5945 = vmatpush3.bf16.msra.mxu0 %v6234_v49 }
0x1756   : > { %5946 = vmatprep.subr.bf16.mxu0 %v6309_v1 }
0x1759   : > { %5947 = vmatpush3.bf16.msra.mxu0 %v6235_v50 }
0x175a   : > { %5948 = vmatprep.subr.bf16.mxu0 %v6309_v1 }
0x175d   : > { %5949 = vmatpush3.bf16.msra.mxu0 %v6236_v51 }
0x175e   : > { %5950 = vmatprep.subr.bf16.mxu0 %v6309_v1 }
0x1761   : > { %5951 = vmatpush3.bf16.msra.mxu0 %v6237_v52  ;;  %v5096_v52 = vld [vmem:[%s7510_s3 + $0x7] ss:$0 sm:$0xff] }
0x1762   : > { %5952 = vmatprep.subr.bf16.mxu0 %v6309_v1 }
0x1765   : > { %5953 = vmatpush3.bf16.msra.mxu0 %v6238_v53 }
0x1766   : > { %5954 = vmatprep.subr.bf16.mxu0 %v6309_v1 }
0x1769   : > { %5955 = vmatpush3.bf16.msra.mxu0 %v6239_v54 }
0x176a   : > { %5998 = vmatprep.subr.bf16.mxu0 %v6309_v1 }
0x176b   : > { %v3538_v41 = vpop.f32.mrb[72].mxu0 }
0x176c   : > { %v3539_v42 = vadd.f32 %v5012_v40, %v3538_v41  ;;  %v5918_v43 = vpop.f32.mrb[73].mxu0  ;;  %5957 = vmatmul.mubr.bf16.vlgmr.msra.gmra.mrb[76].mxu0 %v6468_v19  ;;  %v5122_v40 = vld [vmem:[%s7512_s5 + $0x7] ss:$0 sm:$0xff] }
0x176d   : > { %v3541_v44 = vpop.f32.mrb[74].mxu0  ;;  %6014 = vmatprep.mubr.msk.bf16.mxu0 %vm6310_vm0, %v6309_v1  ;;  %5999 = vmatpush3.bf16.msra.mxu0 %v6240_v12 }
0x176e   : > { %v3770_v45 = vpack.c.bf16 %v3539_v42, %v3539_v42  ;;  %v5919_v46 = vpop.f32.mrb[75].mxu0  ;;  %6000 = vmatprep.subr.bf16.mxu0 %v6309_v1 }
0x1770   : > { %5963 = vmatmul.mubr.msk.bf16.vlgmr.msra.gmra.mrb[76].mxu1 %vm766_vm1, %v3770_v45 }
0x1771   : > { %5968 = vmatprep.mubr.msk.bf16.mxu1 %vm6310_vm0, %v6309_v1  ;;  %6001 = vmatpush3.bf16.msra.mxu0 %v6242_v13 }
0x1772   : > { %6002 = vmatprep.subr.bf16.mxu0 %v6309_v1 }
0x1775   : > { %6003 = vmatpush3.bf16.msra.mxu0 %v6243_v21 }
0x1776   : > { %6004 = vmatprep.subr.bf16.mxu0 %v6309_v1 }
0x1779   : > { %6005 = vmatpush3.bf16.msra.mxu0 %v6245_v22 }
0x177a   : > { %6006 = vmatprep.subr.bf16.mxu0 %v6309_v1 }
0x177d   : > { %6007 = vmatpush3.bf16.msra.mxu0 %v6247_v61 }
0x177e   : > { %6008 = vmatprep.subr.bf16.mxu0 %v6309_v1 }
0x1781   : > { %6009 = vmatpush3.bf16.msra.mxu0 %v6249_v23 }
0x1782   : > { %6010 = vmatprep.subr.bf16.mxu0 %v6309_v1 }
0x1785   : > { %6011 = vmatpush3.bf16.msra.mxu0 %v6251_v25 }
0x1786   : > { %6012 = vmatprep.subr.bf16.mxu0 %v6309_v1 }
0x1789   : > { %6013 = vmatpush3.bf16.msra.mxu0 %v6253_v26 }
0x178a   : > { %6038 = vmatprep.subr.bf16.mxu0 %v6309_v1 }
0x178c   : > { %6015 = vmatmul.mubr.bf16.vlgmr.msra.gmra.mrb[80].mxu0 %v6468_v19 }
0x178d   : > { %6040 = vmatprep.mubr.msk.bf16.mxu0 %vm6310_vm0, %v6309_v1 }
0x183f   : > { %v3764_v4 = vpop.f32.mrb[76].mxu0 }
0x1840   : > { %v5958_v5 = vpop.f32.mrb[77].mxu0  ;;  %v3765_v48 = vadd.f32 %v5064_v7, %v3764_v4 }
0x1841   : > { %v3767_v6 = vpop.f32.mrb[78].mxu0 }
0x1842   : > { %v5959_v8 = vpop.f32.mrb[79].mxu0  ;;  %v3831_v9 = vpack.c.bf16 %v3765_v48, %v3765_v48 }
0x1843   : > { %v3812_v55 = vpop.f32.mrb[76].mxu1 }
0x1844   : > { %v3818_v56 = vmul.f32 0.25, %v3812_v55  ;;  %v5964_v57 = vpop.f32.mrb[77].mxu1  ;;  %v3836_v11 = vsel %vm831_vm3, %v3831_v9, 0  ;;  %v5148_v9 = vld [vmem:[%s7514_s7 + $0x7] ss:$0 sm:$0xff] }
0x1845   : > { %v3815_v58 = vpop.f32.mrb[78].mxu1  ;;  %5967 = vmatpush3.bf16.msra.mxu1 %v3836_v11 }
0x1846   : > { %v5965_v59 = vpop.f32.mrb[79].mxu1  ;;  %v3819_v60 = vsel %vm814_vm2, %v3818_v56, -inf  ;;  %5972 = vmatprep.subr.bf16.mxu1 %v6309_v1 }
0x1847   : > { %3820 = vmax.xlane.f32.xlu0 %v3819_v60  ;;  %v6258_v59 = vld [vmem:[%s7513_s6 + $0x1c8] sm:$0xff]   ;;  %v6259_v60 = vld [vmem:[%s7513_s6 + $0x1d0] sm:$0xff]  }
0x185f   : > { %v4152_v41 = vpop.f32.mrb[80].mxu0 }
0x1860   : > { %v4153_v42 = vadd.f32 %v5122_v40, %v4152_v41  ;;  %v6016_v43 = vpop.f32.mrb[81].mxu0 }
0x1861   : > { %v4155_v44 = vpop.f32.mrb[82].mxu0 }
0x1862   : > { %v4272_v45 = vpack.c.bf16 %v4153_v42, %v4153_v42  ;;  %v6017_v46 = vpop.f32.mrb[83].mxu0 }
0x1864   : > { %v4277_v24 = vsel %vm766_vm1, %v4272_v45, 0 }
0x1865   : > { %6039 = vmatpush3.bf16.xpose.msra.mxu0 %v4277_v24 }
0x1866   : > { %6044 = vmatprep.subr.bf16.mxu0 %v6309_v1 }
0x18d4   : > { %v3821_v62 = vpop.xlane.xlu0 %3820 }
0x18d5   : > { %v3822_v63 = vsub.f32 %v3818_v56, %v3821_v62  ;;  %v6260_v62 = vld [vmem:[%s7513_s6 + $0x1d8] sm:$0xff]  }
0x18d7   : > { %v3823_v0 = vmul.f32 1.442695, %v3822_v63  ;;  %v6261_v63 = vld [vmem:[%s7513_s6 + $0x1e0] sm:$0xff]  }
0x18d9   : > { %6290 = vpow2.f32 %v3823_v0  ;;  %v6262_v0 = vld [vmem:[%s7513_s6 + $0x1e8] sm:$0xff]  }
0x18e3   : > { %v6291_v2 = vpop.eup %6290 }
0x18e4   : > { %v3825_v3 = vsel %vm814_vm2, %v6291_v2, 0.0 }
0x18e5   : > { %3826 = vadd.xlane.f32.xlu1 %v3825_v3  ;;  %v6264_v3 = vld [vmem:[%s7513_s6 + $0x1f8] sm:$0xff]  }
0x1972   : > { %v3827_v14 = vpop.xlane.xlu1 %3826 }
0x1973   : > { %6292 = vrcp.f32 %v3827_v14 }
0x197d   : > { %v6293_v15 = vpop.eup %6292 }
0x197e   : > { %v3829_v16 = vmul.f32 %v6293_v15, %v6291_v2  ;;  %v6263_v2 = vld [vmem:[%s7513_s6 + $0x1f0] sm:$0xff]  }
0x1980   : > { %v3830_v18 = vpack.c.bf16 %v3829_v16, %v3829_v16 }
0x1982   : > { %5969 = vmatmul.mubr.msk.bf16.vlgmr.msra.gmra.mrb[80].mxu1 %vm814_vm2, %v3830_v18 }
0x1983   : > { %5973 = vmatpush3.bf16.msra.mxu1 %v6241_v17  ;;  %5974 = vmatprep.mubr.msk.bf16.mxu1 %vm6310_vm0, %v6309_v1 }
0x1984   : > { %5978 = vmatprep.subr.bf16.mxu1 %v6309_v1 }
0x1a55   : > { %v3872_v27 = vpop.f32.mrb[80].mxu1 }
0x1a56   : > { %v3878_v29 = vpack.c.bf16 %v3872_v27, %v3872_v27  ;;  %v5970_v30 = vpop.f32.mrb[81].mxu1  ;;  %v6265_v27 = vld [vmem:[%s7515_s8 + $0x38] sm:$0xff]  }
0x1a57   : > { %v3875_v31 = vpop.f32.mrb[82].mxu1 }
0x1a58   : > { %v5971_v32 = vpop.f32.mrb[83].mxu1  ;;  %5975 = vmatmul.mubr.msk.bf16.vlgmr.msra.gmra.mrb[84].mxu1 %vm766_vm1, %v3878_v29 }
0x1a59   : > { %5979 = vmatpush3.bf16.msra.mxu1 %v6244_v28  ;;  %5994 = vmatprep.mubr.msk.bf16.mxu1 %vm6310_vm0, %v6309_v1 }
0x1a5a   : > { %5980 = vmatprep.subr.bf16.mxu1 %v6309_v1 }
0x1a5d   : > { %5981 = vmatpush3.bf16.msra.mxu1 %v6246_v33 }
0x1a5e   : > { %5982 = vmatprep.subr.bf16.mxu1 %v6309_v1 }
0x1a61   : > { %5983 = vmatpush3.bf16.msra.mxu1 %v6248_v34 }
0x1a62   : > { %5984 = vmatprep.subr.bf16.mxu1 %v6309_v1 }
0x1a65   : > { %5985 = vmatpush3.bf16.msra.mxu1 %v6250_v10 }
0x1a66   : > { %5986 = vmatprep.subr.bf16.mxu1 %v6309_v1 }
0x1a69   : > { %5987 = vmatpush3.bf16.msra.mxu1 %v6252_v35 }
0x1a6a   : > { %5988 = vmatprep.subr.bf16.mxu1 %v6309_v1 }
0x1a6d   : > { %5989 = vmatpush3.bf16.msra.mxu1 %v6254_v37 }
0x1a6e   : > { %5990 = vmatprep.subr.bf16.mxu1 %v6309_v1 }
0x1a71   : > { %5991 = vmatpush3.bf16.msra.mxu1 %v6255_v38  ;;  %v5163_v38 = vld [vmem:[%s7516_s9] ss:$0 sm:$0xff] }
0x1a72   : > { %5992 = vmatprep.subr.bf16.mxu1 %v6309_v1 }
0x1a75   : > { %5993 = vmatpush3.bf16.msra.mxu1 %v6256_v39  ;;  %v6300_v39 = vld [vmem:[%s6457_s24] sm:$0xff] }
0x1a76   : > { %6018 = vmatprep.subr.bf16.mxu1 %v6309_v1 }
0x1a78   : > { %5995 = vmatmul.mubr.bf16.vlgmr.msra.gmra.mrb[88].mxu1 %v6471_v20 }
0x1a79   : > { %6034 = vmatprep.mubr.msk.bf16.mxu1 %vm6310_vm0, %v6309_v1 }
0x1b2b   : > { %v3925_v47 = vpop.f32.mrb[84].mxu1 }
0x1b2c   : > { %v7435_v20 = vadd.f32 %v3925_v47, %v7299_v36  ;;  %v5976_v49 = vpop.f32.mrb[85].mxu1  ;;  %v6257_v36 = vld [vmem:[%s7513_s6 + $0x1c0] sm:$0xff]  }
0x1b2d   : > { %v3928_v50 = vpop.f32.mrb[86].mxu1  ;;  %6019 = vmatpush3.bf16.msra.mxu1 %v6257_v36  ;;  %v5164_v49 = vld [vmem:[%s7517_s10] ss:$0 sm:$0xff] }
0x1b2e   : > { %v5977_v51 = vpop.f32.mrb[87].mxu1  ;;  %6020 = vmatprep.subr.bf16.mxu1 %v6309_v1 }
0x1b2f   : > { %v5165_v51 = vld [vmem:[%s7518_s11] ss:$0 sm:$0xff] }
0x1b31   : > { %6021 = vmatpush3.bf16.msra.mxu1 %v6258_v59 }
0x1b32   : > { %6022 = vmatprep.subr.bf16.mxu1 %v6309_v1 }
0x1b35   : > { %6023 = vmatpush3.bf16.msra.mxu1 %v6259_v60 }
0x1b36   : > { %6024 = vmatprep.subr.bf16.mxu1 %v6309_v1 }
0x1b39   : > { %6025 = vmatpush3.bf16.msra.mxu1 %v6260_v62 }
0x1b3a   : > { %6026 = vmatprep.subr.bf16.mxu1 %v6309_v1 }
0x1b3d   : > { %6027 = vmatpush3.bf16.msra.mxu1 %v6261_v63 }
0x1b3e   : > { %6028 = vmatprep.subr.bf16.mxu1 %v6309_v1 }
0x1b41   : > { %6029 = vmatpush3.bf16.msra.mxu1 %v6262_v0 }
0x1b42   : > { %6030 = vmatprep.subr.bf16.mxu1 %v6309_v1 }
0x1b45   : > { %6031 = vmatpush3.bf16.msra.mxu1 %v6263_v2 }
0x1b46   : > { %6032 = vmatprep.subr.bf16.mxu1 %v6309_v1 }
0x1b49   : > { %6033 = vmatpush3.bf16.msra.mxu1 %v6264_v3 }
0x1b4b   : > { %v4039_v53 = vpop.f32.mrb[88].mxu1 }
0x1b4c   : > { %v4040_v54 = vadd.f32 %v5096_v52, %v4039_v53  ;;  %v5996_v55 = vpop.f32.mrb[89].mxu1  ;;  %6035 = vmatmul.mubr.bf16.vlgmr.msra.gmra.mrb[92].mxu1 %v6468_v19 }
0x1b4d   : > { %v4042_v56 = vpop.f32.mrb[90].mxu1 }
0x1b4e   : > { %v4271_v57 = vpack.c.bf16 %v4040_v54, %v4040_v54  ;;  %v5997_v58 = vpop.f32.mrb[91].mxu1 }
0x1b50   : > { %6041 = vmatmul.mubr.msk.bf16.vlgmr.msra.gmra.mrb[84].mxu0 %vm766_vm1, %v4271_v57 }
0x1b51   : > { %6046 = vmatprep.mubr.msk.bf16.mxu0 %vm6310_vm0, %v6309_v1 }
0x1c1f   : > { %v4265_v11 = vpop.f32.mrb[92].mxu1 }
0x1c20   : > { %v4266_v12 = vadd.f32 %v5148_v9, %v4265_v11  ;;  %v6036_v13 = vpop.f32.mrb[93].mxu1 }
0x1c21   : > { %v4268_v14 = vpop.f32.mrb[94].mxu1 }
0x1c22   : > { %v4332_v15 = vpack.c.bf16 %v4266_v12, %v4266_v12  ;;  %v6037_v16 = vpop.f32.mrb[95].mxu1 }
0x1c23   : > { %v4313_v4 = vpop.f32.mrb[84].mxu0 }
0x1c24   : > { %v4319_v5 = vmul.f32 0.25, %v4313_v4  ;;  %v6042_v6 = vpop.f32.mrb[85].mxu0  ;;  %v4337_v19 = vsel %vm831_vm3, %v4332_v15, 0 }
0x1c25   : > { %v4316_v7 = vpop.f32.mrb[86].mxu0  ;;  %6045 = vmatpush3.bf16.msra.mxu0 %v4337_v19 }
0x1c26   : > { %v6043_v8 = vpop.f32.mrb[87].mxu0  ;;  %v4320_v48 = vsel %vm814_vm2, %v4319_v5, -inf  ;;  %6050 = vmatprep.subr.bf16.mxu0 %v6309_v1 }
0x1c27   : > { %4321 = vmax.xlane.f32.xlu0 %v4320_v48 }
0x1cb4   : > { %v4322_v17 = vpop.xlane.xlu0 %4321 }
0x1cb5   : > { %v4323_v18 = vsub.f32 %v4319_v5, %v4322_v17 }
0x1cb7   : > { %v4324_v21 = vmul.f32 1.442695, %v4323_v18 }
0x1cb9   : > { %6294 = vpow2.f32 %v4324_v21 }
0x1cc3   : > { %v6295_v22 = vpop.eup %6294 }
0x1cc4   : > { %v4326_v61 = vsel %vm814_vm2, %v6295_v22, 0.0 }
0x1cc5   : > { %4327 = vadd.xlane.f32.xlu1 %v4326_v61 }
0x1d52   : > { %v4328_v23 = vpop.xlane.xlu1 %4327 }
0x1d53   : > { %6296 = vrcp.f32 %v4328_v23 }
0x1d5d   : > { %v6297_v25 = vpop.eup %6296 }
0x1d5e   : > { %v4330_v26 = vmul.f32 %v6297_v25, %v6295_v22 }
0x1d60   : > { %v4331_v28 = vpack.c.bf16 %v4330_v26, %v4330_v26 }
0x1d62   : > { %6047 = vmatmul.mubr.msk.bf16.vlgmr.msra.gmra.mrb[88].mxu0 %vm814_vm2, %v4331_v28 }
0x1d63   : > { %6051 = vmatpush3.bf16.msra.mxu0 %v6265_v27  ;;  %6052 = vmatprep.mubr.msk.bf16.mxu0 %vm6310_vm0, %v6309_v1 }
0x1e35   : > { %v4373_v29 = vpop.f32.mrb[88].mxu0 }
0x1e36   : > { %v4379_v30 = vpack.c.bf16 %v4373_v29, %v4373_v29  ;;  %v6048_v31 = vpop.f32.mrb[89].mxu0 }
0x1e37   : > { %v4376_v32 = vpop.f32.mrb[90].mxu0 }
0x1e38   : > { %v6049_v33 = vpop.f32.mrb[91].mxu0  ;;  %6053 = vmatmul.mubr.msk.bf16.vlgmr.msra.gmra.mrb[92].mxu0 %vm766_vm1, %v4379_v30 }
0x1f0b   : > { %v4426_v34 = vpop.f32.mrb[92].mxu0 }
0x1f0c   : > { %v4432_v10 = vadd.f32 %v4426_v34, %v7435_v20  ;;  %v6054_v35 = vpop.f32.mrb[93].mxu0 }
0x1f0d   : > { %v4429_v37 = vpop.f32.mrb[94].mxu0 }
0x1f0e   : > { %v4433_v40 = vadd.f32 %v6300_v39, %v4432_v10  ;;  %v6055_v41 = vpop.f32.mrb[95].mxu0 }
0x1f10   : > { %v4441_v1 = vadd.f32 %v5163_v38, %v4433_v40 }
0x1f12   : > { %4442 = vadd.xlane.f32.xlu0 %v4441_v1 }
0x1f9f   : > { %v4443_v42 = vpop.xlane.xlu0 %4442 }
0x1fa0   : > { %v4445_v43 = vmul.f32 0.0078125, %v4443_v42 }
0x1fa2   : > { %v4446_v44 = vsub.f32 %v4441_v1, %v4445_v43 }
0x1fa4   : > { %v4447_v45 = vmul.f32 %v4446_v44, %v4446_v44 }
0x1fa6   : > { %4448 = vadd.xlane.f32.xlu1 %v4447_v45 }
0x2033   : > { %v4449_v46 = vpop.xlane.xlu1 %4448 }
0x2034   : > { %v4450_v24 = vmul.f32 0.0078125, %v4449_v46 }
0x2036   : > { %v4451_v47 = vadd.f32 1e-05, %v4450_v24 }
0x2038   : > { %6298 = vrsqrt.f32 %v4451_v47 }
0x2042   : > { %v6299_v20 = vpop.eup %6298 }
0x2043   : > { %v4453_v50 = vmul.f32 %v6299_v20, %v4446_v44 }
0x2045   : > { %v4461_v52 = vmul.f32 %v5164_v49, %v4453_v50 }
0x2047   : > { %v4469_v53 = vadd.f32 %v5165_v51, %v4461_v52 }
0x2049   : > { %4470 = vst [vmem:[%s425_s15] sm:$0xff] %v4469_v53 }
0x204a PF: > { %s22_s21 = sadd.s32 1, %s6307_s21  }
0x204b   : > { %p19_p4 = scmp.ge.s32.totalorder %s22_s21, 4  }
0x204d   :  { %21 = sbr.rel (!%p19_p4) target bundleno = 1 (0x1), region = 150 }

</bundles_post_ra>
